<compile_context>
chip_gen: v6e
topology: v6e:2x2x1
jax: 0.10.0
libtpu: 0.0.40
codegen_flags: <defaults>
</compile_context>

<pallas_src>
import jax
import jax.numpy as jnp
from jax.experimental import pallas as pl
from jax.experimental.pallas import tpu as pltpu


# ----------------------------------------------------------------------------
# Architecture constants (fixed by the PyTorch module)
# ----------------------------------------------------------------------------
CIN = 3            # Conv1 input channels
C1 = 128           # Conv1 output channels
KH1 = KW1 = 3      # Conv1 kernel
C2 = 64            # Conv2 output channels
KH2 = KW2 = 5      # Conv2 kernel
FC1 = 32           # Linear(64 -> 32)
NCLS = 5           # Linear(32 -> 5)
KP1 = 32           # Conv1 im2col K (3*3*3 = 27) zero-padded to a lane-friendly 32
NPAD = 128         # logits padded to a full 128-lane vector (unmasked output store)
B_TILE = 8         # samples per grid step (= one f32 sublane tile -> free reshapes)


# ----------------------------------------------------------------------------
# Fused kernel: conv1 GEMM + pool1 -> conv2 im2col GEMM -> pool2/adaptive -> MLP
# ----------------------------------------------------------------------------
def _make_kernel(b, oh1, ow1, ph1, pw1, oh2, ow2, ph2, pw2):
    def kernel(p_ref, w1_ref, b1_ref, w2_ref, b2_ref, w3_ref, b3_ref,
               w4_ref, b4_ref, o_ref):
        # ---- Conv1: one (OH1*OW1*B, 32) x (32, 128) bf16 GEMM ----------------
        p = p_ref[...]                                      # (oh1*ow1, b, 32) f32
        lhs1 = p.reshape(oh1 * ow1 * b, KP1).astype(jnp.bfloat16)
        c1 = jnp.dot(lhs1, w1_ref[...], preferred_element_type=jnp.float32)
        c1 = c1.reshape(oh1, ow1, b, C1)                    # rows ordered (i, j, s)

        # ---- MaxPool2d(2,2) (floor) fused; bias added once after pooling -----
        cw = c1[:, : 2 * pw1].reshape(oh1, pw1, 2, b, C1)
        rw = jnp.maximum(cw[:, :, 0], cw[:, :, 1])          # pool along W
        rh = rw[: 2 * ph1].reshape(ph1, 2, pw1, b, C1)
        p1 = jnp.maximum(rh[:, 0], rh[:, 1]) + b1_ref[...]  # (ph1, pw1, b, 128) f32

        # ---- Conv2: ONE im2col GEMM, K = 25*128 accumulated inside the MXU ---
        pieces = []
        for ki in range(KH2):
            for kj in range(KW2):
                blk = p1[ki:ki + oh2, kj:kj + ow2]          # (oh2, ow2, b, 128)
                pieces.append(blk.reshape(oh2 * ow2 * b, C1))
        lhs2 = jnp.concatenate(pieces, axis=-1).astype(jnp.bfloat16)   # (9b, 3200)
        c2 = jnp.dot(lhs2, w2_ref[...], preferred_element_type=jnp.float32)
        c2 = (c2 + b2_ref[...]).reshape(oh2, ow2, b, C2)    # rows ordered (oi, oj, s)

        # ---- MaxPool2d(2,2) + AdaptiveMaxPool2d((1,1)) (collapsed) -----------
        # TODO(synk): Dropout2d(p=0.1) uses eval/inference semantics (identity).
        feat = c2[0, 0]
        for oi in range(2 * ph2):
            for oj in range(2 * pw2):
                if oi or oj:
                    feat = jnp.maximum(feat, c2[oi, oj])    # (b, 64) f32

        # ---- Linear(64,32) -> ReLU -> Linear(32, 5 padded to 128) ------------
        h = jnp.dot(feat, w3_ref[...], preferred_element_type=jnp.float32) + b3_ref[...]
        h = jnp.maximum(h, 0.0)
        o_ref[...] = jnp.dot(h, w4_ref[...], preferred_element_type=jnp.float32) + b4_ref[...]

    return kernel


# ----------------------------------------------------------------------------
# XLA-side glue: conv1 im2col patches, sample-minor, K zero-padded 27 -> 32.
# Kept f32 at the pallas_call boundary so the in-kernel flatten (8-row groups)
# is layout-preserving; the bf16 cast happens at the MXU operand.
# TODO(synk): move the im2col fully into the kernel to avoid the XLA-materialized
#             patch tensor HBM round trip.
# ----------------------------------------------------------------------------
def _conv1_patches(x_nhwc):
    n, h, w, c = x_nhwc.shape
    oh, ow = h - KH1 + 1, w - KW1 + 1
    cols = [x_nhwc[:, i:i + oh, j:j + ow, :] for i in range(KH1) for j in range(KW1)]
    p = jnp.concatenate(cols, axis=-1)                          # (N, OH, OW, 27)
    p = jnp.pad(p, ((0, 0), (0, 0), (0, 0), (0, KP1 - KH1 * KW1 * c)))
    p = p.reshape(n, oh * ow, KP1)                              # rows = i*OW + j
    return jnp.transpose(p, (1, 0, 2))                          # (OH*OW, N, 32) f32


def _const_spec(arr):
    """Whole-array VMEM block with a grid-constant index map (DMA'd once)."""
    nd = arr.ndim
    return pl.BlockSpec(arr.shape, lambda g, _nd=nd: (0,) * _nd)


# ----------------------------------------------------------------------------
# Full forward pass (accepts NCHW like the PyTorch module)
# ----------------------------------------------------------------------------
def backbone_forward(params, x_nchw):
    x = jnp.transpose(x_nchw, (0, 2, 3, 1)).astype(jnp.float32)     # NCHW -> NHWC
    n, h, w, c = x.shape
    assert c == CIN, c

    oh1, ow1 = h - KH1 + 1, w - KW1 + 1
    ph1, pw1 = oh1 // 2, ow1 // 2
    oh2, ow2 = ph1 - KH2 + 1, pw1 - KW2 + 1
    ph2, pw2 = oh2 // 2, ow2 // 2
    assert ph2 >= 1 and pw2 >= 1, "spatial input too small for this backbone"

    n_pad = ((n + B_TILE - 1) // B_TILE) * B_TILE
    if n_pad != n:
        x = jnp.pad(x, ((0, n_pad - n), (0, 0), (0, 0), (0, 0)))
    grid = (n_pad // B_TILE,)

    patches = _conv1_patches(x)                                     # (oh1*ow1, n_pad, 32)

    # Parameter packing (bf16 at MXU boundaries, f32 elsewhere).
    w1 = params["w1"].reshape(KH1 * KW1 * CIN, C1)
    w1 = jnp.pad(w1, ((0, KP1 - KH1 * KW1 * CIN), (0, 0))).astype(jnp.bfloat16)  # (32,128)
    b1 = params["b1"].reshape(1, C1).astype(jnp.float32)
    w2 = params["w2"].reshape(KH2 * KW2 * C1, C2).astype(jnp.bfloat16)           # (3200,64)
    b2 = params["b2"].reshape(1, C2).astype(jnp.float32)
    w3 = params["w3"].astype(jnp.float32)                                        # (64,32)
    b3 = params["b3"].reshape(1, FC1).astype(jnp.float32)
    w4 = jnp.zeros((FC1, NPAD), jnp.float32).at[:, :NCLS].set(params["w4"])      # (32,128)
    b4 = jnp.zeros((1, NPAD), jnp.float32).at[0, :NCLS].set(params["b4"])

    kernel = _make_kernel(B_TILE, oh1, ow1, ph1, pw1, oh2, ow2, ph2, pw2)

    out = pl.pallas_call(
        kernel,
        out_shape=jax.ShapeDtypeStruct((n_pad, NPAD), jnp.float32),
        grid_spec=pltpu.PrefetchScalarGridSpec(
            num_scalar_prefetch=0,
            grid=grid,
            in_specs=[
                pl.BlockSpec((oh1 * ow1, B_TILE, KP1), lambda g: (0, g, 0)),
                _const_spec(w1), _const_spec(b1),
                _const_spec(w2), _const_spec(b2),
                _const_spec(w3), _const_spec(b3),
                _const_spec(w4), _const_spec(b4),
            ],
            out_specs=pl.BlockSpec((B_TILE, NPAD), lambda g: (g, 0)),
        ),
        compiler_params=pltpu.CompilerParams(
            dimension_semantics=("parallel",),     # batch tiles across TensorCores (v7x)
            vmem_limit_bytes=32 * 1024 * 1024,     # safe on v5e/v6e/v7x; working set << limit
        ),
    )(patches, w1, b1, w2, b2, w3, b3, w4, b4)

    return out[:n, :NCLS]                                           # (N, 5)


# ----------------------------------------------------------------------------
# Parameter initialization (deterministic, synthetic)
# ----------------------------------------------------------------------------
def init_params(key):
    ks = jax.random.split(key, 8)

    def _w(k, shape, fan_in):
        return (jax.random.normal(k, shape, jnp.float32) / jnp.sqrt(fan_in)).astype(jnp.float32)

    return {
        "w1": _w(ks[0], (KH1, KW1, CIN, C1), KH1 * KW1 * CIN),   # Conv2d(3,128,3)  HWIO
        "b1": _w(ks[1], (C1,), KH1 * KW1 * CIN),
        "w2": _w(ks[2], (KH2, KW2, C1, C2), C1 * KH2 * KW2),     # Conv2d(128,64,5) HWIO
        "b2": _w(ks[3], (C2,), C1 * KH2 * KW2),
        "w3": _w(ks[4], (C2, FC1), C2),                          # Linear(64,32) (in,out)
        "b3": _w(ks[5], (FC1,), C2),
        "w4": _w(ks[6], (FC1, NCLS), FC1),                       # Linear(32,5)
        "b4": _w(ks[7], (NCLS,), FC1),
    }


# ----------------------------------------------------------------------------
if __name__ == "__main__":
    key = jax.random.PRNGKey(0)
    pkey, xkey = jax.random.split(key)

    params = init_params(pkey)

    # NCHW input like the PyTorch module: batch=2, channels=3 (fixed), 16x16 spatial
    # (smallest size that survives conv3 -> pool -> conv5 -> pool).
    x = jax.random.normal(xkey, (2, 3, 16, 16), jnp.float32)

    fwd = jax.jit(backbone_forward)
    out = jax.block_until_ready(fwd(params, x))

    assert out.shape == (2, 5), out.shape
    assert out.dtype == jnp.float32, out.dtype
    print("KERNEL_OK")
</pallas_src>

<mosaic_0001>
module attributes {stable_mosaic.version = 11 : i64} {
  func.func @kernel(%arg0: i32, %arg1: memref<196x8x32xf32, #tpu.memory_space<vmem>>, %arg2: memref<32x128xbf16, #tpu.memory_space<vmem>>, %arg3: memref<1x128xf32, #tpu.memory_space<vmem>>, %arg4: memref<3200x64xbf16, #tpu.memory_space<vmem>>, %arg5: memref<1x64xf32, #tpu.memory_space<vmem>>, %arg6: memref<64x32xf32, #tpu.memory_space<vmem>>, %arg7: memref<1x32xf32, #tpu.memory_space<vmem>>, %arg8: memref<32x128xf32, #tpu.memory_space<vmem>>, %arg9: memref<1x128xf32, #tpu.memory_space<vmem>>, %arg10: memref<8x128xf32, #tpu.memory_space<vmem>>) attributes {dimension_semantics = [#tpu.dimension_semantics<parallel>], iteration_bounds = array<i64: 1>, scalar_prefetch = 0 : i64, scratch_operands = 0 : i64, tpu.core_type = #tpu.core_type<tc>, window_params = [{transform_indices = @transform_0, window_bounds = array<i64: 196, 8, 32>}, {pipeline_mode = #tpu.pipeline_mode<synchronous>, transform_indices = @transform_1, window_bounds = array<i64: 32, 128>}, {pipeline_mode = #tpu.pipeline_mode<synchronous>, transform_indices = @transform_2, window_bounds = array<i64: 1, 128>}, {pipeline_mode = #tpu.pipeline_mode<synchronous>, transform_indices = @transform_3, window_bounds = array<i64: 3200, 64>}, {pipeline_mode = #tpu.pipeline_mode<synchronous>, transform_indices = @transform_4, window_bounds = array<i64: 1, 64>}, {pipeline_mode = #tpu.pipeline_mode<synchronous>, transform_indices = @transform_5, window_bounds = array<i64: 64, 32>}, {pipeline_mode = #tpu.pipeline_mode<synchronous>, transform_indices = @transform_6, window_bounds = array<i64: 1, 32>}, {pipeline_mode = #tpu.pipeline_mode<synchronous>, transform_indices = @transform_7, window_bounds = array<i64: 32, 128>}, {pipeline_mode = #tpu.pipeline_mode<synchronous>, transform_indices = @transform_8, window_bounds = array<i64: 1, 128>}, {transform_indices = @transform_9, window_bounds = array<i64: 8, 128>}]} {
    %c0 = arith.constant 0 : index
    %c0_0 = arith.constant 0 : index
    %c0_1 = arith.constant 0 : index
    %0 = vector.load %arg1[%c0, %c0_0, %c0_1] : memref<196x8x32xf32, #tpu.memory_space<vmem>>, vector<196x8x32xf32>
    %1 = vector.shape_cast %0 : vector<196x8x32xf32> to vector<1568x32xf32>
    %2 = arith.truncf %1 : vector<1568x32xf32> to vector<1568x32xbf16>
    %c0_2 = arith.constant 0 : index
    %c0_3 = arith.constant 0 : index
    %3 = vector.load %arg2[%c0_2, %c0_3] : memref<32x128xbf16, #tpu.memory_space<vmem>>, vector<32x128xbf16>
    %cst = arith.constant dense<0.000000e+00> : vector<1568x128xf32>
    %4 = tpu.matmul %2, %3, %cst {dimension_numbers = #tpu.dot_dimension_numbers<[1], [0], [0], [1], [0, 0, 1, 1], [], []>} : vector<1568x32xbf16>, vector<32x128xbf16>, vector<1568x128xf32> -> vector<1568x128xf32>
    %5 = vector.shape_cast %4 : vector<1568x128xf32> to vector<14x14x8x128xf32>
    %6 = vector.shape_cast %5 : vector<14x14x8x128xf32> to vector<14x7x2x8x128xf32>
    %7 = vector.extract_strided_slice %6 {offsets = [0, 0, 0, 0, 0], sizes = [14, 7, 1, 8, 128], strides = [1, 1, 1, 1, 1]} : vector<14x7x2x8x128xf32> to vector<14x7x1x8x128xf32>
    %8 = vector.shape_cast %7 : vector<14x7x1x8x128xf32> to vector<14x7x8x128xf32>
    %9 = vector.extract_strided_slice %6 {offsets = [0, 0, 1, 0, 0], sizes = [14, 7, 1, 8, 128], strides = [1, 1, 1, 1, 1]} : vector<14x7x2x8x128xf32> to vector<14x7x1x8x128xf32>
    %10 = vector.shape_cast %9 : vector<14x7x1x8x128xf32> to vector<14x7x8x128xf32>
    %11 = arith.maximumf %8, %10 : vector<14x7x8x128xf32>
    %12 = vector.shape_cast %11 : vector<14x7x8x128xf32> to vector<7x2x7x8x128xf32>
    %13 = vector.extract_strided_slice %12 {offsets = [0, 0, 0, 0, 0], sizes = [7, 1, 7, 8, 128], strides = [1, 1, 1, 1, 1]} : vector<7x2x7x8x128xf32> to vector<7x1x7x8x128xf32>
    %14 = vector.shape_cast %13 : vector<7x1x7x8x128xf32> to vector<7x7x8x128xf32>
    %15 = vector.extract_strided_slice %12 {offsets = [0, 1, 0, 0, 0], sizes = [7, 1, 7, 8, 128], strides = [1, 1, 1, 1, 1]} : vector<7x2x7x8x128xf32> to vector<7x1x7x8x128xf32>
    %16 = vector.shape_cast %15 : vector<7x1x7x8x128xf32> to vector<7x7x8x128xf32>
    %17 = arith.maximumf %14, %16 : vector<7x7x8x128xf32>
    %c0_4 = arith.constant 0 : index
    %c0_5 = arith.constant 0 : index
    %18 = vector.load %arg3[%c0_4, %c0_5] : memref<1x128xf32, #tpu.memory_space<vmem>>, vector<1x128xf32>
    %19 = vector.shape_cast %18 : vector<1x128xf32> to vector<1x1x1x128xf32>
    %20 = vector.broadcast %19 : vector<1x1x1x128xf32> to vector<7x7x8x128xf32>
    %21 = arith.addf %17, %20 : vector<7x7x8x128xf32>
    %22 = vector.extract_strided_slice %21 {offsets = [0, 0, 0, 0], sizes = [3, 3, 8, 128], strides = [1, 1, 1, 1]} : vector<7x7x8x128xf32> to vector<3x3x8x128xf32>
    %23 = vector.shape_cast %22 : vector<3x3x8x128xf32> to vector<72x128xf32>
    %24 = vector.extract_strided_slice %21 {offsets = [0, 1, 0, 0], sizes = [3, 3, 8, 128], strides = [1, 1, 1, 1]} : vector<7x7x8x128xf32> to vector<3x3x8x128xf32>
    %25 = vector.shape_cast %24 : vector<3x3x8x128xf32> to vector<72x128xf32>
    %26 = vector.extract_strided_slice %21 {offsets = [0, 2, 0, 0], sizes = [3, 3, 8, 128], strides = [1, 1, 1, 1]} : vector<7x7x8x128xf32> to vector<3x3x8x128xf32>
    %27 = vector.shape_cast %26 : vector<3x3x8x128xf32> to vector<72x128xf32>
    %28 = vector.extract_strided_slice %21 {offsets = [0, 3, 0, 0], sizes = [3, 3, 8, 128], strides = [1, 1, 1, 1]} : vector<7x7x8x128xf32> to vector<3x3x8x128xf32>
    %29 = vector.shape_cast %28 : vector<3x3x8x128xf32> to vector<72x128xf32>
    %30 = vector.extract_strided_slice %21 {offsets = [0, 4, 0, 0], sizes = [3, 3, 8, 128], strides = [1, 1, 1, 1]} : vector<7x7x8x128xf32> to vector<3x3x8x128xf32>
    %31 = vector.shape_cast %30 : vector<3x3x8x128xf32> to vector<72x128xf32>
    %32 = vector.extract_strided_slice %21 {offsets = [1, 0, 0, 0], sizes = [3, 3, 8, 128], strides = [1, 1, 1, 1]} : vector<7x7x8x128xf32> to vector<3x3x8x128xf32>
    %33 = vector.shape_cast %32 : vector<3x3x8x128xf32> to vector<72x128xf32>
    %34 = vector.extract_strided_slice %21 {offsets = [1, 1, 0, 0], sizes = [3, 3, 8, 128], strides = [1, 1, 1, 1]} : vector<7x7x8x128xf32> to vector<3x3x8x128xf32>
    %35 = vector.shape_cast %34 : vector<3x3x8x128xf32> to vector<72x128xf32>
    %36 = vector.extract_strided_slice %21 {offsets = [1, 2, 0, 0], sizes = [3, 3, 8, 128], strides = [1, 1, 1, 1]} : vector<7x7x8x128xf32> to vector<3x3x8x128xf32>
    %37 = vector.shape_cast %36 : vector<3x3x8x128xf32> to vector<72x128xf32>
    %38 = vector.extract_strided_slice %21 {offsets = [1, 3, 0, 0], sizes = [3, 3, 8, 128], strides = [1, 1, 1, 1]} : vector<7x7x8x128xf32> to vector<3x3x8x128xf32>
    %39 = vector.shape_cast %38 : vector<3x3x8x128xf32> to vector<72x128xf32>
    %40 = vector.extract_strided_slice %21 {offsets = [1, 4, 0, 0], sizes = [3, 3, 8, 128], strides = [1, 1, 1, 1]} : vector<7x7x8x128xf32> to vector<3x3x8x128xf32>
    %41 = vector.shape_cast %40 : vector<3x3x8x128xf32> to vector<72x128xf32>
    %42 = vector.extract_strided_slice %21 {offsets = [2, 0, 0, 0], sizes = [3, 3, 8, 128], strides = [1, 1, 1, 1]} : vector<7x7x8x128xf32> to vector<3x3x8x128xf32>
    %43 = vector.shape_cast %42 : vector<3x3x8x128xf32> to vector<72x128xf32>
    %44 = vector.extract_strided_slice %21 {offsets = [2, 1, 0, 0], sizes = [3, 3, 8, 128], strides = [1, 1, 1, 1]} : vector<7x7x8x128xf32> to vector<3x3x8x128xf32>
    %45 = vector.shape_cast %44 : vector<3x3x8x128xf32> to vector<72x128xf32>
    %46 = vector.extract_strided_slice %21 {offsets = [2, 2, 0, 0], sizes = [3, 3, 8, 128], strides = [1, 1, 1, 1]} : vector<7x7x8x128xf32> to vector<3x3x8x128xf32>
    %47 = vector.shape_cast %46 : vector<3x3x8x128xf32> to vector<72x128xf32>
    %48 = vector.extract_strided_slice %21 {offsets = [2, 3, 0, 0], sizes = [3, 3, 8, 128], strides = [1, 1, 1, 1]} : vector<7x7x8x128xf32> to vector<3x3x8x128xf32>
    %49 = vector.shape_cast %48 : vector<3x3x8x128xf32> to vector<72x128xf32>
    %50 = vector.extract_strided_slice %21 {offsets = [2, 4, 0, 0], sizes = [3, 3, 8, 128], strides = [1, 1, 1, 1]} : vector<7x7x8x128xf32> to vector<3x3x8x128xf32>
    %51 = vector.shape_cast %50 : vector<3x3x8x128xf32> to vector<72x128xf32>
    %52 = vector.extract_strided_slice %21 {offsets = [3, 0, 0, 0], sizes = [3, 3, 8, 128], strides = [1, 1, 1, 1]} : vector<7x7x8x128xf32> to vector<3x3x8x128xf32>
    %53 = vector.shape_cast %52 : vector<3x3x8x128xf32> to vector<72x128xf32>
    %54 = vector.extract_strided_slice %21 {offsets = [3, 1, 0, 0], sizes = [3, 3, 8, 128], strides = [1, 1, 1, 1]} : vector<7x7x8x128xf32> to vector<3x3x8x128xf32>
    %55 = vector.shape_cast %54 : vector<3x3x8x128xf32> to vector<72x128xf32>
    %56 = vector.extract_strided_slice %21 {offsets = [3, 2, 0, 0], sizes = [3, 3, 8, 128], strides = [1, 1, 1, 1]} : vector<7x7x8x128xf32> to vector<3x3x8x128xf32>
    %57 = vector.shape_cast %56 : vector<3x3x8x128xf32> to vector<72x128xf32>
    %58 = vector.extract_strided_slice %21 {offsets = [3, 3, 0, 0], sizes = [3, 3, 8, 128], strides = [1, 1, 1, 1]} : vector<7x7x8x128xf32> to vector<3x3x8x128xf32>
    %59 = vector.shape_cast %58 : vector<3x3x8x128xf32> to vector<72x128xf32>
    %60 = vector.extract_strided_slice %21 {offsets = [3, 4, 0, 0], sizes = [3, 3, 8, 128], strides = [1, 1, 1, 1]} : vector<7x7x8x128xf32> to vector<3x3x8x128xf32>
    %61 = vector.shape_cast %60 : vector<3x3x8x128xf32> to vector<72x128xf32>
    %62 = vector.extract_strided_slice %21 {offsets = [4, 0, 0, 0], sizes = [3, 3, 8, 128], strides = [1, 1, 1, 1]} : vector<7x7x8x128xf32> to vector<3x3x8x128xf32>
    %63 = vector.shape_cast %62 : vector<3x3x8x128xf32> to vector<72x128xf32>
    %64 = vector.extract_strided_slice %21 {offsets = [4, 1, 0, 0], sizes = [3, 3, 8, 128], strides = [1, 1, 1, 1]} : vector<7x7x8x128xf32> to vector<3x3x8x128xf32>
    %65 = vector.shape_cast %64 : vector<3x3x8x128xf32> to vector<72x128xf32>
    %66 = vector.extract_strided_slice %21 {offsets = [4, 2, 0, 0], sizes = [3, 3, 8, 128], strides = [1, 1, 1, 1]} : vector<7x7x8x128xf32> to vector<3x3x8x128xf32>
    %67 = vector.shape_cast %66 : vector<3x3x8x128xf32> to vector<72x128xf32>
    %68 = vector.extract_strided_slice %21 {offsets = [4, 3, 0, 0], sizes = [3, 3, 8, 128], strides = [1, 1, 1, 1]} : vector<7x7x8x128xf32> to vector<3x3x8x128xf32>
    %69 = vector.shape_cast %68 : vector<3x3x8x128xf32> to vector<72x128xf32>
    %70 = vector.extract_strided_slice %21 {offsets = [4, 4, 0, 0], sizes = [3, 3, 8, 128], strides = [1, 1, 1, 1]} : vector<7x7x8x128xf32> to vector<3x3x8x128xf32>
    %71 = vector.shape_cast %70 : vector<3x3x8x128xf32> to vector<72x128xf32>
    %72 = tpu.concatenate %23, %25, %27, %29, %31, %33, %35, %37, %39, %41, %43, %45, %47, %49, %51, %53 in 1 : vector<72x128xf32>, vector<72x128xf32>, vector<72x128xf32>, vector<72x128xf32>, vector<72x128xf32>, vector<72x128xf32>, vector<72x128xf32>, vector<72x128xf32>, vector<72x128xf32>, vector<72x128xf32>, vector<72x128xf32>, vector<72x128xf32>, vector<72x128xf32>, vector<72x128xf32>, vector<72x128xf32>, vector<72x128xf32> -> vector<72x2048xf32>
    %73 = tpu.concatenate %55, %57, %59, %61, %63, %65, %67, %69, %71 in 1 : vector<72x128xf32>, vector<72x128xf32>, vector<72x128xf32>, vector<72x128xf32>, vector<72x128xf32>, vector<72x128xf32>, vector<72x128xf32>, vector<72x128xf32>, vector<72x128xf32> -> vector<72x1152xf32>
    %74 = tpu.concatenate %72, %73 in 1 : vector<72x2048xf32>, vector<72x1152xf32> -> vector<72x3200xf32>
    %75 = arith.truncf %74 : vector<72x3200xf32> to vector<72x3200xbf16>
    %c0_6 = arith.constant 0 : index
    %c0_7 = arith.constant 0 : index
    %76 = vector.load %arg4[%c0_6, %c0_7] : memref<3200x64xbf16, #tpu.memory_space<vmem>>, vector<3200x64xbf16>
    %cst_8 = arith.constant dense<0.000000e+00> : vector<72x64xf32>
    %77 = tpu.matmul %75, %76, %cst_8 {dimension_numbers = #tpu.dot_dimension_numbers<[1], [0], [0], [1], [0, 0, 1, 1], [], []>} : vector<72x3200xbf16>, vector<3200x64xbf16>, vector<72x64xf32> -> vector<72x64xf32>
    %c0_9 = arith.constant 0 : index
    %c0_10 = arith.constant 0 : index
    %78 = vector.load %arg5[%c0_9, %c0_10] : memref<1x64xf32, #tpu.memory_space<vmem>>, vector<1x64xf32>
    %79 = vector.broadcast %78 : vector<1x64xf32> to vector<72x64xf32>
    %80 = arith.addf %77, %79 : vector<72x64xf32>
    %81 = vector.shape_cast %80 : vector<72x64xf32> to vector<3x3x8x64xf32>
    %82 = vector.extract_strided_slice %81 {offsets = [0, 0, 0, 0], sizes = [1, 1, 8, 64], strides = [1, 1, 1, 1]} : vector<3x3x8x64xf32> to vector<1x1x8x64xf32>
    %83 = vector.shape_cast %82 : vector<1x1x8x64xf32> to vector<8x64xf32>
    %84 = vector.extract_strided_slice %81 {offsets = [0, 1, 0, 0], sizes = [1, 1, 8, 64], strides = [1, 1, 1, 1]} : vector<3x3x8x64xf32> to vector<1x1x8x64xf32>
    %85 = vector.shape_cast %84 : vector<1x1x8x64xf32> to vector<8x64xf32>
    %86 = arith.maximumf %83, %85 : vector<8x64xf32>
    %87 = vector.extract_strided_slice %81 {offsets = [1, 0, 0, 0], sizes = [1, 1, 8, 64], strides = [1, 1, 1, 1]} : vector<3x3x8x64xf32> to vector<1x1x8x64xf32>
    %88 = vector.shape_cast %87 : vector<1x1x8x64xf32> to vector<8x64xf32>
    %89 = arith.maximumf %86, %88 : vector<8x64xf32>
    %90 = vector.extract_strided_slice %81 {offsets = [1, 1, 0, 0], sizes = [1, 1, 8, 64], strides = [1, 1, 1, 1]} : vector<3x3x8x64xf32> to vector<1x1x8x64xf32>
    %91 = vector.shape_cast %90 : vector<1x1x8x64xf32> to vector<8x64xf32>
    %92 = arith.maximumf %89, %91 : vector<8x64xf32>
    %c0_11 = arith.constant 0 : index
    %c0_12 = arith.constant 0 : index
    %93 = vector.load %arg6[%c0_11, %c0_12] : memref<64x32xf32, #tpu.memory_space<vmem>>, vector<64x32xf32>
    %cst_13 = arith.constant dense<0.000000e+00> : vector<8x32xf32>
    %94 = tpu.matmul %92, %93, %cst_13 {dimension_numbers = #tpu.dot_dimension_numbers<[1], [0], [0], [1], [0, 0, 1, 1], [], []>} : vector<8x64xf32>, vector<64x32xf32>, vector<8x32xf32> -> vector<8x32xf32>
    %c0_14 = arith.constant 0 : index
    %c0_15 = arith.constant 0 : index
    %95 = vector.load %arg7[%c0_14, %c0_15] : memref<1x32xf32, #tpu.memory_space<vmem>>, vector<1x32xf32>
    %96 = vector.broadcast %95 : vector<1x32xf32> to vector<8x32xf32>
    %97 = arith.addf %94, %96 : vector<8x32xf32>
    %cst_16 = arith.constant 0.000000e+00 : f32
    %98 = vector.broadcast %cst_16 : f32 to vector<8x32xf32>
    %99 = arith.maximumf %97, %98 : vector<8x32xf32>
    %c0_17 = arith.constant 0 : index
    %c0_18 = arith.constant 0 : index
    %100 = vector.load %arg8[%c0_17, %c0_18] : memref<32x128xf32, #tpu.memory_space<vmem>>, vector<32x128xf32>
    %cst_19 = arith.constant dense<0.000000e+00> : vector<8x128xf32>
    %101 = tpu.matmul %99, %100, %cst_19 {dimension_numbers = #tpu.dot_dimension_numbers<[1], [0], [0], [1], [0, 0, 1, 1], [], []>} : vector<8x32xf32>, vector<32x128xf32>, vector<8x128xf32> -> vector<8x128xf32>
    %c0_20 = arith.constant 0 : index
    %c0_21 = arith.constant 0 : index
    %102 = vector.load %arg9[%c0_20, %c0_21] : memref<1x128xf32, #tpu.memory_space<vmem>>, vector<1x128xf32>
    %103 = vector.broadcast %102 : vector<1x128xf32> to vector<8x128xf32>
    %104 = arith.addf %101, %103 : vector<8x128xf32>
    %c0_22 = arith.constant 0 : index
    %c0_23 = arith.constant 0 : index
    %105 = vector.load %arg10[%c0_22, %c0_23] : memref<8x128xf32, #tpu.memory_space<vmem>>, vector<8x128xf32>
    tpu.vector_store %arg10[%c0_22, %c0_23], %104 {strides = array<i32>} : memref<8x128xf32, #tpu.memory_space<vmem>>, vector<8x128xf32>,
    return
  }
  func.func @transform_0(%arg0: i32) -> (i32, i32, i32) {
    %c0_i32 = arith.constant 0 : i32
    %c0_i32_0 = arith.constant 0 : i32
    %c0_i32_1 = arith.constant 0 : i32
    return %c0_i32, %arg0, %c0_i32_0 : i32, i32, i32
  }
  func.func @transform_1(%arg0: i32) -> (i32, i32) {
    %c0_i32 = arith.constant 0 : i32
    %c0_i32_0 = arith.constant 0 : i32
    %c0_i32_1 = arith.constant 0 : i32
    return %c0_i32, %c0_i32_0 : i32, i32
  }
  func.func @transform_2(%arg0: i32) -> (i32, i32) {
    %c0_i32 = arith.constant 0 : i32
    %c0_i32_0 = arith.constant 0 : i32
    %c0_i32_1 = arith.constant 0 : i32
    return %c0_i32, %c0_i32_0 : i32, i32
  }
  func.func @transform_3(%arg0: i32) -> (i32, i32) {
    %c0_i32 = arith.constant 0 : i32
    %c0_i32_0 = arith.constant 0 : i32
    %c0_i32_1 = arith.constant 0 : i32
    return %c0_i32, %c0_i32_0 : i32, i32
  }
  func.func @transform_4(%arg0: i32) -> (i32, i32) {
    %c0_i32 = arith.constant 0 : i32
    %c0_i32_0 = arith.constant 0 : i32
    %c0_i32_1 = arith.constant 0 : i32
    return %c0_i32, %c0_i32_0 : i32, i32
  }
  func.func @transform_5(%arg0: i32) -> (i32, i32) {
    %c0_i32 = arith.constant 0 : i32
    %c0_i32_0 = arith.constant 0 : i32
    %c0_i32_1 = arith.constant 0 : i32
    return %c0_i32, %c0_i32_0 : i32, i32
  }
  func.func @transform_6(%arg0: i32) -> (i32, i32) {
    %c0_i32 = arith.constant 0 : i32
    %c0_i32_0 = arith.constant 0 : i32
    %c0_i32_1 = arith.constant 0 : i32
    return %c0_i32, %c0_i32_0 : i32, i32
  }
  func.func @transform_7(%arg0: i32) -> (i32, i32) {
    %c0_i32 = arith.constant 0 : i32
    %c0_i32_0 = arith.constant 0 : i32
    %c0_i32_1 = arith.constant 0 : i32
    return %c0_i32, %c0_i32_0 : i32, i32
  }
  func.func @transform_8(%arg0: i32) -> (i32, i32) {
    %c0_i32 = arith.constant 0 : i32
    %c0_i32_0 = arith.constant 0 : i32
    %c0_i32_1 = arith.constant 0 : i32
    return %c0_i32, %c0_i32_0 : i32, i32
  }
  func.func @transform_9(%arg0: i32) -> (i32, i32) {
    %c0_i32 = arith.constant 0 : i32
    %c0_i32_0 = arith.constant 0 : i32
    return %arg0, %c0_i32 : i32, i32
  }
}

</mosaic_0001>

<bundles_post_ra>
// kernel: backbone_forward.1
= control target key start
LH: loop header
LB: loop body
LE: loop exit
PB: predicated region body
PF: predicated region fallthrough
CT: control target
= control target key end

     0   :  { %vm343_vm0 = vcmask 261120   ;;  %vm5866_vm1 = vmmov 0   ;;  %vm4244_vm2 = vcmask 523264   ;;  %s8217_s1 = inlined_call_operand.vmem [shape: bf16[32,128], index: 1, kind: input, shape index: {}]   ;;  %s8218_s0 = inlined_call_operand.vmem [shape: f32[196,8,32], index: 0, kind: input, shape index: {}]   ;;  %s8219_s3 = inlined_call_operand.vmem [shape: bf16[3200,64], index: 3, kind: input, shape index: {}]   ;;  %s8220_s2 = inlined_call_operand.vmem [shape: f32[1,128], index: 2, kind: input, shape index: {}]   ;;  %s8221_s4 = inlined_call_operand.vmem [shape: f32[1,64], index: 4, kind: input, shape index: {}]   ;;  %s8222_s5 = inlined_call_operand.vmem [shape: f32[64,32], index: 5, kind: input, shape index: {}]   ;;  %s8223_s7 = inlined_call_operand.vmem [shape: f32[32,128], index: 7, kind: input, shape index: {}]   ;;  %s8224_s6 = inlined_call_operand.vmem [shape: f32[1,32], index: 6, kind: input, shape index: {}]   ;;  %s8225_s8 = inlined_call_operand.vmem [shape: f32[1,128], index: 8, kind: input, shape index: {}]   ;;  %s8226_s9 = inlined_call_operand.vmem [shape: f32[8,128], index: 9, kind: output, shape index: {}]  }
   0x1   :  { %v5661_v0 = vld [vmem:[%s8217_s1 + $0x8] sm:$0xff]   ;;  %v5662_v1 = vld [vmem:[%s8217_s1] sm:$0xff]   ;;  %v35_v5 = vld [vmem:[%s8218_s0 + $0x10] sm:$0xff] }
   0x2   :  { %5393 = vmatprep.subr.bf16.mxu0 %v5661_v0  ;;  %v33_v2 = vld [vmem:[%s8218_s0] sm:$0xff]  ;;  %v34_v3 = vld [vmem:[%s8218_s0 + $0x8] sm:$0xff]  ;;  %v36_v6 = vld [vmem:[%s8218_s0 + $0x18] sm:$0xff] }
   0x3   :  { %5394 = vmatpush3.bf16.msra.mxu0 %v5661_v0  ;;  %v229_v4 = vpack.c.bf16 %v34_v3, %v33_v2  ;;  %v37_v7 = vld [vmem:[%s8218_s0 + $0x20] sm:$0xff]  ;;  %v38_v8 = vld [vmem:[%s8218_s0 + $0x28] sm:$0xff]  ;;  %v230_v9 = vpack.c.bf16 %v36_v6, %v35_v5  ;;  %v39_v11 = vld [vmem:[%s8218_s0 + $0x30] sm:$0xff] }
   0x4   :  { %5395 = vmatprep.subr.bf16.mxu0 %v5662_v1  ;;  %v231_v10 = vpack.c.bf16 %v38_v8, %v37_v7  ;;  %v40_v12 = vld [vmem:[%s8218_s0 + $0x38] sm:$0xff]  ;;  %v41_v13 = vld [vmem:[%s8218_s0 + $0x40] sm:$0xff]  ;;  %v42_v14 = vld [vmem:[%s8218_s0 + $0x48] sm:$0xff] }
   0x5   :  { %5397 = vmatprep.mubr.msk.bf16.mxu0 %vm343_vm0, %v229_v4  ;;  %v232_v15 = vpack.c.bf16 %v40_v12, %v39_v11  ;;  %v233_v16 = vpack.c.bf16 %v42_v14, %v41_v13  ;;  %v43_v17 = vld [vmem:[%s8218_s0 + $0x50] sm:$0xff]  ;;  %v44_v18 = vld [vmem:[%s8218_s0 + $0x58] sm:$0xff]  ;;  %v45_v19 = vld [vmem:[%s8218_s0 + $0x60] sm:$0xff] }
   0x6   :  { %v46_v20 = vld [vmem:[%s8218_s0 + $0x68] sm:$0xff]  ;;  %v234_v21 = vpack.c.bf16 %v44_v18, %v43_v17  ;;  %v47_v23 = vld [vmem:[%s8218_s0 + $0x70] sm:$0xff]  ;;  %v48_v24 = vld [vmem:[%s8218_s0 + $0x78] sm:$0xff] }
   0x7   :  { %5396 = vmatpush3.bf16.msra.mxu0 %v5662_v1  ;;  %v235_v22 = vpack.c.bf16 %v46_v20, %v45_v19  ;;  %v49_v25 = vld [vmem:[%s8218_s0 + $0x80] sm:$0xff]  ;;  %v50_v26 = vld [vmem:[%s8218_s0 + $0x88] sm:$0xff]  ;;  %v236_v27 = vpack.c.bf16 %v48_v24, %v47_v23  ;;  %v51_v29 = vld [vmem:[%s8218_s0 + $0x90] sm:$0xff] }
   0x8   :  { %v237_v28 = vpack.c.bf16 %v50_v26, %v49_v25  ;;  %v52_v30 = vld [vmem:[%s8218_s0 + $0x98] sm:$0xff]  ;;  %v53_v31 = vld [vmem:[%s8218_s0 + $0xa0] sm:$0xff]  ;;  %v54_v32 = vld [vmem:[%s8218_s0 + $0xa8] sm:$0xff] }
   0x9   :  { %v238_v33 = vpack.c.bf16 %v52_v30, %v51_v29  ;;  %v239_v34 = vpack.c.bf16 %v54_v32, %v53_v31  ;;  %v55_v35 = vld [vmem:[%s8218_s0 + $0xb0] sm:$0xff]  ;;  %v56_v36 = vld [vmem:[%s8218_s0 + $0xb8] sm:$0xff]  ;;  %v57_v37 = vld [vmem:[%s8218_s0 + $0xc0] sm:$0xff] }
   0xa   :  { %5398 = vmatmul.mubr.msk.bf16.vlgmr.msra.gmra.mxu0 %vm343_vm0, %v230_v9  ;;  %v58_v38 = vld [vmem:[%s8218_s0 + $0xc8] sm:$0xff]  ;;  %v240_v39 = vpack.c.bf16 %v56_v36, %v55_v35  ;;  %v59_v41 = vld [vmem:[%s8218_s0 + $0xd0] sm:$0xff]  ;;  %v60_v42 = vld [vmem:[%s8218_s0 + $0xd8] sm:$0xff] }
   0xb   :  { %5401 = vmatprep.mubr.msk.bf16.mxu0 %vm343_vm0, %v231_v10  ;;  %v241_v40 = vpack.c.bf16 %v58_v38, %v57_v37  ;;  %v61_v43 = vld [vmem:[%s8218_s0 + $0xe0] sm:$0xff]  ;;  %v62_v44 = vld [vmem:[%s8218_s0 + $0xe8] sm:$0xff]  ;;  %v242_v45 = vpack.c.bf16 %v60_v42, %v59_v41  ;;  %v63_v47 = vld [vmem:[%s8218_s0 + $0xf0] sm:$0xff] }
   0xc   :  { %v243_v46 = vpack.c.bf16 %v62_v44, %v61_v43  ;;  %v64_v48 = vld [vmem:[%s8218_s0 + $0xf8] sm:$0xff]  ;;  %v65_v49 = vld [vmem:[%s8218_s0 + $0x100] sm:$0xff]  ;;  %v66_v50 = vld [vmem:[%s8218_s0 + $0x108] sm:$0xff] }
   0xd   :  { %v244_v51 = vpack.c.bf16 %v64_v48, %v63_v47  ;;  %v245_v52 = vpack.c.bf16 %v66_v50, %v65_v49  ;;  %v67_v53 = vld [vmem:[%s8218_s0 + $0x110] sm:$0xff]  ;;  %v68_v54 = vld [vmem:[%s8218_s0 + $0x118] sm:$0xff]  ;;  %v69_v55 = vld [vmem:[%s8218_s0 + $0x120] sm:$0xff] }
   0xe   :  { %v70_v56 = vld [vmem:[%s8218_s0 + $0x128] sm:$0xff]  ;;  %v246_v57 = vpack.c.bf16 %v68_v54, %v67_v53  ;;  %v71_v59 = vld [vmem:[%s8218_s0 + $0x130] sm:$0xff]  ;;  %v72_v60 = vld [vmem:[%s8218_s0 + $0x138] sm:$0xff] }
   0xf   :  { %v247_v58 = vpack.c.bf16 %v70_v56, %v69_v55  ;;  %v73_v61 = vld [vmem:[%s8218_s0 + $0x140] sm:$0xff]  ;;  %v74_v62 = vld [vmem:[%s8218_s0 + $0x148] sm:$0xff]  ;;  %v248_v63 = vpack.c.bf16 %v72_v60, %v71_v59  ;;  %v75_v1 = vld [vmem:[%s8218_s0 + $0x150] sm:$0xff] }
  0x10   :  { %v249_v0 = vpack.c.bf16 %v74_v62, %v73_v61  ;;  %v76_v2 = vld [vmem:[%s8218_s0 + $0x158] sm:$0xff]  ;;  %v77_v3 = vld [vmem:[%s8218_s0 + $0x160] sm:$0xff]  ;;  %v78_v4 = vld [vmem:[%s8218_s0 + $0x168] sm:$0xff] }
  0x11   :  { %v250_v5 = vpack.c.bf16 %v76_v2, %v75_v1  ;;  %v251_v6 = vpack.c.bf16 %v78_v4, %v77_v3  ;;  %v5663_v7 = vld [vmem:[%s8219_s3 + $0x78] sm:$0xff]   ;;  %v79_v8 = vld [vmem:[%s8218_s0 + $0x170] sm:$0xff]  ;;  %v81_v11 = vld [vmem:[%s8218_s0 + $0x180] sm:$0xff] }
  0x12   :  { %5402 = vmatmul.mubr.msk.bf16.gmra.mxu0 %vm343_vm0, %v232_v15  ;;  %v80_v9 = vld [vmem:[%s8218_s0 + $0x178] sm:$0xff]  ;;  %v82_v12 = vld [vmem:[%s8218_s0 + $0x188] sm:$0xff]  ;;  %4814 = vmatprep.subr.bf16.mxu1 %v5663_v7  ;;  %v5665_v13 = vld [vmem:[%s8219_s3 + $0x70] sm:$0xff]  }
  0x13   :  { %5405 = vmatprep.mubr.msk.bf16.mxu0 %vm343_vm0, %v233_v16  ;;  %v5664_v10 = vld [vmem:[%s8219_s3 + $0x38] sm:$0xff]   ;;  %v5666_v14 = vld [vmem:[%s8219_s3 + $0x30] sm:$0xff]   ;;  %v252_v15 = vpack.c.bf16 %v80_v9, %v79_v8  ;;  %v253_v16 = vpack.c.bf16 %v82_v12, %v81_v11  ;;  %v5667_v17 = vld [vmem:[%s8219_s3 + $0x68] sm:$0xff]  }
  0x14   :  { %4815 = vmatpush3.bf16.msra.mxu1 %v5664_v10  ;;  %v83_v18 = vld [vmem:[%s8218_s0 + $0x190] sm:$0xff]  ;;  %v84_v19 = vld [vmem:[%s8218_s0 + $0x198] sm:$0xff]  ;;  %v5668_v20 = vld [vmem:[%s8219_s3 + $0x28] sm:$0xff]  }
  0x15   :  { %4816 = vmatprep.subr.bf16.mxu1 %v5665_v13  ;;  %v5669_v23 = vld [vmem:[%s8219_s3 + $0x60] sm:$0xff]   ;;  %v254_v25 = vpack.c.bf16 %v84_v19, %v83_v18  ;;  %v88_v29 = vld [vmem:[%s8218_s0 + $0x1b8] sm:$0xff]  ;;  %v90_v32 = vld [vmem:[%s8218_s0 + $0x1c8] sm:$0xff] }
  0x16   :  { %v5670_v24 = vld [vmem:[%s8219_s3 + $0x20] sm:$0xff]   ;;  %v5672_v30 = vld [vmem:[%s8219_s3 + $0x18] sm:$0xff]   ;;  %v5675_v37 = vld [vmem:[%s8219_s3 + $0x48] sm:$0xff]  }
  0x17   :  { %v89_v31 = vld [vmem:[%s8218_s0 + $0x1c0] sm:$0xff]  ;;  %v91_v38 = vld [vmem:[%s8218_s0 + $0x1d0] sm:$0xff]  ;;  %v94_v42 = vld [vmem:[%s8218_s0 + $0x1e8] sm:$0xff] }
  0x18   :  { %4817 = vmatpush3.bf16.msra.mxu1 %v5666_v14  ;;  %v257_v36 = vpack.c.bf16 %v90_v32, %v89_v31  ;;  %v93_v41 = vld [vmem:[%s8218_s0 + $0x1e0] sm:$0xff]  ;;  %v95_v47 = vld [vmem:[%s8218_s0 + $0x1f0] sm:$0xff]  ;;  %v96_v48 = vld [vmem:[%s8218_s0 + $0x1f8] sm:$0xff] }
  0x19   :  { %4818 = vmatprep.subr.bf16.mxu1 %v5667_v17  ;;  %v5677_v43 = vld [vmem:[%s8219_s3 + $0x40] sm:$0xff]   ;;  %v98_v50 = vld [vmem:[%s8218_s0 + $0x208] sm:$0xff]  ;;  %v99_v53 = vld [vmem:[%s8218_s0 + $0x210] sm:$0xff] }
  0x1a   :  { %5406 = vmatmul.mubr.msk.bf16.gmra.mxu0 %vm343_vm0, %v234_v21  ;;  %v85_v21 = vld [vmem:[%s8218_s0 + $0x1a0] sm:$0xff]  ;;  %v100_v54 = vld [vmem:[%s8218_s0 + $0x218] sm:$0xff]  ;;  %v102_v56 = vld [vmem:[%s8218_s0 + $0x228] sm:$0xff] }
  0x1b   :  { %5409 = vmatprep.mubr.msk.bf16.mxu0 %vm343_vm0, %v235_v22  ;;  %v86_v22 = vld [vmem:[%s8218_s0 + $0x1a8] sm:$0xff]  ;;  %v5678_v44 = vld [vmem:[%s8219_s3] sm:$0xff]   ;;  %v103_v59 = vld [vmem:[%s8218_s0 + $0x230] sm:$0xff] }
  0x1c   :  { %4819 = vmatpush3.bf16.msra.mxu1 %v5668_v20  ;;  %v255_v26 = vpack.c.bf16 %v86_v22, %v85_v21  ;;  %v97_v49 = vld [vmem:[%s8218_s0 + $0x200] sm:$0xff]  ;;  %v104_v60 = vld [vmem:[%s8218_s0 + $0x238] sm:$0xff]  ;;  %v106_v62 = vld [vmem:[%s8218_s0 + $0x248] sm:$0xff] }
  0x1d   :  { %4820 = vmatprep.subr.bf16.mxu1 %v5669_v23  ;;  %v101_v55 = vld [vmem:[%s8218_s0 + $0x220] sm:$0xff]  ;;  %v107_v1 = vld [vmem:[%s8218_s0 + $0x250] sm:$0xff]  ;;  %v108_v2 = vld [vmem:[%s8218_s0 + $0x258] sm:$0xff] }
  0x1e   :  { %v105_v61 = vld [vmem:[%s8218_s0 + $0x240] sm:$0xff]  ;;  %v110_v4 = vld [vmem:[%s8218_s0 + $0x268] sm:$0xff]  ;;  %v111_v7 = vld [vmem:[%s8218_s0 + $0x270] sm:$0xff] }
  0x1f   :  { %v109_v3 = vld [vmem:[%s8218_s0 + $0x260] sm:$0xff]  ;;  %v112_v8 = vld [vmem:[%s8218_s0 + $0x278] sm:$0xff]  ;;  %v114_v10 = vld [vmem:[%s8218_s0 + $0x288] sm:$0xff] }
  0x20   :  { %4821 = vmatpush3.bf16.msra.mxu1 %v5670_v24  ;;  %v113_v9 = vld [vmem:[%s8218_s0 + $0x280] sm:$0xff]  ;;  %v268_v11 = vpack.c.bf16 %v112_v8, %v111_v7  ;;  %v115_v13 = vld [vmem:[%s8218_s0 + $0x290] sm:$0xff]  ;;  %v116_v14 = vld [vmem:[%s8218_s0 + $0x298] sm:$0xff] }
  0x21   :  { %v269_v12 = vpack.c.bf16 %v114_v10, %v113_v9  ;;  %v270_v17 = vpack.c.bf16 %v116_v14, %v115_v13  ;;  %v119_v19 = vld [vmem:[%s8218_s0 + $0x2b0] sm:$0xff]  ;;  %v120_v20 = vld [vmem:[%s8218_s0 + $0x2b8] sm:$0xff]  ;;  %v121_v21 = vld [vmem:[%s8218_s0 + $0x2c0] sm:$0xff] }
  0x22   :  { %5410 = vmatmul.mubr.msk.bf16.gmra.mxu0 %vm343_vm0, %v236_v27  ;;  %v5671_v27 = vld [vmem:[%s8219_s3 + $0x58] sm:$0xff]   ;;  %v122_v22 = vld [vmem:[%s8218_s0 + $0x2c8] sm:$0xff]  ;;  %v272_v23 = vpack.c.bf16 %v120_v20, %v119_v19  ;;  %v127_v31 = vld [vmem:[%s8218_s0 + $0x2f0] sm:$0xff] }
  0x23   :  { %5413 = vmatprep.mubr.msk.bf16.mxu0 %vm343_vm0, %v237_v28  ;;  %v87_v28 = vld [vmem:[%s8218_s0 + $0x1b0] sm:$0xff]  ;;  %4822 = vmatprep.subr.bf16.mxu1 %v5671_v27  ;;  %v273_v24 = vpack.c.bf16 %v122_v22, %v121_v21  ;;  %v125_v27 = vld [vmem:[%s8218_s0 + $0x2e0] sm:$0xff]  ;;  %v128_v32 = vld [vmem:[%s8218_s0 + $0x2f8] sm:$0xff] }
  0x24   :  { %4823 = vmatpush3.bf16.msra.mxu1 %v5672_v30  ;;  %v256_v35 = vpack.c.bf16 %v88_v29, %v87_v28  ;;  %v126_v28 = vld [vmem:[%s8218_s0 + $0x2e8] sm:$0xff] }
  0x25   :  { %v275_v30 = vpack.c.bf16 %v126_v28, %v125_v27  ;;  %v146_v8 = vld [vmem:[%s8218_s0 + $0x388] sm:$0xff]  ;;  %v152_v27 = vld [vmem:[%s8218_s0 + $0x3b8] sm:$0xff] }
  0x26   :  { %v150_v20 = vld [vmem:[%s8218_s0 + $0x3a8] sm:$0xff] }
  0x2a   :  { %5414 = vmatmul.mubr.msk.bf16.gmra.mxu0 %vm343_vm0, %v238_v33  ;;  %v5673_v33 = vld [vmem:[%s8219_s3 + $0x50] sm:$0xff]  }
  0x2b   :  { %5417 = vmatprep.mubr.msk.bf16.mxu0 %vm343_vm0, %v239_v34  ;;  %v5674_v34 = vld [vmem:[%s8219_s3 + $0x10] sm:$0xff]   ;;  %4824 = vmatprep.subr.bf16.mxu1 %v5673_v33  ;;  %v129_v33 = vld [vmem:[%s8218_s0 + $0x300] sm:$0xff] }
  0x2c   :  { %4825 = vmatpush3.bf16.msra.mxu1 %v5674_v34  ;;  %v130_v34 = vld [vmem:[%s8218_s0 + $0x308] sm:$0xff] }
  0x2d   :  { %4826 = vmatprep.subr.bf16.mxu1 %v5675_v37  ;;  %v276_v37 = vpack.c.bf16 %v128_v32, %v127_v31  ;;  %v154_v31 = vld [vmem:[%s8218_s0 + $0x3c8] sm:$0xff] }
  0x32   :  { %5418 = vmatmul.mubr.msk.bf16.gmra.mxu0 %vm343_vm0, %v240_v39  ;;  %v92_v39 = vld [vmem:[%s8218_s0 + $0x1d8] sm:$0xff] }
  0x33   :  { %5421 = vmatprep.mubr.msk.bf16.mxu0 %vm343_vm0, %v241_v40  ;;  %v5676_v40 = vld [vmem:[%s8219_s3 + $0x8] sm:$0xff]  }
  0x34   :  { %4827 = vmatpush3.bf16.msra.mxu1 %v5676_v40  ;;  %v132_v40 = vld [vmem:[%s8218_s0 + $0x318] sm:$0xff] }
  0x35   :  { %4828 = vmatprep.subr.bf16.mxu1 %v5677_v43 }
  0x38   :  { %4829 = vmatpush3.bf16.msra.mxu1 %v5678_v44 }
  0x3a   :  { %5422 = vmatmul.mubr.msk.bf16.gmra.mxu0 %vm343_vm0, %v242_v45  ;;  %v258_v45 = vpack.c.bf16 %v92_v39, %v91_v38  ;;  %v277_v38 = vpack.c.bf16 %v130_v34, %v129_v33  ;;  %v131_v39 = vld [vmem:[%s8218_s0 + $0x310] sm:$0xff] }
  0x3b   :  { %5425 = vmatprep.mubr.msk.bf16.mxu0 %vm343_vm0, %v243_v46  ;;  %v259_v46 = vpack.c.bf16 %v94_v42, %v93_v41  ;;  %v133_v41 = vld [vmem:[%s8218_s0 + $0x320] sm:$0xff]  ;;  %v134_v42 = vld [vmem:[%s8218_s0 + $0x328] sm:$0xff]  ;;  %v278_v43 = vpack.c.bf16 %v132_v40, %v131_v39  ;;  %v5691_v33 = vld [vmem:[%s8219_s3 + $0x570] sm:$0xff]  }
  0x3c   :  { %v279_v44 = vpack.c.bf16 %v134_v42, %v133_v41  ;;  %v5692_v34 = vld [vmem:[%s8219_s3 + $0x530] sm:$0xff]   ;;  %v6448_v41 = vld [vmem:[%s8220_s2] ss:$0 sm:$0xff] }
  0x42   :  { %5426 = vmatmul.mubr.msk.bf16.gmra.mxu0 %vm343_vm0, %v244_v51  ;;  %v260_v51 = vpack.c.bf16 %v96_v48, %v95_v47  ;;  %v137_v48 = vld [vmem:[%s8218_s0 + $0x340] sm:$0xff] }
  0x43   :  { %5429 = vmatprep.mubr.msk.bf16.mxu0 %vm343_vm0, %v245_v52  ;;  %v261_v52 = vpack.c.bf16 %v98_v50, %v97_v49  ;;  %v138_v49 = vld [vmem:[%s8218_s0 + $0x348] sm:$0xff] }
  0x4a   :  { %5430 = vmatmul.mubr.msk.bf16.gmra.mxu0 %vm343_vm0, %v246_v57  ;;  %v262_v57 = vpack.c.bf16 %v100_v54, %v99_v53  ;;  %v281_v53 = vpack.c.bf16 %v138_v49, %v137_v48  ;;  %v155_v48 = vld [vmem:[%s8218_s0 + $0x3d0] sm:$0xff]  ;;  %v156_v49 = vld [vmem:[%s8218_s0 + $0x3d8] sm:$0xff] }
  0x4b   :  { %5433 = vmatprep.mubr.msk.bf16.mxu0 %vm343_vm0, %v247_v58  ;;  %v263_v58 = vpack.c.bf16 %v102_v56, %v101_v55  ;;  %v139_v55 = vld [vmem:[%s8218_s0 + $0x350] sm:$0xff]  ;;  %v140_v56 = vld [vmem:[%s8218_s0 + $0x358] sm:$0xff] }
  0x52   :  { %5434 = vmatmul.mubr.msk.bf16.gmra.mxu0 %vm343_vm0, %v248_v63  ;;  %v264_v63 = vpack.c.bf16 %v104_v60, %v103_v59  ;;  %v141_v59 = vld [vmem:[%s8218_s0 + $0x360] sm:$0xff]  ;;  %v142_v60 = vld [vmem:[%s8218_s0 + $0x368] sm:$0xff] }
  0x53   :  { %5437 = vmatprep.mubr.msk.bf16.mxu0 %vm343_vm0, %v249_v0  ;;  %v265_v0 = vpack.c.bf16 %v106_v62, %v105_v61 }
  0x5a   :  { %5438 = vmatmul.mubr.msk.bf16.gmra.mxu0 %vm343_vm0, %v250_v5  ;;  %v266_v5 = vpack.c.bf16 %v108_v2, %v107_v1  ;;  %v283_v1 = vpack.c.bf16 %v142_v60, %v141_v59  ;;  %v290_v59 = vpack.c.bf16 %v156_v49, %v155_v48  ;;  %v5694_v48 = vld [vmem:[%s8219_s3 + $0x90] sm:$0xff]  }
  0x5b   :  { %5441 = vmatprep.mubr.msk.bf16.mxu0 %vm343_vm0, %v251_v6  ;;  %v267_v6 = vpack.c.bf16 %v110_v4, %v109_v3  ;;  %v143_v4 = vld [vmem:[%s8218_s0 + $0x370] sm:$0xff] }
  0x62   :  { %5442 = vmatmul.mubr.msk.bf16.gmra.mxu0 %vm343_vm0, %v252_v15  ;;  %v117_v15 = vld [vmem:[%s8218_s0 + $0x2a0] sm:$0xff] }
  0x63   :  { %5445 = vmatprep.mubr.msk.bf16.mxu0 %vm343_vm0, %v253_v16  ;;  %v118_v16 = vld [vmem:[%s8218_s0 + $0x2a8] sm:$0xff] }
  0x64   :  { %v271_v18 = vpack.c.bf16 %v118_v16, %v117_v15  ;;  %v147_v15 = vld [vmem:[%s8218_s0 + $0x390] sm:$0xff]  ;;  %v148_v16 = vld [vmem:[%s8218_s0 + $0x398] sm:$0xff] }
  0x65   :  { %v286_v22 = vpack.c.bf16 %v148_v16, %v147_v15  ;;  %v162_v15 = vld [vmem:[%s8218_s0 + $0x408] sm:$0xff] }
  0x66   :  { %v5685_v16 = vld [vmem:[%s8219_s3 + $0xe8] sm:$0xff]  }
  0x6a   :  { %5446 = vmatmul.mubr.msk.bf16.gmra.mxu0 %vm343_vm0, %v254_v25  ;;  %v123_v25 = vld [vmem:[%s8218_s0 + $0x2d0] sm:$0xff] }
  0x6b   :  { %5449 = vmatprep.mubr.msk.bf16.mxu0 %vm343_vm0, %v255_v26  ;;  %v124_v26 = vld [vmem:[%s8218_s0 + $0x2d8] sm:$0xff] }
  0x6c   :  { %v274_v29 = vpack.c.bf16 %v124_v26, %v123_v25  ;;  %v151_v26 = vld [vmem:[%s8218_s0 + $0x3b0] sm:$0xff] }
  0x72   :  { %5450 = vmatmul.mubr.msk.bf16.gmra.mxu0 %vm343_vm0, %v256_v35  ;;  %v5679_v35 = vld [vmem:[%s8219_s3 + $0x578] sm:$0xff]  }
  0x73   :  { %5453 = vmatprep.mubr.msk.bf16.mxu0 %vm343_vm0, %v257_v36  ;;  %5274 = vmatprep.subr.bf16.mxu0 %v5679_v35  ;;  %v5680_v36 = vld [vmem:[%s8219_s3 + $0x538] sm:$0xff]  }
  0x74   :  { %5275 = vmatpush3.bf16.msra.mxu0 %v5680_v36  ;;  %v288_v36 = vpack.c.bf16 %v152_v27, %v151_v26 }
  0x75   :  { %5276 = vmatprep.subr.bf16.mxu0 %v5691_v33  ;;  %v164_v33 = vld [vmem:[%s8218_s0 + $0x418] sm:$0xff] }
  0x78   :  { %5277 = vmatpush3.bf16.msra.mxu0 %v5692_v34 }
  0x7a   :  { %5454 = vmatmul.mubr.msk.bf16.gmra.mxu0 %vm343_vm0, %v258_v45  ;;  %v135_v45 = vld [vmem:[%s8218_s0 + $0x330] sm:$0xff] }
  0x7b   :  { %5457 = vmatprep.mubr.msk.bf16.mxu0 %vm343_vm0, %v259_v46  ;;  %v136_v46 = vld [vmem:[%s8218_s0 + $0x338] sm:$0xff] }
  0x82   :  { %5458 = vmatmul.mubr.msk.bf16.gmra.mxu0 %vm343_vm0, %v260_v51 }
  0x83   :  { %5461 = vmatprep.mubr.msk.bf16.mxu0 %vm343_vm0, %v261_v52  ;;  %v280_v52 = vpack.c.bf16 %v136_v46, %v135_v45 }
  0x8a   :  { %5462 = vmatmul.mubr.msk.bf16.gmra.mxu0 %vm343_vm0, %v262_v57  ;;  %v5681_v57 = vld [vmem:[%s8219_s3 + $0xf8] sm:$0xff]  }
  0x8b   :  { %5465 = vmatprep.mubr.msk.bf16.mxu0 %vm343_vm0, %v263_v58  ;;  %4860 = vmatprep.subr.bf16.mxu1 %v5681_v57 }
  0x92   :  { %5466 = vmatmul.mubr.msk.bf16.gmra.mxu0 %vm343_vm0, %v264_v63  ;;  %v282_v63 = vpack.c.bf16 %v140_v56, %v139_v55 }
  0x93   :  { %5469 = vmatprep.mubr.msk.bf16.mxu0 %vm343_vm0, %v265_v0 }
  0x9a   :  { %5470 = vmatmul.mubr.msk.bf16.gmra.mxu0 %vm343_vm0, %v266_v5  ;;  %v144_v5 = vld [vmem:[%s8218_s0 + $0x378] sm:$0xff] }
  0x9b   :  { %5473 = vmatprep.mubr.msk.bf16.mxu0 %vm343_vm0, %v267_v6  ;;  %v145_v6 = vld [vmem:[%s8218_s0 + $0x380] sm:$0xff]  ;;  %v284_v10 = vpack.c.bf16 %v144_v5, %v143_v4  ;;  %v5683_v4 = vld [vmem:[%s8219_s3 + $0xf0] sm:$0xff]  }
  0xa2   :  { %5474 = vmatmul.mubr.msk.bf16.gmra.mxu0 %vm343_vm0, %v268_v11 }
  0xa3   :  { %5477 = vmatprep.mubr.msk.bf16.mxu0 %vm343_vm0, %v269_v12  ;;  %v285_v12 = vpack.c.bf16 %v146_v8, %v145_v6  ;;  %v159_v8 = vld [vmem:[%s8218_s0 + $0x3f0] sm:$0xff] }
  0xaa   :  { %5478 = vmatmul.mubr.msk.bf16.gmra.mxu0 %vm343_vm0, %v270_v17 }
  0xab   :  { %5481 = vmatprep.mubr.msk.bf16.mxu0 %vm343_vm0, %v271_v18  ;;  %v149_v18 = vld [vmem:[%s8218_s0 + $0x3a0] sm:$0xff] }
  0xb2   :  { %5482 = vmatmul.mubr.msk.bf16.gmra.mxu0 %vm343_vm0, %v272_v23  ;;  %v287_v23 = vpack.c.bf16 %v150_v20, %v149_v18 }
  0xb3   :  { %5485 = vmatprep.mubr.msk.bf16.mxu0 %vm343_vm0, %v273_v24 }
  0xba   :  { %5486 = vmatmul.mubr.msk.bf16.gmra.mxu0 %vm343_vm0, %v274_v29  ;;  %v153_v29 = vld [vmem:[%s8218_s0 + $0x3c0] sm:$0xff] }
  0xbb   :  { %5489 = vmatprep.mubr.msk.bf16.mxu0 %vm343_vm0, %v275_v30  ;;  %v289_v40 = vpack.c.bf16 %v154_v31, %v153_v29  ;;  %v5687_v29 = vld [vmem:[%s8219_s3 + $0xe0] sm:$0xff]  }
  0xc2   :  { %5490 = vmatmul.mubr.msk.bf16.gmra.mxu0 %vm343_vm0, %v276_v37 }
  0xc3   :  { %5493 = vmatprep.mubr.msk.bf16.mxu0 %vm343_vm0, %v277_v38 }
  0xca   :  { %v6338_v47 = vpop.f32.mrf.mxu0  ;;  %5494 = vmatmul.mubr.msk.bf16.gmra.mxu0 %vm343_vm0, %v278_v43 }
  0xcb   :  { %5497 = vmatprep.mubr.msk.bf16.mxu0 %vm343_vm0, %v279_v44 }
  0xcc   :  { %v6348_v50 = vpop.f32.mrf.mxu0 }
  0xce   :  { %v6350_v51 = vpop.f32.mrf.mxu0 }
  0xcf   :  { %v1456_v43 = vmax.f32 %v6338_v47, %v6350_v51  ;;  %v158_v51 = vld [vmem:[%s8218_s0 + $0x3e8] sm:$0xff] }
  0xd0   :  { %v6352_v54 = vpop.f32.mrf.mxu0 }
  0xd1   :  { %v1455_v37 = vmax.f32 %v6348_v50, %v6352_v54 }
  0xd2   :  { %v6363_v58 = vpop.f32.mrf.mxu0  ;;  %5498 = vmatmul.mubr.msk.bf16.gmra.mxu0 %vm343_vm0, %v280_v52  ;;  %v157_v52 = vld [vmem:[%s8218_s0 + $0x3e0] sm:$0xff] }
  0xd3   :  { %5501 = vmatprep.mubr.msk.bf16.mxu0 %vm343_vm0, %v281_v53 }
  0xd4   :  { %v688_v61 = vpop.f32.mrf.mxu0 }
  0xd6   :  { %v6373_v62 = vpop.f32.mrf.mxu0 }
  0xd7   :  { %v1458_v0 = vmax.f32 %v6363_v58, %v6373_v62  ;;  %v5686_v58 = vld [vmem:[%s8219_s3 + $0xa8] sm:$0xff]  }
  0xd8   :  { %v691_v2 = vpop.f32.mrf.mxu0 }
  0xd9   :  { %v1457_v38 = vmax.f32 %v688_v61, %v691_v2  ;;  %v5682_v2 = vld [vmem:[%s8219_s3 + $0xb8] sm:$0xff]  }
  0xda   :  { %v6377_v3 = vpop.f32.mrf.mxu0  ;;  %5502 = vmatmul.mubr.msk.bf16.gmra.mxu0 %vm343_vm0, %v282_v63 }
  0xdb   :  { %5505 = vmatprep.mubr.msk.bf16.mxu0 %vm343_vm0, %v283_v1  ;;  %v291_v1 = vpack.c.bf16 %v158_v51, %v157_v52  ;;  %v170_v52 = vld [vmem:[%s8218_s0 + $0x448] sm:$0xff] }
  0xdc   :  { %v6390_v7 = vpop.f32.mrf.mxu0 }
  0xde   :  { %v6395_v9 = vpop.f32.mrf.mxu0 }
  0xdf   :  { %v1460_v11 = vmax.f32 %v6377_v3, %v6395_v9 }
  0xe0   :  { %v6399_v13 = vpop.f32.mrf.mxu0 }
  0xe1   :  { %v1459_v14 = vmax.f32 %v6390_v7, %v6399_v13 }
  0xe2   :  { %v5411_v17 = vpop.f32.mrf.mxu0  ;;  %5506 = vmatmul.mubr.msk.bf16.gmra.mxu0 %vm343_vm0, %v284_v10  ;;  %v160_v10 = vld [vmem:[%s8218_s0 + $0x3f8] sm:$0xff] }
  0xe3   :  { %5509 = vmatprep.mubr.msk.bf16.mxu0 %vm343_vm0, %v285_v12  ;;  %v5684_v12 = vld [vmem:[%s8219_s3 + $0xb0] sm:$0xff]  }
  0xe4   :  { %v6414_v19 = vpop.f32.mrf.mxu0 }
  0xe6   :  { %v5412_v21 = vpop.f32.mrf.mxu0 }
  0xe7   :  { %v1462_v32 = vmax.f32 %v5411_v17, %v5412_v21 }
  0xe8   :  { %v6419_v24 = vpop.f32.mrf.mxu0 }
  0xe9   :  { %v1461_v25 = vmax.f32 %v6414_v19, %v6419_v24  ;;  %v1553_v44 = vmax.f32 %v1455_v37, %v1462_v32  ;;  %v163_v32 = vld [vmem:[%s8218_s0 + $0x410] sm:$0xff]  ;;  %v166_v19 = vld [vmem:[%s8218_s0 + $0x428] sm:$0xff]  ;;  %v5689_v37 = vld [vmem:[%s8219_s3 + $0xd8] sm:$0xff]  }
  0xea   :  { %v5415_v28 = vpop.f32.mrf.mxu0  ;;  %5510 = vmatmul.mubr.msk.bf16.gmra.mxu0 %vm343_vm0, %v286_v22  ;;  %v294_v3 = vpack.c.bf16 %v164_v33, %v163_v32 }
  0xeb   :  { %5513 = vmatprep.mubr.msk.bf16.mxu0 %vm343_vm0, %v287_v23  ;;  %v1609_v54 = vadd.f32 %v6448_v41, %v1553_v44  ;;  %v292_v23 = vpack.c.bf16 %v160_v10, %v159_v8 }
  0xec   :  { %v736_v30 = vpop.f32.mrf.mxu0 }
  0xee   :  { %v5416_v35 = vpop.f32.mrf.mxu0 }
  0xef   :  { %v1464_v39 = vmax.f32 %v5415_v28, %v5416_v35  ;;  %v165_v35 = vld [vmem:[%s8218_s0 + $0x420] sm:$0xff] }
  0xf0   :  { %v739_v42 = vpop.f32.mrf.mxu0 }
  0xf1   :  { %v1555_v45 = vmax.f32 %v1457_v38, %v1464_v39  ;;  %v1463_v46 = vmax.f32 %v736_v30, %v739_v42 }
  0xf2   :  { %v5419_v50 = vpop.f32.mrf.mxu0  ;;  %5514 = vmatmul.mubr.msk.bf16.gmra.mxu0 %vm343_vm0, %v288_v36 }
  0xf3   :  { %v1554_v53 = vmax.f32 %v1456_v43, %v1463_v46  ;;  %5517 = vmatprep.mubr.msk.bf16.mxu0 %vm343_vm0, %v289_v40  ;;  %v6469_v56 = vadd.f32 %v6448_v41, %v1555_v45  ;;  %v5690_v40 = vld [vmem:[%s8219_s3 + $0x98] sm:$0xff]   ;;  %v5693_v43 = vld [vmem:[%s8219_s3 + $0xd0] sm:$0xff]  }
  0xf4   :  { %v752_v47 = vpop.f32.mrf.mxu0  ;;  %v167_v45 = vld [vmem:[%s8218_s0 + $0x430] sm:$0xff]  ;;  %v168_v46 = vld [vmem:[%s8218_s0 + $0x438] sm:$0xff] }
  0xf5   :  { %v1610_v55 = vadd.f32 %v6448_v41, %v1554_v53  ;;  %v5695_v53 = vld [vmem:[%s8219_s3 + $0xc8] sm:$0xff]   ;;  %v296_v51 = vpack.c.bf16 %v168_v46, %v167_v45 }
  0xf6   :  { %v5420_v57 = vpop.f32.mrf.mxu0 }
  0xf7   :  { %v1466_v60 = vmax.f32 %v5419_v50, %v5420_v57  ;;  %v1659_v61 = vpack.c.bf16 %v6469_v56, %v1610_v55  ;;  %v1658_v63 = vpack.c.bf16 %v1610_v55, %v1609_v54  ;;  %v169_v50 = vld [vmem:[%s8218_s0 + $0x440] sm:$0xff]  ;;  %v5696_v55 = vld [vmem:[%s8219_s3 + $0x88] sm:$0xff]  }
  0xf8   :  { %v755_v5 = vpop.f32.mrf.mxu0  ;;  %v297_v54 = vpack.c.bf16 %v170_v52, %v169_v50 }
  0xf9   :  { %v1557_v6 = vmax.f32 %v1459_v14, %v1466_v60  ;;  %v1465_v7 = vmax.f32 %v752_v47, %v755_v5  ;;  %3387 = vmatprep.mubr.bf16.mxu1 %v1659_v61  ;;  %v161_v14 = vld [vmem:[%s8218_s0 + $0x400] sm:$0xff]  ;;  %v171_v61 = vld [vmem:[%s8218_s0 + $0x450] sm:$0xff]  ;;  %v174_v5 = vld [vmem:[%s8218_s0 + $0x468] sm:$0xff] }
  0xfa   :  { %v5423_v13 = vpop.f32.mrf.mxu0  ;;  %5518 = vmatmul.mubr.msk.bf16.gmra.mxu0 %vm343_vm0, %v290_v59  ;;  %3388 = vmatmul.mubr.bf16.vlgmr.msra.gmra.mxu1 %v1658_v63  ;;  %v293_v28 = vpack.c.bf16 %v162_v15, %v161_v14  ;;  %v5697_v59 = vld [vmem:[%s8219_s3 + $0xc0] sm:$0xff]   ;;  %v172_v63 = vld [vmem:[%s8218_s0 + $0x458] sm:$0xff] }
  0xfb   :  { %v1556_v17 = vmax.f32 %v1458_v0, %v1465_v7  ;;  %5521 = vmatprep.mubr.msk.bf16.mxu0 %vm343_vm0, %v291_v1  ;;  %4861 = vmatpush3.bf16.msra.mxu1 %v5682_v2  ;;  %v6502_v20 = vadd.f32 %v6448_v41, %v1557_v6  ;;  %v5698_v1 = vld [vmem:[%s8219_s3 + $0x80] sm:$0xff]   ;;  %v5699_v6 = vld [vmem:[%s8219_s3 + $0x178] sm:$0xff]   ;;  %v298_v8 = vpack.c.bf16 %v172_v63, %v171_v61  ;;  %v186_v61 = vld [vmem:[%s8218_s0 + $0x4c8] sm:$0xff] }
  0xfc   :  { %v768_v18 = vpop.f32.mrf.mxu0  ;;  %4862 = vmatprep.subr.bf16.mxu1 %v5683_v4  ;;  %v173_v4 = vld [vmem:[%s8218_s0 + $0x460] sm:$0xff] }
  0xfd   :  { %v6505_v21 = vadd.f32 %v6448_v41, %v1556_v17  ;;  %v176_v17 = vld [vmem:[%s8218_s0 + $0x478] sm:$0xff] }
  0xfe   :  { %v5424_v22 = vpop.f32.mrf.mxu0 }
  0xff   :  { %v1660_v26 = vpack.c.bf16 %v6505_v21, %v6469_v56  ;;  %v1468_v27 = vmax.f32 %v5423_v13, %v5424_v22  ;;  %4863 = vmatpush3.bf16.msra.mxu1 %v5684_v12  ;;  %v1661_v62 = vpack.c.bf16 %v6502_v20, %v6505_v21  ;;  %v299_v12 = vpack.c.bf16 %v174_v5, %v173_v4  ;;  %v177_v22 = vld [vmem:[%s8218_s0 + $0x480] sm:$0xff] }
 0x100   :  { %v771_v0 = vpop.f32.mrf.mxu0  ;;  %4864 = vmatprep.subr.bf16.mxu1 %v5685_v16  ;;  %v175_v16 = vld [vmem:[%s8218_s0 + $0x470] sm:$0xff] }
 0x101   :  { %v6520_v30 = vmax.f32 %v1461_v25, %v1468_v27  ;;  %v1467_v31 = vmax.f32 %v768_v18, %v771_v0  ;;  %v5688_v25 = vld [vmem:[%s8219_s3 + $0xa0] sm:$0xff]   ;;  %v5713_v27 = vld [vmem:[%s8219_s3 + $0x568] sm:$0xff]   ;;  %v300_v0 = vpack.c.bf16 %v176_v17, %v175_v16 }
 0x102   :  { %v6528_v34 = vpop.f32.mrf.mxu0  ;;  %5522 = vmatmul.mubr.msk.bf16.gmra.mxu0 %vm343_vm0, %v292_v23  ;;  %v178_v23 = vld [vmem:[%s8218_s0 + $0x488] sm:$0xff]  ;;  %5278 = vmatprep.subr.bf16.mxu0 %v5713_v27  ;;  %v187_v27 = vld [vmem:[%s8218_s0 + $0x4d0] sm:$0xff] }
 0x103   :  { %v1558_v24 = vmax.f32 %v1460_v11, %v1467_v31  ;;  %5525 = vmatprep.mubr.msk.bf16.mxu0 %vm343_vm0, %v293_v28  ;;  %4865 = vmatpush3.bf16.msra.mxu1 %v5686_v58  ;;  %v295_v11 = vpack.c.bf16 %v166_v19, %v165_v35  ;;  %v5714_v28 = vld [vmem:[%s8219_s3 + $0x528] sm:$0xff]   ;;  %v179_v35 = vld [vmem:[%s8218_s0 + $0x490] sm:$0xff]  ;;  %v180_v19 = vld [vmem:[%s8218_s0 + $0x498] sm:$0xff] }
 0x104   :  { %v6544_v36 = vpop.f32.mrf.mxu0  ;;  %4866 = vmatprep.subr.bf16.mxu1 %v5687_v29  ;;  %v301_v29 = vpack.c.bf16 %v178_v23, %v177_v22  ;;  %5279 = vmatpush3.bf16.msra.mxu0 %v5714_v28  ;;  %v6712_v28 = vadd.f32 %v6448_v41, %v6520_v30 }
 0x105   :  { %v6550_v38 = vadd.f32 %v6448_v41, %v1558_v24 }
 0x106   :  { %v6552_v39 = vpop.f32.mrf.mxu0 }
 0x107   :  { %v1662_v9 = vpack.c.bf16 %v6550_v38, %v6502_v20  ;;  %4867 = vmatpush3.bf16.msra.mxu1 %v5688_v25 }
 0x108   :  { %v6559_v42 = vpop.f32.mrf.mxu0  ;;  %4868 = vmatprep.subr.bf16.mxu1 %v5689_v37  ;;  %v181_v37 = vld [vmem:[%s8218_s0 + $0x4a0] sm:$0xff] }
 0x10a   :  { %v6564_v44 = vpop.f32.mrf.mxu0  ;;  %5526 = vmatmul.mubr.msk.bf16.gmra.mxu0 %vm343_vm0, %v294_v3  ;;  %v182_v3 = vld [vmem:[%s8218_s0 + $0x4a8] sm:$0xff] }
 0x10b   :  { %5529 = vmatprep.mubr.msk.bf16.mxu0 %vm343_vm0, %v295_v11  ;;  %4869 = vmatpush3.bf16.msra.mxu1 %v5690_v40  ;;  %v1469_v11 = vmax.f32 %v6544_v36, %v6559_v42  ;;  %v183_v42 = vld [vmem:[%s8218_s0 + $0x4b0] sm:$0xff] }
 0x10c   :  { %v6577_v49 = vpop.f32.mrf.mxu0  ;;  %4870 = vmatprep.subr.bf16.mxu1 %v5693_v43  ;;  %v302_v43 = vpack.c.bf16 %v180_v19, %v179_v35 }
 0x10e   :  { %v6588_v47 = vpop.f32.mrf.mxu0 }
 0x10f   :  { %4871 = vmatpush3.bf16.msra.mxu1 %v5694_v48  ;;  %v303_v48 = vpack.c.bf16 %v182_v3, %v181_v37  ;;  %v1472_v16 = vmax.f32 %v6564_v44, %v6588_v47  ;;  %v188_v44 = vld [vmem:[%s8218_s0 + $0x4d8] sm:$0xff]  ;;  %v189_v47 = vld [vmem:[%s8218_s0 + $0x4e0] sm:$0xff] }
 0x110   :  { %v803_v57 = vpop.f32.mrf.mxu0  ;;  %4872 = vmatprep.subr.bf16.mxu1 %v5695_v53  ;;  %v1470_v53 = vmax.f32 %v6528_v34, %v6552_v39  ;;  %v306_v19 = vpack.c.bf16 %v188_v44, %v187_v27  ;;  %v201_v27 = vld [vmem:[%s8218_s0 + $0x540] sm:$0xff] }
 0x111   :  { %v1471_v45 = vmax.f32 %v6577_v49, %v803_v57  ;;  %v184_v49 = vld [vmem:[%s8218_s0 + $0x4b8] sm:$0xff]  ;;  %v185_v57 = vld [vmem:[%s8218_s0 + $0x4c0] sm:$0xff] }
 0x112   :  { %v6596_v60 = vpop.f32.mrf.mxu0  ;;  %5530 = vmatmul.mubr.msk.bf16.gmra.mxu0 %vm343_vm0, %v296_v51  ;;  %v304_v4 = vpack.c.bf16 %v184_v49, %v183_v42  ;;  %v5736_v44 = vld [vmem:[%s8219_s3 + $0x520] sm:$0xff]  }
 0x113   :  { %5533 = vmatprep.mubr.msk.bf16.mxu0 %vm343_vm0, %v297_v54  ;;  %4873 = vmatpush3.bf16.msra.mxu1 %v5696_v55 }
 0x114   :  { %v6609_v2 = vpop.f32.mrf.mxu0  ;;  %4874 = vmatprep.subr.bf16.mxu1 %v5697_v59 }
 0x116   :  { %v6620_v7 = vpop.f32.mrf.mxu0 }
 0x117   :  { %v1474_v10 = vmax.f32 %v6596_v60, %v6620_v7  ;;  %4875 = vmatpush3.bf16.msra.mxu1 %v5698_v1  ;;  %v194_v60 = vld [vmem:[%s8218_s0 + $0x508] sm:$0xff] }
 0x118   :  { %v6624_v13 = vpop.f32.mrf.mxu0  ;;  %4906 = vmatprep.subr.bf16.mxu1 %v5699_v6 }
 0x119   :  { %v1473_v14 = vmax.f32 %v6609_v2, %v6624_v13 }
 0x11a   :  { %v5439_v15 = vpop.f32.mrf.mxu0  ;;  %5534 = vmatmul.mubr.msk.bf16.gmra.mxu0 %vm343_vm0, %v298_v8  ;;  %v305_v8 = vpack.c.bf16 %v186_v61, %v185_v57  ;;  %v196_v57 = vld [vmem:[%s8218_s0 + $0x518] sm:$0xff] }
 0x11b   :  { %5537 = vmatprep.mubr.msk.bf16.mxu0 %vm343_vm0, %v299_v12 }
 0x11c   :  { %v6636_v18 = vpop.f32.mrf.mxu0 }
 0x11e   :  { %v5440_v58 = vpop.f32.mrf.mxu0 }
 0x11f   :  { %v1476_v24 = vmax.f32 %v5439_v15, %v5440_v58 }
 0x120   :  { %v6650_v31 = vpop.f32.mrf.mxu0 }
 0x121   :  { %v1475_v32 = vmax.f32 %v6636_v18, %v6650_v31  ;;  %v1560_v50 = vmax.f32 %v1469_v11, %v1476_v24  ;;  %v191_v18 = vld [vmem:[%s8218_s0 + $0x4f0] sm:$0xff]  ;;  %v192_v31 = vld [vmem:[%s8218_s0 + $0x4f8] sm:$0xff] }
 0x122   :  { %v5443_v33 = vpop.f32.mrf.mxu0  ;;  %5538 = vmatmul.mubr.msk.bf16.gmra.mxu0 %vm343_vm0, %v300_v0 }
 0x123   :  { %5541 = vmatprep.mubr.msk.bf16.mxu0 %vm343_vm0, %v301_v29  ;;  %v6685_v34 = vadd.f32 %v6448_v41, %v1560_v50 }
 0x124   :  { %v848_v25 = vpop.f32.mrf.mxu0 }
 0x125   :  { %v1683_v15 = vpack.c.bf16 %v6685_v34, %v6469_v56  ;;  %v5703_v56 = vld [vmem:[%s8219_s3 + $0x168] sm:$0xff]  }
 0x126   :  { %v5444_v40 = vpop.f32.mrf.mxu0 }
 0x127   :  { %v1478_v46 = vmax.f32 %v5443_v33, %v5444_v40 }
 0x128   :  { %v851_v52 = vpop.f32.mrf.mxu0 }
 0x129   :  { %v1562_v51 = vmax.f32 %v1471_v45, %v1478_v46  ;;  %v1477_v54 = vmax.f32 %v848_v25, %v851_v52  ;;  %v193_v52 = vld [vmem:[%s8218_s0 + $0x500] sm:$0xff] }
 0x12a   :  { %v5447_v55 = vpop.f32.mrf.mxu0  ;;  %5542 = vmatmul.mubr.msk.bf16.gmra.mxu0 %vm343_vm0, %v302_v43 }
 0x12b   :  { %v6675_v59 = vadd.f32 %v6448_v41, %v1562_v51  ;;  %v1561_v36 = vmax.f32 %v1470_v53, %v1477_v54  ;;  %5545 = vmatprep.mubr.msk.bf16.mxu0 %vm343_vm0, %v303_v48  ;;  %v308_v51 = vpack.c.bf16 %v192_v31, %v191_v18  ;;  %v309_v54 = vpack.c.bf16 %v194_v60, %v193_v52 }
 0x12c   :  { %v864_v39 = vpop.f32.mrf.mxu0 }
 0x12d   :  { %v6694_v63 = vadd.f32 %v6448_v41, %v1561_v36  ;;  %v1685_v1 = vpack.c.bf16 %v6675_v59, %v6502_v20  ;;  %v5721_v20 = vld [vmem:[%s8219_s3 + $0x1e8] sm:$0xff]  }
 0x12e   :  { %v5448_v2 = vpop.f32.mrf.mxu0 }
 0x12f   :  { %v1480_v5 = vmax.f32 %v5447_v55, %v5448_v2  ;;  %v1684_v6 = vpack.c.bf16 %v6694_v63, %v6505_v21  ;;  %v1663_v12 = vpack.c.bf16 %v6694_v63, %v6685_v34  ;;  %v6744_v43 = vpack.c.bf16 %v6675_v59, %v6694_v63  ;;  %v197_v2 = vld [vmem:[%s8218_s0 + $0x520] sm:$0xff]  ;;  %v5761_v21 = vld [vmem:[%s8219_s3 + $0x548] sm:$0xff]   ;;  %v5719_v63 = vld [vmem:[%s8219_s3 + $0x1f0] sm:$0xff]  }
 0x130   :  { %v867_v13 = vpop.f32.mrf.mxu0 }
 0x131   :  { %v1564_v17 = vmax.f32 %v1473_v14, %v1480_v5  ;;  %v1479_v22 = vmax.f32 %v864_v39, %v867_v13  ;;  %3395 = vmatprep.mubr.bf16.mxu1 %v1684_v6  ;;  %v190_v14 = vld [vmem:[%s8218_s0 + $0x4e8] sm:$0xff]  ;;  %v195_v39 = vld [vmem:[%s8218_s0 + $0x510] sm:$0xff] }
 0x132   :  { %v5451_v23 = vpop.f32.mrf.mxu0  ;;  %5546 = vmatmul.mubr.msk.bf16.gmra.mxu0 %vm343_vm0, %v304_v4  ;;  %3396 = vmatmul.mubr.bf16.gmra.mxu1 %v1683_v15  ;;  %v307_v24 = vpack.c.bf16 %v190_v14, %v189_v47  ;;  %v198_v4 = vld [vmem:[%s8218_s0 + $0x528] sm:$0xff]  ;;  %v310_v6 = vpack.c.bf16 %v196_v57, %v195_v39  ;;  %v208_v39 = vld [vmem:[%s8218_s0 + $0x578] sm:$0xff] }
 0x133   :  { %v6715_v58 = vadd.f32 %v6448_v41, %v1564_v17  ;;  %v1563_v0 = vmax.f32 %v1472_v16, %v1479_v22  ;;  %5549 = vmatprep.mubr.msk.bf16.mxu0 %vm343_vm0, %v305_v8  ;;  %v311_v8 = vpack.c.bf16 %v198_v4, %v197_v2  ;;  %v199_v16 = vld [vmem:[%s8218_s0 + $0x530] sm:$0xff]  ;;  %v200_v17 = vld [vmem:[%s8218_s0 + $0x538] sm:$0xff]  ;;  %v5735_v22 = vld [vmem:[%s8219_s3 + $0x560] sm:$0xff]  }
 0x134   :  { %v880_v30 = vpop.f32.mrf.mxu0  ;;  %5280 = vmatprep.subr.bf16.mxu0 %v5735_v22  ;;  %v312_v14 = vpack.c.bf16 %v200_v17, %v199_v16  ;;  %v209_v2 = vld [vmem:[%s8218_s0 + $0x580] sm:$0xff]  ;;  %v210_v4 = vld [vmem:[%s8218_s0 + $0x588] sm:$0xff] }
 0x135   :  { %v6728_v29 = vadd.f32 %v6448_v41, %v1563_v0  ;;  %v1687_v33 = vpack.c.bf16 %v6715_v58, %v6712_v28  ;;  %v202_v0 = vld [vmem:[%s8218_s0 + $0x548] sm:$0xff]  ;;  %5281 = vmatpush3.bf16.msra.mxu0 %v5736_v44 }
 0x136   :  { %v5452_v35 = vpop.f32.mrf.mxu0 }
 0x137   :  { %v1482_v25 = vmax.f32 %v5451_v23, %v5452_v35  ;;  %v6734_v37 = vpack.c.bf16 %v6728_v29, %v6675_v59  ;;  %v1686_v3 = vpack.c.bf16 %v6728_v29, %v6550_v38  ;;  %v6740_v11 = vpack.c.bf16 %v6715_v58, %v6728_v29 }
 0x138   :  { %v883_v40 = vpop.f32.mrf.mxu0 }
 0x139   :  { %v1566_v45 = vmax.f32 %v1475_v32, %v1482_v25  ;;  %v1481_v46 = vmax.f32 %v880_v30, %v883_v40  ;;  %3402 = vmatprep.mubr.bf16.mxu1 %v6734_v37  ;;  %v313_v30 = vpack.c.bf16 %v202_v0, %v201_v27  ;;  %v204_v25 = vld [vmem:[%s8218_s0 + $0x558] sm:$0xff]  ;;  %v317_v0 = vpack.c.bf16 %v210_v4, %v209_v2 }
 0x13a   :  { %v6750_v48 = vpop.f32.mrf.mxu0  ;;  %5550 = vmatmul.mubr.msk.bf16.gmra.mxu0 %vm343_vm0, %v306_v19  ;;  %3403 = vmatmul.mubr.bf16.gmra.mxu1 %v6744_v43 }
 0x13b   :  { %v1565_v50 = vmax.f32 %v1474_v10, %v1481_v46  ;;  %5553 = vmatprep.mubr.msk.bf16.mxu0 %vm343_vm0, %v307_v24  ;;  %v6773_v7 = vadd.f32 %v6448_v41, %v1566_v45  ;;  %v203_v24 = vld [vmem:[%s8218_s0 + $0x550] sm:$0xff]  ;;  %v205_v45 = vld [vmem:[%s8218_s0 + $0x560] sm:$0xff]  ;;  %v206_v46 = vld [vmem:[%s8218_s0 + $0x568] sm:$0xff] }
 0x13c   :  { %v6764_v32 = vpop.f32.mrf.mxu0  ;;  %v314_v18 = vpack.c.bf16 %v204_v25, %v203_v24  ;;  %v315_v31 = vpack.c.bf16 %v206_v46, %v205_v45 }
 0x13d   :  { %v6776_v10 = vadd.f32 %v6448_v41, %v1565_v50 }
 0x13e   :  { %v6778_v53 = vpop.f32.mrf.mxu0 }
 0x13f   :  { %v6782_v55 = vpack.c.bf16 %v6776_v10, %v6715_v58  ;;  %v1708_v36 = vpack.c.bf16 %v6773_v7, %v6776_v10 }
 0x140   :  { %v899_v42 = vpop.f32.mrf.mxu0 }
 0x141   :  { %v1483_v17 = vmax.f32 %v6764_v32, %v899_v42  ;;  %v214_v42 = vld [vmem:[%s8218_s0 + $0x5a8] sm:$0xff] }
 0x142   :  { %v6786_v49 = vpop.f32.mrf.mxu0  ;;  %5554 = vmatmul.mubr.msk.bf16.gmra.mxu0 %vm343_vm0, %v308_v51 }
 0x143   :  { %5557 = vmatprep.mubr.msk.bf16.mxu0 %vm343_vm0, %v309_v54  ;;  %v207_v54 = vld [vmem:[%s8218_s0 + $0x570] sm:$0xff] }
 0x144   :  { %v912_v61 = vpop.f32.mrf.mxu0  ;;  %v316_v16 = vpack.c.bf16 %v208_v39, %v207_v54 }
 0x146   :  { %v6802_v5 = vpop.f32.mrf.mxu0 }
 0x148   :  { %v915_v13 = vpop.f32.mrf.mxu0 }
 0x149   :  { %v1485_v22 = vmax.f32 %v912_v61, %v915_v13 }
 0x14a   :  { %v6804_v15 = vpop.f32.mrf.mxu0  ;;  %5558 = vmatmul.mubr.msk.bf16.gmra.mxu0 %vm343_vm0, %v310_v6 }
 0x14b   :  { %5561 = vmatprep.mubr.msk.bf16.mxu0 %vm343_vm0, %v311_v8 }
 0x14c   :  { %v6817_v23 = vpop.f32.mrf.mxu0 }
 0x14e   :  { %v6828_v47 = vpop.f32.mrf.mxu0 }
 0x150   :  { %v931_v35 = vpop.f32.mrf.mxu0 }
 0x152   :  { %v5467_v19 = vpop.f32.mrf.mxu0  ;;  %5562 = vmatmul.mubr.msk.bf16.gmra.mxu0 %vm343_vm0, %v312_v14  ;;  %v1484_v14 = vmax.f32 %v6750_v48, %v6778_v53  ;;  %v212_v48 = vld [vmem:[%s8218_s0 + $0x598] sm:$0xff]  ;;  %v213_v53 = vld [vmem:[%s8218_s0 + $0x5a0] sm:$0xff] }
 0x153   :  { %5565 = vmatprep.mubr.msk.bf16.mxu0 %vm343_vm0, %v313_v30  ;;  %v319_v39 = vpack.c.bf16 %v214_v42, %v213_v53 }
 0x154   :  { %v6838_v40 = vpop.f32.mrf.mxu0 }
 0x156   :  { %v5468_v50 = vpop.f32.mrf.mxu0 }
 0x157   :  { %v1490_v6 = vmax.f32 %v5467_v19, %v5468_v50  ;;  %v211_v19 = vld [vmem:[%s8218_s0 + $0x590] sm:$0xff] }
 0x158   :  { %v6846_v52 = vpop.f32.mrf.mxu0  ;;  %v318_v54 = vpack.c.bf16 %v212_v48, %v211_v19 }
 0x159   :  { %v1489_v60 = vmax.f32 %v6838_v40, %v6846_v52  ;;  %v1567_v30 = vmax.f32 %v1483_v17, %v1490_v6  ;;  %v5753_v40 = vld [vmem:[%s8219_s3 + $0x558] sm:$0xff]  }
 0x15a   :  { %v5471_v51 = vpop.f32.mrf.mxu0  ;;  %5566 = vmatmul.mubr.msk.bf16.gmra.mxu0 %vm343_vm0, %v314_v18  ;;  %5282 = vmatprep.subr.bf16.mxu0 %v5753_v40 }
 0x15b   :  { %5569 = vmatprep.mubr.msk.bf16.mxu0 %vm343_vm0, %v315_v31  ;;  %v6885_v13 = vadd.f32 %v6448_v41, %v1567_v30  ;;  %v1487_v31 = vmax.f32 %v6817_v23, %v931_v35 }
 0x15c   :  { %v960_v57 = vpop.f32.mrf.mxu0 }
 0x15e   :  { %v5472_v8 = vpop.f32.mrf.mxu0 }
 0x15f   :  { %v1492_v27 = vmax.f32 %v5471_v51, %v5472_v8 }
 0x160   :  { %v963_v44 = vpop.f32.mrf.mxu0 }
 0x161   :  { %v1569_v24 = vmax.f32 %v1485_v22, %v1492_v27  ;;  %v1491_v25 = vmax.f32 %v960_v57, %v963_v44  ;;  %v217_v44 = vld [vmem:[%s8218_s0 + $0x5c0] sm:$0xff] }
 0x162   :  { %v5475_v45 = vpop.f32.mrf.mxu0  ;;  %5570 = vmatmul.mubr.msk.bf16.gmra.mxu0 %vm343_vm0, %v316_v16  ;;  %v1486_v16 = vmax.f32 %v6786_v49, %v6802_v5  ;;  %v216_v49 = vld [vmem:[%s8218_s0 + $0x5b8] sm:$0xff] }
 0x163   :  { %v6872_v46 = vadd.f32 %v6448_v41, %v1569_v24  ;;  %v1568_v32 = vmax.f32 %v1484_v14, %v1491_v25  ;;  %5573 = vmatprep.mubr.msk.bf16.mxu0 %vm343_vm0, %v317_v0  ;;  %v215_v0 = vld [vmem:[%s8218_s0 + $0x5b0] sm:$0xff]  ;;  %v218_v14 = vld [vmem:[%s8218_s0 + $0x5c8] sm:$0xff] }
 0x164   :  { %v976_v61 = vpop.f32.mrf.mxu0  ;;  %v321_v48 = vpack.c.bf16 %v218_v14, %v217_v44  ;;  %v5701_v44 = vld [vmem:[%s8219_s3 + $0x170] sm:$0xff]  }
 0x165   :  { %v6888_v50 = vadd.f32 %v6448_v41, %v1568_v32  ;;  %v1690_v18 = vpack.c.bf16 %v6872_v46, %v6715_v58  ;;  %v1723_v42 = vpack.c.bf16 %v6872_v46, %v6872_v46 }
 0x166   :  { %v5476_v51 = vpop.f32.mrf.mxu0 }
 0x167   :  { %v1494_v57 = vmax.f32 %v5475_v45, %v5476_v51  ;;  %v6895_v2 = vpack.c.bf16 %v6872_v46, %v6888_v50  ;;  %v6899_v4 = vpack.c.bf16 %v6888_v50, %v6885_v13  ;;  %v1689_v6 = vpack.c.bf16 %v6888_v50, %v6728_v29 }
 0x168   :  { %v979_v8 = vpop.f32.mrf.mxu0  ;;  %v320_v45 = vpack.c.bf16 %v216_v49, %v215_v0  ;;  %v5757_v0 = vld [vmem:[%s8219_s3 + $0x550] sm:$0xff]  }
 0x169   :  { %v1571_v23 = vmax.f32 %v1487_v31, %v1494_v57  ;;  %v1493_v35 = vmax.f32 %v976_v61, %v979_v8  ;;  %3409 = vmatprep.mubr.bf16.mxu1 %v6895_v2  ;;  %v1488_v31 = vmax.f32 %v6804_v15, %v6828_v47  ;;  %v219_v15 = vld [vmem:[%s8218_s0 + $0x5d0] sm:$0xff]  ;;  %v220_v47 = vld [vmem:[%s8218_s0 + $0x5d8] sm:$0xff] }
 0x16a   :  { %v5479_v17 = vpop.f32.mrf.mxu0  ;;  %5574 = vmatmul.mubr.msk.bf16.gmra.mxu0 %vm343_vm0, %v318_v54  ;;  %3410 = vmatmul.mubr.bf16.gmra.mxu1 %v6899_v4 }
 0x16b   :  { %v6909_v22 = vadd.f32 %v6448_v41, %v1571_v23  ;;  %v1570_v27 = vmax.f32 %v1486_v16, %v1493_v35  ;;  %5577 = vmatprep.mubr.msk.bf16.mxu0 %vm343_vm0, %v319_v39  ;;  %v221_v16 = vld [vmem:[%s8218_s0 + $0x5e0] sm:$0xff]  ;;  %v222_v23 = vld [vmem:[%s8218_s0 + $0x5e8] sm:$0xff] }
 0x16c   :  { %v992_v5 = vpop.f32.mrf.mxu0  ;;  %v323_v14 = vpack.c.bf16 %v222_v23, %v221_v16  ;;  %v5766_v23 = vld [vmem:[%s8219_s3 + $0x500] sm:$0xff]  }
 0x16d   :  { %v6925_v30 = vadd.f32 %v6448_v41, %v1570_v27  ;;  %v1692_v24 = vpack.c.bf16 %v6909_v22, %v6773_v7  ;;  %v5700_v27 = vld [vmem:[%s8219_s3 + $0x138] sm:$0xff]  }
 0x16e   :  { %v5480_v25 = vpop.f32.mrf.mxu0 }
 0x16f   :  { %v1496_v19 = vmax.f32 %v5479_v17, %v5480_v25  ;;  %v1724_v32 = vpack.c.bf16 %v6925_v30, %v6925_v30  ;;  %v1691_v61 = vpack.c.bf16 %v6925_v30, %v6776_v10  ;;  %v322_v17 = vpack.c.bf16 %v220_v47, %v219_v15  ;;  %v5758_v25 = vld [vmem:[%s8219_s3 + $0x510] sm:$0xff]   ;;  %v5705_v47 = vld [vmem:[%s8219_s3 + $0x160] sm:$0xff]  }
 0x170   :  { %v995_v53 = vpop.f32.mrf.mxu0 }
 0x171   :  { %v1573_v51 = vmax.f32 %v1489_v60, %v1496_v19  ;;  %v1495_v54 = vmax.f32 %v992_v5, %v995_v53  ;;  %3415 = vmatprep.mubr.bf16.mxu1 %v1724_v32  ;;  %v5702_v19 = vld [vmem:[%s8219_s3 + $0x130] sm:$0xff]  }
 0x172   :  { %v6940_v39 = vpop.f32.mrf.mxu0  ;;  %5578 = vmatmul.mubr.msk.bf16.gmra.mxu0 %vm343_vm0, %v320_v45  ;;  %3416 = vmatmul.mubr.bf16.gmra.mxu1 %v1723_v42  ;;  %v223_v32 = vld [vmem:[%s8218_s0 + $0x5f0] sm:$0xff]  ;;  %v5762_v42 = vld [vmem:[%s8219_s3 + $0x508] sm:$0xff]  }
 0x173   :  { %v1572_v57 = vmax.f32 %v1488_v31, %v1495_v54  ;;  %3454 = vmatprep.mubr.bf16.mxu1 %v1661_v62  ;;  %5581 = vmatprep.mubr.msk.bf16.mxu0 %vm343_vm0, %v321_v48  ;;  %v5755_v62 = vld [vmem:[%s8219_s3 + $0x518] sm:$0xff]   ;;  %v6962_v60 = vadd.f32 %v6448_v41, %v1573_v51 }
 0x174   :  { %v6956_v52 = vpop.f32.mrf.mxu0  ;;  %5283 = vmatpush3.bf16.msra.mxu0 %v5755_v62  ;;  %v224_v48 = vld [vmem:[%s8218_s0 + $0x5f8] sm:$0xff]  ;;  %v5765_v62 = vld [vmem:[%s8219_s3 + $0x540] sm:$0xff]  }
 0x175   :  { %8242 = vst [vmem:[#allocation2_spill] sm:$0xff] %v6962_v60  ;;  %v6965_v8 = vadd.f32 %v6448_v41, %v1572_v57  ;;  %5284 = vmatprep.subr.bf16.mxu0 %v5757_v0  ;;  %v324_v51 = vpack.c.bf16 %v224_v48, %v223_v32  ;;  %v5704_v57 = vld [vmem:[%s8219_s3 + $0x128] sm:$0xff]   ;;  %v228_v0 = vld [vmem:[%s8218_s0 + $0x618] sm:$0xff] }
 0x176   :  { %v6973_v35 = vpop.f32.mrf.mxu0  ;;  %v5708_v32 = vld [vmem:[%s8219_s3 + $0x118] sm:$0xff]  }
 0x177   :  { %v1709_v49 = vpack.c.bf16 %v6962_v60, %v6965_v8 }
 0x178   :  { %v6983_v5 = vpop.f32.mrf.mxu0  ;;  %5285 = vmatpush3.bf16.msra.mxu0 %v5758_v25 }
 0x179   :  { %5286 = vmatprep.subr.bf16.mxu0 %v5761_v21  ;;  %v7079_v21 = vpack.c.bf16 %v6909_v22, %v6925_v30 }
 0x17a   :  { %v6991_v45 = vpop.f32.mrf.mxu0  ;;  %5582 = vmatmul.mubr.msk.bf16.gmra.mxu0 %vm343_vm0, %v322_v17  ;;  %3455 = vmatmul.mubr.bf16.vlgmr.msra.gmra.mxu1 %v1660_v26  ;;  %v225_v26 = vld [vmem:[%s8218_s0 + $0x600] sm:$0xff] }
 0x17b   :  { %4907 = vmatpush3.bf16.msra.mxu1 %v5700_v27  ;;  %3462 = vmatprep.mubr.bf16.mxu1 %v1686_v3  ;;  %v226_v3 = vld [vmem:[%s8218_s0 + $0x608] sm:$0xff]  ;;  %v5706_v17 = vld [vmem:[%s8219_s3 + $0x120] sm:$0xff]   ;;  %v227_v27 = vld [vmem:[%s8218_s0 + $0x610] sm:$0xff] }
 0x17c   :  { %v7009_v53 = vpop.f32.mrf.mxu0  ;;  %4908 = vmatprep.subr.bf16.mxu1 %v5701_v44  ;;  %5585 = vmatprep.mubr.msk.bf16.mxu0 %vm343_vm0, %v323_v14  ;;  %v325_v40 = vpack.c.bf16 %v226_v3, %v225_v26  ;;  %v5707_v44 = vld [vmem:[%s8219_s3 + $0x158] sm:$0xff]   ;;  %v326_v25 = vpack.c.bf16 %v228_v0, %v227_v27  ;;  %v5710_v3 = vld [vmem:[%s8219_s3 + $0x110] sm:$0xff]   ;;  %v5715_v27 = vld [vmem:[%s8219_s3 + $0x140] sm:$0xff]  }
 0x17d   :  { %5287 = vmatpush3.bf16.msra.mxu0 %v5762_v42 }
 0x17e   :  { %v7027_v31 = vpop.f32.mrf.mxu0  ;;  %5288 = vmatprep.subr.bf16.mxu0 %v5765_v62  ;;  %v5712_v62 = vld [vmem:[%s8219_s3 + $0x108] sm:$0xff]  }
 0x17f   :  { %v1500_v54 = vmax.f32 %v6991_v45, %v7027_v31  ;;  %4909 = vmatpush3.bf16.msra.mxu1 %v5702_v19  ;;  %v5722_v31 = vld [vmem:[%s8219_s3 + $0x1a8] sm:$0xff]  }
 0x180   :  { %v7034_v15 = vpop.f32.mrf.mxu0  ;;  %4910 = vmatprep.subr.bf16.mxu1 %v5703_v56  ;;  %v5709_v56 = vld [vmem:[%s8219_s3 + $0x150] sm:$0xff]  }
 0x181   :  { %5289 = vmatpush3.bf16.msra.mxu0 %v5766_v23 }
 0x182   :  { %v7042_v16 = vpop.f32.mrf.mxu0  ;;  %5586 = vmatmul.mubr.msk.bf16.gmra.mxu0 %vm343_vm0, %v324_v51  ;;  %3463 = vmatmul.mubr.bf16.gmra.mxu1 %v1685_v1  ;;  %v5711_v51 = vld [vmem:[%s8219_s3 + $0x148] sm:$0xff]  }
 0x183   :  { %3469 = vmatprep.mubr.bf16.mxu1 %v6782_v55  ;;  %4911 = vmatpush3.bf16.msra.mxu1 %v5704_v57 }
 0x184   :  { %v7061_v1 = vpop.f32.mrf.mxu0  ;;  %4912 = vmatprep.subr.bf16.mxu1 %v5705_v47  ;;  %5589 = vmatprep.mubr.msk.bf16.mxu0 %vm343_vm0, %v325_v40  ;;  %v1497_v47 = vmax.f32 %v6956_v52, %v6983_v5  ;;  %v1726_v52 = vpack.c.bf16 %v6965_v8, %v6965_v8 }
 0x186   :  { %v7067_v14 = vpop.f32.mrf.mxu0 }
 0x187   :  { %v1502_v19 = vmax.f32 %v7042_v16, %v7067_v14  ;;  %4913 = vmatpush3.bf16.msra.mxu1 %v5706_v17  ;;  %v7101_v17 = vpack.c.bf16 %v6925_v30, %v6872_v46  ;;  %v5726_v14 = vld [vmem:[%s8219_s3 + $0x198] sm:$0xff]  }
 0x188   :  { %v1043_v48 = vpop.f32.mrf.mxu0  ;;  %4914 = vmatprep.subr.bf16.mxu1 %v5707_v44 }
 0x18a   :  { %v5495_v26 = vpop.f32.mrf.mxu0  ;;  %3470 = vmatmul.mubr.bf16.gmra.mxu1 %v6740_v11  ;;  %5590 = vmatmul.mubr.msk.bf16.gmra.mxu0 %vm343_vm0, %v326_v25  ;;  %v5716_v25 = vld [vmem:[%s8219_s3 + $0x100] sm:$0xff]  }
 0x18b   :  { %3476 = vmatprep.mubr.bf16.mxu1 %v7079_v21  ;;  %4915 = vmatpush3.bf16.msra.mxu1 %v5708_v32 }
 0x18c   :  { %v7087_v42 = vpop.f32.mrf.mxu0  ;;  %4916 = vmatprep.subr.bf16.mxu1 %v5709_v56  ;;  %v5717_v56 = vld [vmem:[%s8219_s3 + $0x1f8] sm:$0xff]  }
 0x18e   :  { %v5496_v57 = vpop.f32.mrf.mxu0 }
 0x18f   :  { %v1504_v40 = vmax.f32 %v5495_v26, %v5496_v57  ;;  %4917 = vmatpush3.bf16.msra.mxu1 %v5710_v3 }
 0x190   :  { %v7097_v23 = vpop.f32.mrf.mxu0  ;;  %4918 = vmatprep.subr.bf16.mxu1 %v5711_v51 }
 0x191   :  { %v1574_v0 = vmax.f32 %v1497_v47, %v1504_v40  ;;  %v1725_v47 = vpack.c.bf16 %v6909_v22, %v6909_v22  ;;  %v1498_v40 = vmax.f32 %v6940_v39, %v6973_v35 }
 0x192   :  { %v5499_v5 = vpop.f32.mrf.mxu0  ;;  %3477 = vmatmul.mubr.bf16.gmra.mxu1 %v7101_v17 }
 0x193   :  { %v7110_v44 = vadd.f32 %v6448_v41, %v1574_v0  ;;  %3482 = vmatprep.mubr.bf16.mxu1 %v1726_v52  ;;  %4919 = vmatpush3.bf16.msra.mxu1 %v5712_v62  ;;  %v1499_v41 = vmax.f32 %v7009_v53, %v7034_v15  ;;  %v7129_v52 = vld [vmem:[%s8220_s2] ss:$0 sm:$0xff] }
 0x194   :  { %v1072_v32 = vpop.f32.mrf.mxu0  ;;  %4920 = vmatprep.subr.bf16.mxu1 %v5715_v27 }
 0x196   :  { %v5500_v3 = vpop.f32.mrf.mxu0 }
 0x197   :  { %v1506_v51 = vmax.f32 %v5499_v5, %v5500_v3  ;;  %4921 = vmatpush3.bf16.msra.mxu1 %v5716_v25  ;;  %v5718_v3 = vld [vmem:[%s8219_s3 + $0x1b8] sm:$0xff]  }
 0x198   :  { %v1075_v57 = vpop.f32.mrf.mxu0  ;;  %4952 = vmatprep.subr.bf16.mxu1 %v5717_v56 }
 0x199   :  { %v1576_v62 = vmax.f32 %v1499_v41, %v1506_v51  ;;  %v1505_v27 = vmax.f32 %v1072_v32, %v1075_v57  ;;  %v1501_v32 = vmax.f32 %v7061_v1, %v1043_v48  ;;  %v1688_v57 = vpack.c.bf16 %v6885_v13, %v6675_v59 }
 0x19a   :  { %v5503_v0 = vpop.f32.mrf.mxu0  ;;  %3483 = vmatmul.mubr.bf16.gmra.mxu1 %v1725_v47  ;;  %v1503_v13 = vmax.f32 %v7087_v42, %v7097_v23 }
 0x19b   :  { %v7132_v53 = vadd.f32 %v7129_v52, %v1576_v62  ;;  %v1575_v15 = vmax.f32 %v1498_v40, %v1505_v27  ;;  %3521 = vmatprep.mubr.bf16.mxu1 %v1663_v12  ;;  %v5720_v40 = vld [vmem:[%s8219_s3 + $0x1b0] sm:$0xff]  }
 0x19c   :  { %v1088_v5 = vpop.f32.mrf.mxu0 }
 0x19d   :  { %v7138_v39 = vadd.f32 %v7129_v52, %v1575_v15 }
 0x19e   :  { %v5504_v25 = vpop.f32.mrf.mxu0 }
 0x19f   :  { %v1508_v56 = vmax.f32 %v5503_v0, %v5504_v25  ;;  %v5723_v0 = vld [vmem:[%s8219_s3 + $0x1e0] sm:$0xff]  }
 0x1a0   :  { %v1091_v34 = vpop.f32.mrf.mxu0 }
 0x1a1   :  { %v1578_v12 = vmax.f32 %v1501_v32, %v1508_v56  ;;  %v1507_v51 = vmax.f32 %v1088_v5, %v1091_v34  ;;  %v5724_v32 = vld [vmem:[%s8219_s3 + $0x1a0] sm:$0xff]  }
 0x1a2   :  { %v5507_v47 = vpop.f32.mrf.mxu0  ;;  %3522 = vmatmul.mubr.bf16.vlgmr.msra.gmra.mxu1 %v1662_v9  ;;  %v5734_v9 = vld [vmem:[%s8219_s3 + $0x238] sm:$0xff]  }
 0x1a3   :  { %v7157_v1 = vadd.f32 %v7129_v52, %v1578_v12  ;;  %v1577_v48 = vmax.f32 %v1500_v54, %v1507_v51  ;;  %4953 = vmatpush3.bf16.msra.mxu1 %v5718_v3  ;;  %3529 = vmatprep.mubr.bf16.mxu1 %v1688_v57  ;;  %v5725_v3 = vld [vmem:[%s8219_s3 + $0x1d8] sm:$0xff]   ;;  %v5727_v12 = vld [vmem:[%s8219_s3 + $0x1d0] sm:$0xff]   ;;  %v7224_v51 = vpack.c.bf16 %v7138_v39, %v7110_v44 }
 0x1a4   :  { %v1104_v62 = vpop.f32.mrf.mxu0  ;;  %4954 = vmatprep.subr.bf16.mxu1 %v5719_v63 }
 0x1a5   :  { %8243 = vst [vmem:[#allocation3_spill] sm:$0xff] %v7157_v1  ;;  %v7169_v38 = vadd.f32 %v7129_v52, %v1577_v48 }
 0x1a6   :  { %v5508_v59 = vpop.f32.mrf.mxu0 }
 0x1a7   :  { %v1510_v45 = vmax.f32 %v5507_v47, %v5508_v59  ;;  %4955 = vmatpush3.bf16.msra.mxu1 %v5720_v40  ;;  %v7180_v54 = vpack.c.bf16 %v7157_v1, %v7169_v38  ;;  %v5728_v47 = vld [vmem:[%s8219_s3 + $0x190] sm:$0xff]   ;;  %v5729_v40 = vld [vmem:[%s8219_s3 + $0x1c8] sm:$0xff]  }
 0x1a8   :  { %v1107_v27 = vpop.f32.mrf.mxu0  ;;  %4956 = vmatprep.subr.bf16.mxu1 %v5721_v20 }
 0x1a9   :  { %v1580_v42 = vmax.f32 %v1503_v13, %v1510_v45  ;;  %v1509_v23 = vmax.f32 %v1104_v62, %v1107_v27  ;;  %v7247_v13 = vpack.c.bf16 %v6965_v8, %v6909_v22  ;;  %v5731_v45 = vld [vmem:[%s8219_s3 + $0x1c0] sm:$0xff]  }
 0x1aa   :  { %v7187_v5 = vpop.f32.mrf.mxu0  ;;  %3530 = vmatmul.mubr.bf16.gmra.mxu1 %v1687_v33 }
 0x1ab   :  { %v1579_v25 = vmax.f32 %v1502_v19, %v1509_v23  ;;  %3536 = vmatprep.mubr.bf16.mxu1 %v6895_v2  ;;  %4957 = vmatpush3.bf16.msra.mxu1 %v5722_v31  ;;  %v7203_v28 = vadd.f32 %v7129_v52, %v1580_v42  ;;  %8244 = vst [vmem:[#allocation4_spill] sm:$0xff] %v7247_v13  ;;  %v5732_v42 = vld [vmem:[%s8219_s3 + $0x180] sm:$0xff]  }
 0x1ac   :  { %v1120_v56 = vpop.f32.mrf.mxu0  ;;  %4958 = vmatprep.subr.bf16.mxu1 %v5723_v0  ;;  %v1728_v31 = vpack.c.bf16 %v7132_v53, %v7132_v53 }
 0x1ad   :  { %v7206_v33 = vadd.f32 %v7129_v52, %v1579_v25 }
 0x1ae   :  { %v7208_v16 = vpop.f32.mrf.mxu0 }
 0x1af   :  { %4959 = vmatpush3.bf16.msra.mxu1 %v5724_v32  ;;  %v7215_v19 = vpack.c.bf16 %v7206_v33, %v7157_v1  ;;  %v5733_v32 = vld [vmem:[%s8219_s3 + $0x278] sm:$0xff]  }
 0x1b0   :  { %v1123_v63 = vpop.f32.mrf.mxu0  ;;  %4960 = vmatprep.subr.bf16.mxu1 %v5725_v3  ;;  %v8227_v3 = vmov 0.0  }
 0x1b1   :  { %5593 = vmatprep.subr.bf16.mxu0 %v8227_v3  ;;  %v1511_v34 = vmax.f32 %v1120_v56, %v1123_v63  ;;  %v5738_v56 = vld [vmem:[%s8219_s3 + $0x230] sm:$0xff]  }
 0x1b2   :  { %v7226_v57 = vpop.f32.mrf.mxu0  ;;  %3537 = vmatmul.mubr.bf16.gmra.mxu1 %v1708_v36  ;;  %v5730_v36 = vld [vmem:[%s8219_s3 + $0x188] sm:$0xff]  }
 0x1b3   :  { %3543 = vmatprep.mubr.bf16.mxu1 %v7224_v51  ;;  %4961 = vmatpush3.bf16.msra.mxu1 %v5726_v14 }
 0x1b4   :  { %v1136_v48 = vpop.f32.mrf.mxu0  ;;  %4962 = vmatprep.subr.bf16.mxu1 %v5727_v12 }
 0x1b6   :  { %v7238_v62 = vpop.f32.mrf.mxu0 }
 0x1b7   :  { %v1514_v20 = vmax.f32 %v7226_v57, %v7238_v62  ;;  %4963 = vmatpush3.bf16.msra.mxu1 %v5728_v47 }
 0x1b8   :  { %v1139_v59 = vpop.f32.mrf.mxu0  ;;  %4964 = vmatprep.subr.bf16.mxu1 %v5729_v40 }
 0x1ba   :  { %v7254_v27 = vpop.f32.mrf.mxu0  ;;  %v4830_v0 = vpop.f32.mrf.mxu1  ;;  %3544 = vmatmul.mubr.bf16.gmra.mxu1 %v7247_v13 }
 0x1bb   :  { %3549 = vmatprep.mubr.bf16.mxu1 %v1728_v31  ;;  %4965 = vmatpush3.bf16.msra.mxu1 %v5730_v36  ;;  %v1727_v36 = vpack.c.bf16 %v6962_v60, %v6962_v60 }
 0x1bc   :  { %v7260_v23 = vpop.f32.mrf.mxu0  ;;  %v4831_v25 = vpop.f32.mrf.mxu1  ;;  %4966 = vmatprep.subr.bf16.mxu1 %v5731_v45 }
 0x1bd   :  { %v7266_v14 = vadd.f32 %v4831_v25, %v4830_v0 }
 0x1be   :  { %v7268_v12 = vpop.f32.mrf.mxu0 }
 0x1bf   :  { %v1516_v47 = vmax.f32 %v7254_v27, %v7268_v12  ;;  %4967 = vmatpush3.bf16.msra.mxu1 %v5732_v42  ;;  %v5737_v42 = vld [vmem:[%s8219_s3 + $0x270] sm:$0xff]  }
 0x1c0   :  { %v1155_v40 = vpop.f32.mrf.mxu0  ;;  %4998 = vmatprep.subr.bf16.mxu1 %v5733_v32 }
 0x1c1   :  { %v1515_v29 = vmax.f32 %v7260_v23, %v1155_v40 }
 0x1c2   :  { %v5523_v45 = vpop.f32.mrf.mxu0  ;;  %3550 = vmatmul.mubr.bf16.gmra.mxu1 %v1727_v36  ;;  %v1513_v36 = vmax.f32 %v1136_v48, %v1139_v59 }
 0x1c3   :  { %3588 = vmatprep.mubr.bf16.mxu1 %v6734_v37 }
 0x1c4   :  { %v7275_v31 = vpop.f32.mrf.mxu0 }
 0x1c6   :  { %v5524_v0 = vpop.f32.mrf.mxu0 }
 0x1c7   :  { %v1518_v25 = vmax.f32 %v5523_v45, %v5524_v0 }
 0x1c8   :  { %v7280_v35 = vpop.f32.mrf.mxu0 }
 0x1c9   :  { %v1581_v32 = vmax.f32 %v1511_v34, %v1518_v25  ;;  %v5739_v34 = vld [vmem:[%s8219_s3 + $0x268] sm:$0xff]   ;;  %v5741_v25 = vld [vmem:[%s8219_s3 + $0x260] sm:$0xff]   ;;  %v1517_v57 = vmax.f32 %v7275_v31, %v7280_v35 }
 0x1ca   :  { %v5527_v15 = vpop.f32.mrf.mxu0  ;;  %3589 = vmatmul.mubr.bf16.vlgmr.msra.gmra.mxu1 %v6744_v43  ;;  %v5759_v43 = vld [vmem:[%s8219_s3 + $0x2e8] sm:$0xff]  }
 0x1cb   :  { %v7287_v37 = vadd.f32 %v7129_v52, %v1581_v32  ;;  %4999 = vmatpush3.bf16.msra.mxu1 %v5734_v9  ;;  %3596 = vmatprep.mubr.bf16.mxu1 %v1690_v18  ;;  %v1512_v9 = vmax.f32 %v7187_v5, %v7208_v16  ;;  %v5740_v18 = vld [vmem:[%s8219_s3 + $0x228] sm:$0xff]   ;;  %v5742_v16 = vld [vmem:[%s8219_s3 + $0x220] sm:$0xff]  }
 0x1cc   :  { %v1184_v63 = vpop.f32.mrf.mxu0  ;;  %5000 = vmatprep.subr.bf16.mxu1 %v5737_v42 }
 0x1cd   :  { %8245 = vst [vmem:[#allocation5_spill] sm:$0xff] %v7287_v37 }
 0x1ce   :  { %v5528_v45 = vpop.f32.mrf.mxu0 }
 0x1cf   :  { %v1520_v58 = vmax.f32 %v5527_v15, %v5528_v45  ;;  %5001 = vmatpush3.bf16.msra.mxu1 %v5738_v56  ;;  %v5743_v56 = vld [vmem:[%s8219_s3 + $0x258] sm:$0xff]  }
 0x1d0   :  { %v1187_v0 = vpop.f32.mrf.mxu0  ;;  %5002 = vmatprep.subr.bf16.mxu1 %v5739_v34  ;;  %v5744_v45 = vld [vmem:[%s8219_s3 + $0x218] sm:$0xff]  }
 0x1d1   :  { %v1583_v48 = vmax.f32 %v1513_v36, %v1520_v58  ;;  %v1519_v59 = vmax.f32 %v1184_v63, %v1187_v0  ;;  %v5745_v58 = vld [vmem:[%s8219_s3 + $0x250] sm:$0xff]  }
 0x1d2   :  { %v5531_v42 = vpop.f32.mrf.mxu0  ;;  %3597 = vmatmul.mubr.bf16.gmra.mxu1 %v1689_v6 }
 0x1d3   :  { %v7312_v15 = vadd.f32 %v7129_v52, %v1583_v48  ;;  %v1582_v5 = vmax.f32 %v1512_v9, %v1519_v59  ;;  %3603 = vmatprep.mubr.bf16.mxu1 %v7079_v21  ;;  %5003 = vmatpush3.bf16.msra.mxu1 %v5740_v18  ;;  %v5789_v18 = vld [vmem:[%s8219_s3 + $0x638] sm:$0xff]   ;;  %v7348_v48 = vpack.c.bf16 %v7169_v38, %v7132_v53 }
 0x1d4   :  { %v1200_v32 = vpop.f32.mrf.mxu0  ;;  %5004 = vmatprep.subr.bf16.mxu1 %v5741_v25 }
 0x1d5   :  { %v7323_v50 = vadd.f32 %v7129_v52, %v1582_v5 }
 0x1d6   :  { %v5532_v63 = vpop.f32.mrf.mxu0 }
 0x1d7   :  { %8246 = vst [vmem:[#allocation6_spill] sm:$0xff] %v7323_v50  ;;  %v7329_v34 = vpack.c.bf16 %v7323_v50, %v7287_v37  ;;  %v1522_v36 = vmax.f32 %v5531_v42, %v5532_v63  ;;  %5005 = vmatpush3.bf16.msra.mxu1 %v5742_v16  ;;  %v7336_v23 = vpack.c.bf16 %v7312_v15, %v7323_v50  ;;  %v5746_v16 = vld [vmem:[%s8219_s3 + $0x210] sm:$0xff]  }
 0x1d8   :  { %v1203_v9 = vpop.f32.mrf.mxu0  ;;  %5006 = vmatprep.subr.bf16.mxu1 %v5743_v56  ;;  %v5747_v56 = vld [vmem:[%s8219_s3 + $0x248] sm:$0xff]  }
 0x1d9   :  { %v1585_v0 = vmax.f32 %v1515_v29, %v1522_v36  ;;  %v1521_v25 = vmax.f32 %v1200_v32, %v1203_v9  ;;  %4057 = vmatprep.mubr.bf16.mxu0 %v7336_v23  ;;  %v5792_v29 = vld [vmem:[%s8219_s3 + $0x630] sm:$0xff]  }
 0x1da   :  { %v5535_v59 = vpop.f32.mrf.mxu0  ;;  %3604 = vmatmul.mubr.bf16.gmra.mxu1 %v7101_v17  ;;  %4058 = vmatmul.mubr.bf16.vlgmr.msra.gmra.mxu0 %v7329_v34 }
 0x1db   :  { %v7354_v42 = vadd.f32 %v7129_v52, %v1585_v0  ;;  %v1584_v5 = vmax.f32 %v1514_v20, %v1521_v25  ;;  %3610 = vmatprep.mubr.bf16.mxu1 %v7348_v48  ;;  %5007 = vmatpush3.bf16.msra.mxu1 %v5744_v45  ;;  %v5748_v45 = vld [vmem:[%s8219_s3 + $0x208] sm:$0xff]  }
 0x1dc   :  { %v1216_v32 = vpop.f32.mrf.mxu0  ;;  %5008 = vmatprep.subr.bf16.mxu1 %v5745_v58  ;;  %5594 = vmatpush3.bf16.msra.mxu0 %v5789_v18  ;;  %v7390_v58 = vpack.c.bf16 %v7132_v53, %v7138_v39  ;;  %v5749_v18 = vld [vmem:[%s8219_s3 + $0x240] sm:$0xff]   ;;  %v5795_v0 = vld [vmem:[%s8219_s3 + $0x628] sm:$0xff]  }
 0x1dd   :  { %v7372_v62 = vadd.f32 %v7129_v52, %v1584_v5  ;;  %5595 = vmatprep.subr.bf16.mxu0 %v8227_v3 }
 0x1de   :  { %v5536_v63 = vpop.f32.mrf.mxu0 }
 0x1df   :  { %8247 = vst [vmem:[#allocation7_spill] sm:$0xff] %v7372_v62  ;;  %v1524_v36 = vmax.f32 %v5535_v59, %v5536_v63  ;;  %5009 = vmatpush3.bf16.msra.mxu1 %v5746_v16  ;;  %v7382_v9 = vpack.c.bf16 %v7354_v42, %v7372_v62  ;;  %v7386_v35 = vpack.c.bf16 %v7372_v62, %v7312_v15 }
 0x1e0   :  { %v1219_v31 = vpop.f32.mrf.mxu0  ;;  %5010 = vmatprep.subr.bf16.mxu1 %v5747_v56  ;;  %5596 = vmatpush3.bf16.msra.mxu0 %v5792_v29  ;;  %v1730_v16 = vpack.c.bf16 %v7157_v1, %v7157_v1 }
 0x1e1   :  { %v1587_v59 = vmax.f32 %v1517_v57, %v1524_v36  ;;  %v1523_v5 = vmax.f32 %v1216_v32, %v1219_v31  ;;  %5597 = vmatprep.subr.bf16.mxu0 %v8227_v3  ;;  %v5750_v32 = vld [vmem:[%s8219_s3 + $0x200] sm:$0xff]   ;;  %v5751_v36 = vld [vmem:[%s8219_s3 + $0x2f8] sm:$0xff]  }
 0x1e2   :  { %v7403_v56 = vpop.f32.mrf.mxu0  ;;  %3611 = vmatmul.mubr.bf16.gmra.mxu1 %v7390_v58  ;;  %v5798_v31 = vld [vmem:[%s8219_s3 + $0x620] sm:$0xff]  }
 0x1e3   :  { %v7407_v29 = vadd.f32 %v7129_v52, %v1587_v59  ;;  %v1586_v63 = vmax.f32 %v1516_v47, %v1523_v5  ;;  %3616 = vmatprep.mubr.bf16.mxu1 %v1730_v16  ;;  %5011 = vmatpush3.bf16.msra.mxu1 %v5748_v45  ;;  %v5800_v59 = vld [vmem:[%s8219_s3 + $0x618] sm:$0xff]   ;;  %v7446_v16 = vpop.f32.mrf.mxu1  ;;  %v5805_v45 = vld [vmem:[%s8219_s3 + $0x608] sm:$0xff]  }
 0x1e4   :  { %v7415_v57 = vpop.f32.mrf.mxu0  ;;  %5012 = vmatprep.subr.bf16.mxu1 %v5749_v18  ;;  %5598 = vmatpush3.bf16.msra.mxu0 %v5795_v0  ;;  %v1729_v0 = vpack.c.bf16 %v7169_v38, %v7169_v38 }
 0x1e5   :  { %v7424_v27 = vadd.f32 %v7129_v52, %v1586_v63  ;;  %5599 = vmatprep.subr.bf16.mxu0 %v8227_v3 }
 0x1e6   :  { %v7427_v12 = vpop.f32.mrf.mxu0 }
 0x1e7   :  { %v7431_v47 = vpack.c.bf16 %v7424_v27, %v7354_v42  ;;  %5013 = vmatpush3.bf16.msra.mxu1 %v5750_v32  ;;  %v5802_v32 = vld [vmem:[%s8219_s3 + $0x610] sm:$0xff]  }
 0x1e8   :  { %v7435_v18 = vpop.f32.mrf.mxu0  ;;  %5044 = vmatprep.subr.bf16.mxu1 %v5751_v36  ;;  %5600 = vmatpush3.bf16.msra.mxu0 %v5798_v31  ;;  %v5752_v31 = vld [vmem:[%s8219_s3 + $0x2b8] sm:$0xff]  }
 0x1e9   :  { %5601 = vmatprep.subr.bf16.mxu0 %v8227_v3 }
 0x1ea   :  { %v7443_v5 = vpop.f32.mrf.mxu0  ;;  %3617 = vmatmul.mubr.bf16.gmra.mxu1 %v1729_v0  ;;  %v7459_v0 = vpop.f32.mrf.mxu1 }
 0x1eb   :  { %3655 = vmatprep.mubr.bf16.mxu1 %v6782_v55 }
 0x1ec   :  { %v7448_v63 = vpop.f32.mrf.mxu0  ;;  %5602 = vmatpush3.bf16.msra.mxu0 %v5800_v59  ;;  %v5754_v59 = vld [vmem:[%s8219_s3 + $0x2f0] sm:$0xff]  }
 0x1ed   :  { %5603 = vmatprep.subr.bf16.mxu0 %v8227_v3 }
 0x1ee   :  { %v7454_v36 = vpop.f32.mrf.mxu0 }
 0x1f0   :  { %v7461_v55 = vpop.f32.mrf.mxu0  ;;  %5604 = vmatpush3.bf16.msra.mxu0 %v5802_v32  ;;  %v5756_v32 = vld [vmem:[%s8219_s3 + $0x2b0] sm:$0xff]  }
 0x1f1   :  { %5605 = vmatprep.subr.bf16.mxu0 %v8227_v3 }
 0x1f2   :  { %v7470_v25 = vpop.f32.mrf.mxu0  ;;  %v4836_v20 = vpop.f32.mrf.mxu1  ;;  %3656 = vmatmul.mubr.bf16.vlgmr.msra.gmra.mxu1 %v6740_v11  ;;  %v5808_v11 = vld [vmem:[%s8219_s3 + $0x600] sm:$0xff]  }
 0x1f3   :  { %5045 = vmatpush3.bf16.msra.mxu1 %v5752_v31  ;;  %3663 = vmatprep.mubr.bf16.mxu1 %v1692_v24 }
 0x1f4   :  { %v7479_v40 = vpop.f32.mrf.mxu0  ;;  %v4837_v6 = vpop.f32.mrf.mxu1  ;;  %5046 = vmatprep.subr.bf16.mxu1 %v5754_v59  ;;  %5606 = vmatpush3.bf16.msra.mxu0 %v5805_v45  ;;  %v5763_v59 = vld [vmem:[%s8219_s3 + $0x2e0] sm:$0xff]  }
 0x1f5   :  { %5607 = vmatprep.subr.bf16.mxu0 %v8227_v3  ;;  %v5760_v6 = vld [vmem:[%s8219_s3 + $0x2a8] sm:$0xff]  }
 0x1f6   :  { %v7488_v7 = vpop.f32.mrf.mxu0  ;;  %v7490_v24 = vpop.f32.mrf.mxu1 }
 0x1f7   :  { %5047 = vmatpush3.bf16.msra.mxu1 %v5756_v32 }
 0x1f8   :  { %v7497_v31 = vpop.f32.mrf.mxu0  ;;  %v7499_v45 = vpop.f32.mrf.mxu1  ;;  %5048 = vmatprep.subr.bf16.mxu1 %v5759_v43  ;;  %5608 = vmatpush3.bf16.msra.mxu0 %v5808_v11  ;;  %v5764_v43 = vld [vmem:[%s8219_s3 + $0x2a0] sm:$0xff]  }
 0x1f9   :  { %5648 = vmatprep.subr.mxu0 %v8227_v3  ;;  %v5767_v3 = vld [vmem:[%s8219_s3 + $0x2d8] sm:$0xff]  }
 0x1fa   :  { %v5551_v32 = vpop.f32.mrf.mxu0  ;;  %v4842_v41 = vpop.f32.mrf.mxu1  ;;  %3664 = vmatmul.mubr.bf16.gmra.mxu1 %v1691_v61 }
 0x1fb   :  { %3670 = vmatprep.mubr.bf16.mxu1 %v1709_v49  ;;  %5049 = vmatpush3.bf16.msra.mxu1 %v5760_v6  ;;  %v5768_v49 = vld [vmem:[%s8219_s3 + $0x298] sm:$0xff]  }
 0x1fc   :  { %v7516_v11 = vpop.f32.mrf.mxu0  ;;  %v4843_v20 = vpop.f32.mrf.mxu1  ;;  %5050 = vmatprep.subr.bf16.mxu1 %v5763_v59  ;;  %v5769_v59 = vld [vmem:[%s8219_s3 + $0x2d0] sm:$0xff]  }
 0x1fd   :  { %v7521_v26 = vadd.f32 %v4843_v20, %v4842_v41  ;;  %v1525_v41 = vmax.f32 %v7415_v57, %v7435_v18  ;;  %v1527_v57 = vmax.f32 %v7448_v63, %v7461_v55  ;;  %v1732_v63 = vpack.c.bf16 %v7203_v28, %v7203_v28 }
 0x1fe   :  { %v5552_v10 = vpop.f32.mrf.mxu0  ;;  %v4845_v61 = vpop.f32.mrf.mxu1 }
 0x1ff   :  { %5051 = vmatpush3.bf16.msra.mxu1 %v5764_v43  ;;  %v1532_v20 = vmax.f32 %v5551_v32, %v5552_v10  ;;  %v5771_v61 = vld [vmem:[%s8219_s3 + $0x2c8] sm:$0xff]   ;;  %v1526_v10 = vmax.f32 %v7403_v56, %v7427_v12 }
 0x200   :  { %v7526_v6 = vpop.f32.mrf.mxu0  ;;  %v4846_v50 = vpop.f32.mrf.mxu1  ;;  %5052 = vmatprep.subr.bf16.mxu1 %v5767_v3  ;;  %v5770_v3 = vld [vmem:[%s8219_s3 + $0x290] sm:$0xff]  }
 0x201   :  { %v1588_v18 = vmax.f32 %v1525_v41, %v1532_v20  ;;  %v5775_v20 = vld [vmem:[%s8219_s3 + $0x378] sm:$0xff]  }
 0x202   :  { %v5555_v43 = vpop.f32.mrf.mxu0  ;;  %3671 = vmatmul.mubr.bf16.gmra.mxu1 %v7247_v13 }
 0x203   :  { %3677 = vmatprep.mubr.bf16.mxu1 %v7215_v19  ;;  %5053 = vmatpush3.bf16.msra.mxu1 %v5768_v49  ;;  %v5772_v49 = vld [vmem:[%s8219_s3 + $0x288] sm:$0xff]   ;;  %v7556_v55 = vadd.f32 %v7129_v52, %v1588_v18 }
 0x204   :  { %v1296_v50 = vpop.f32.mrf.mxu0  ;;  %5054 = vmatprep.subr.bf16.mxu1 %v5769_v59  ;;  %v5773_v59 = vld [vmem:[%s8219_s3 + $0x2c0] sm:$0xff]  }
 0x206   :  { %v5556_v32 = vpop.f32.mrf.mxu0 }
 0x207   :  { %v1534_v60 = vmax.f32 %v5555_v43, %v5556_v32  ;;  %5055 = vmatpush3.bf16.msra.mxu1 %v5770_v3 }
 0x208   :  { %v1299_v1 = vpop.f32.mrf.mxu0  ;;  %5056 = vmatprep.subr.bf16.mxu1 %v5771_v61 }
 0x209   :  { %v1590_v37 = vmax.f32 %v1527_v57, %v1534_v60  ;;  %v1533_v13 = vmax.f32 %v1296_v50, %v1299_v1  ;;  %v5774_v60 = vld [vmem:[%s8219_s3 + $0x280] sm:$0xff]   ;;  %v1528_v50 = vmax.f32 %v7443_v5, %v7454_v36 }
 0x20a   :  { %v5559_v56 = vpop.f32.mrf.mxu0  ;;  %3678 = vmatmul.mubr.bf16.gmra.mxu1 %v7180_v54 }
 0x20b   :  { %v7560_v12 = vadd.f32 %v7129_v52, %v1590_v37  ;;  %v1589_v41 = vmax.f32 %v1526_v10, %v1533_v13  ;;  %3683 = vmatprep.mubr.bf16.mxu1 %v1732_v63  ;;  %5057 = vmatpush3.bf16.msra.mxu1 %v5772_v49  ;;  %v1703_v13 = vpack.c.bf16 %v7556_v55, %v7312_v15 }
 0x20c   :  { %v1312_v1 = vpop.f32.mrf.mxu0  ;;  %5058 = vmatprep.subr.bf16.mxu1 %v5773_v59  ;;  %v1731_v10 = vpack.c.bf16 %v7206_v33, %v7206_v33  ;;  %v8248_v49 = vmax.f32 %v7479_v40, %v7497_v31 }
 0x20d   :  { %v7569_v43 = vadd.f32 %v7129_v52, %v1589_v41 }
 0x20e   :  { %v5560_v3 = vpop.f32.mrf.mxu0 }
 0x20f   :  { %v1536_v61 = vmax.f32 %v5559_v56, %v5560_v3  ;;  %v1704_v57 = vpack.c.bf16 %v7569_v43, %v7372_v62  ;;  %5059 = vmatpush3.bf16.msra.mxu1 %v5774_v60  ;;  %v7597_v31 = vpack.c.bf16 %v7560_v12, %v7569_v43 }
 0x210   :  { %v1315_v32 = vpop.f32.mrf.mxu0  ;;  %5090 = vmatprep.subr.bf16.mxu1 %v5775_v20 }
 0x211   :  { %v1592_v59 = vmax.f32 %v8248_v49, %v1536_v61  ;;  %v1535_v63 = vmax.f32 %v1312_v1, %v1315_v32  ;;  %4065 = vmatprep.mubr.bf16.mxu0 %v1704_v57  ;;  %8250 = vst [vmem:[#allocation9_spill] sm:$0xff] %v7597_v31  ;;  %v5777_v61 = vld [vmem:[%s8219_s3 + $0x370] sm:$0xff]   ;;  %v8253_v32 = vmax.f32 %v7516_v11, %v7526_v6 }
 0x212   :  { %v5563_v5 = vpop.f32.mrf.mxu0  ;;  %3684 = vmatmul.mubr.bf16.gmra.mxu1 %v1731_v10  ;;  %4066 = vmatmul.mubr.bf16.gmra.mxu0 %v1703_v13  ;;  %v5776_v13 = vld [vmem:[%s8219_s3 + $0x338] sm:$0xff]   ;;  %v8255_v11 = vpack.c.bf16 %v7138_v39, %v6925_v30  ;;  %v5778_v6 = vld [vmem:[%s8219_s3 + $0x330] sm:$0xff]   ;;  %v5780_v30 = vld [vmem:[%s8219_s3 + $0x328] sm:$0xff]  }
 0x213   :  { %v7587_v36 = vadd.f32 %v7129_v52, %v1592_v59  ;;  %v1591_v56 = vmax.f32 %v1528_v50, %v1535_v63  ;;  %3722 = vmatprep.mubr.bf16.mxu1 %v6895_v2 }
 0x214   :  { %v1328_v41 = vpop.f32.mrf.mxu0 }
 0x215   :  { %v7591_v60 = vadd.f32 %v7129_v52, %v1591_v56 }
 0x216   :  { %v5564_v40 = vpop.f32.mrf.mxu0 }
 0x217   :  { %8249 = vst [vmem:[#allocation8_spill] sm:$0xff] %v7591_v60  ;;  %v1538_v1 = vmax.f32 %v5563_v5, %v5564_v40  ;;  %v7604_v2 = vpack.c.bf16 %v7591_v60, %v7560_v12  ;;  %v7608_v3 = vpack.c.bf16 %v7587_v36, %v7591_v60  ;;  %v8254_v5 = vmax.f32 %v7470_v25, %v7488_v7 }
 0x218   :  { %v1331_v50 = vpop.f32.mrf.mxu0 }
 0x219   :  { %8251 = vst [vmem:[#allocation10_spill] sm:$0xff] %v7604_v2  ;;  %8252 = vst [vmem:[#allocation11_spill] sm:$0xff] %v7608_v3  ;;  %v1594_v10 = vmax.f32 %v8253_v32, %v1538_v1  ;;  %v1537_v49 = vmax.f32 %v1328_v41, %v1331_v50  ;;  %4072 = vmatprep.mubr.bf16.mxu0 %v7604_v2  ;;  %v5782_v32 = vld [vmem:[%s8219_s3 + $0x320] sm:$0xff]  }
 0x21a   :  { %v7619_v59 = vpop.f32.mrf.mxu0  ;;  %3723 = vmatmul.mubr.bf16.vlgmr.msra.gmra.mxu1 %v6899_v4  ;;  %4073 = vmatmul.mubr.bf16.gmra.mxu0 %v7597_v31  ;;  %v5779_v4 = vld [vmem:[%s8219_s3 + $0x368] sm:$0xff]  }
 0x21b   :  { %v7624_v63 = vadd.f32 %v7129_v52, %v1594_v10  ;;  %v1593_v56 = vmax.f32 %v8254_v5, %v1537_v49  ;;  %5091 = vmatpush3.bf16.msra.mxu1 %v5776_v13  ;;  %3730 = vmatprep.mubr.bf16.mxu1 %v8255_v11  ;;  %v5781_v13 = vld [vmem:[%s8219_s3 + $0x360] sm:$0xff]   ;;  %v5783_v49 = vld [vmem:[%s8219_s3 + $0x358] sm:$0xff]  }
 0x21c   :  { %v7635_v41 = vpop.f32.mrf.mxu0  ;;  %5092 = vmatprep.subr.bf16.mxu1 %v5777_v61  ;;  %v8257_v61 = vpack.c.bf16 %v7110_v44, %v6872_v46  ;;  %v5784_v46 = vld [vmem:[%s8219_s3 + $0x318] sm:$0xff]  }
 0x21d   :  { %v7641_v40 = vadd.f32 %v7129_v52, %v1593_v56  ;;  %v5785_v56 = vld [vmem:[%s8219_s3 + $0x350] sm:$0xff]  }
 0x21e   :  { %v7643_v25 = vpop.f32.mrf.mxu0 }
 0x21f   :  { %5093 = vmatpush3.bf16.msra.mxu1 %v5778_v6  ;;  %v7652_v7 = vpack.c.bf16 %v7641_v40, %v7587_v36 }
 0x220   :  { %v7654_v1 = vpop.f32.mrf.mxu0  ;;  %5094 = vmatprep.subr.bf16.mxu1 %v5779_v4  ;;  %v5786_v4 = vld [vmem:[%s8219_s3 + $0x310] sm:$0xff]  }
 0x221   :  { %8256 = vst [vmem:[#allocation12_spill] sm:$0xff] %v7652_v7 }
 0x222   :  { %v7659_v50 = vpop.f32.mrf.mxu0  ;;  %3731 = vmatmul.mubr.bf16.gmra.mxu1 %v8257_v61  ;;  %v5787_v61 = vld [vmem:[%s8219_s3 + $0x348] sm:$0xff]  }
 0x223   :  { %3737 = vmatprep.mubr.bf16.mxu1 %v7348_v48  ;;  %5095 = vmatpush3.bf16.msra.mxu1 %v5780_v30 }
 0x224   :  { %v7668_v10 = vpop.f32.mrf.mxu0  ;;  %5096 = vmatprep.subr.bf16.mxu1 %v5781_v13 }
 0x226   :  { %v7673_v5 = vpop.f32.mrf.mxu0 }
 0x227   :  { %5097 = vmatpush3.bf16.msra.mxu1 %v5782_v32 }
 0x228   :  { %v7678_v44 = vpop.f32.mrf.mxu0  ;;  %5098 = vmatprep.subr.bf16.mxu1 %v5783_v49 }
 0x22a   :  { %v7683_v11 = vpop.f32.mrf.mxu0  ;;  %v4848_v6 = vpop.f32.mrf.mxu1  ;;  %3738 = vmatmul.mubr.bf16.gmra.mxu1 %v7390_v58 }
 0x22b   :  { %3744 = vmatprep.mubr.bf16.mxu1 %v7336_v23  ;;  %5099 = vmatpush3.bf16.msra.mxu1 %v5784_v46  ;;  %v5788_v46 = vld [vmem:[%s8219_s3 + $0x308] sm:$0xff]  }
 0x22c   :  { %v7690_v30 = vpop.f32.mrf.mxu0  ;;  %v4849_v13 = vpop.f32.mrf.mxu1  ;;  %5100 = vmatprep.subr.bf16.mxu1 %v5785_v56  ;;  %v5790_v56 = vld [vmem:[%s8219_s3 + $0x340] sm:$0xff]  }
 0x22d   :  { %v1734_v13 = vpack.c.bf16 %v7372_v62, %v7372_v62  ;;  %v1541_v62 = vmax.f32 %v7668_v10, %v7678_v44 }
 0x22e   :  { %v7695_v32 = vpop.f32.mrf.mxu0  ;;  %v4851_v49 = vpop.f32.mrf.mxu1 }
 0x22f   :  { %5101 = vmatpush3.bf16.msra.mxu1 %v5786_v4  ;;  %v5791_v4 = vld [vmem:[%s8219_s3 + $0x300] sm:$0xff]  }
 0x230   :  { %v7700_v6 = vpop.f32.mrf.mxu0  ;;  %v4852_v37 = vpop.f32.mrf.mxu1  ;;  %5102 = vmatprep.subr.bf16.mxu1 %v5787_v61  ;;  %v5793_v61 = vld [vmem:[%s8219_s3 + $0x3f8] sm:$0xff]  }
 0x232   :  { %v5579_v57 = vpop.f32.mrf.mxu0  ;;  %v4854_v18 = vpop.f32.mrf.mxu1  ;;  %3745 = vmatmul.mubr.bf16.gmra.mxu1 %v7329_v34 }
 0x233   :  { %3750 = vmatprep.mubr.bf16.mxu1 %v1734_v13  ;;  %5103 = vmatpush3.bf16.msra.mxu1 %v5788_v46  ;;  %v1733_v46 = vpack.c.bf16 %v7312_v15, %v7312_v15  ;;  %v7723_v13 = vld [vmem:[%s8221_s4] ss:$0 sm:$0xff] }
 0x234   :  { %v7711_v49 = vpop.f32.mrf.mxu0  ;;  %v4855_v37 = vpop.f32.mrf.mxu1  ;;  %5104 = vmatprep.subr.bf16.mxu1 %v5790_v56  ;;  %v1539_v56 = vmax.f32 %v7635_v41, %v7654_v1 }
 0x236   :  { %v5580_v39 = vpop.f32.mrf.mxu0  ;;  %v4857_v20 = vpop.f32.mrf.mxu1 }
 0x237   :  { %5105 = vmatpush3.bf16.msra.mxu1 %v5791_v4  ;;  %v1546_v37 = vmax.f32 %v5579_v57, %v5580_v39  ;;  %v1540_v39 = vmax.f32 %v7619_v59, %v7643_v25 }
 0x238   :  { %v7716_v18 = vpop.f32.mrf.mxu0  ;;  %v4858_v34 = vpop.f32.mrf.mxu1  ;;  %5136 = vmatprep.subr.bf16.mxu1 %v5793_v61  ;;  %v4835_v61 = vadd.f32 %v7459_v0, %v7446_v16  ;;  %v5796_v16 = vld [vmem:[%s8219_s3 + $0x3f0] sm:$0xff]  }
 0x239   :  { %v3390_v34 = vadd.f32 %v7266_v14, %v7723_v13  ;;  %v1595_v31 = vmax.f32 %v1539_v56, %v1546_v37  ;;  %v5794_v14 = vld [vmem:[%s8219_s3 + $0x3b8] sm:$0xff]  }
 0x23a   :  { %v5583_v3 = vpop.f32.mrf.mxu0  ;;  %v4876_v7 = vpop.f32.mrf.mxu1  ;;  %3751 = vmatmul.mubr.bf16.gmra.mxu1 %v1733_v46  ;;  %v3393_v0 = vadd.f32 %v4835_v61, %v7723_v13 }
 0x23b   :  { %3789 = vmatprep.mubr.bf16.mxu1 %v7079_v21  ;;  %v1651_v59 = vadd.f32 %v7129_v52, %v1595_v31 }
 0x23c   :  { %v1408_v20 = vpop.f32.mrf.mxu0  ;;  %v4877_v4 = vpop.f32.mrf.mxu1 }
 0x23d   :  { %v4878_v60 = vadd.f32 %v4877_v4, %v4876_v7  ;;  %v8258_v4 = vpack.c.bf16 %v7169_v38, %v6965_v8 }
 0x23e   :  { %v5584_v41 = vpop.f32.mrf.mxu0  ;;  %v4879_v57 = vpop.f32.mrf.mxu1 }
 0x23f   :  { %v7736_v1 = vadd.f32 %v4878_v60, %v3390_v34  ;;  %v1548_v21 = vmax.f32 %v5583_v3, %v5584_v41  ;;  %v1543_v34 = vmax.f32 %v7690_v30, %v7700_v6  ;;  %v5803_v30 = vld [vmem:[%s8219_s3 + $0x3e0] sm:$0xff]  }
 0x240   :  { %v1411_v46 = vpop.f32.mrf.mxu0  ;;  %v4880_v2 = vpop.f32.mrf.mxu1 }
 0x241   :  { %v1597_v7 = vmax.f32 %v1541_v62, %v1548_v21  ;;  %v1547_v10 = vmax.f32 %v1408_v20, %v1411_v46  ;;  %v4881_v44 = vadd.f32 %v4880_v2, %v4879_v57  ;;  %v5797_v62 = vld [vmem:[%s8219_s3 + $0x3b0] sm:$0xff]   ;;  %v4841_v20 = vadd.f32 %v7499_v45, %v7490_v24  ;;  %v5801_v46 = vld [vmem:[%s8219_s3 + $0x3a8] sm:$0xff]  }
 0x242   :  { %v5587_v60 = vpop.f32.mrf.mxu0  ;;  %v4882_v25 = vpop.f32.mrf.mxu1  ;;  %3790 = vmatmul.mubr.bf16.vlgmr.msra.gmra.mxu1 %v7101_v17  ;;  %v5799_v17 = vld [vmem:[%s8219_s3 + $0x3e8] sm:$0xff]   ;;  %v1542_v57 = vmax.f32 %v7659_v50, %v7673_v5 }
 0x243   :  { %v7748_v3 = vadd.f32 %v7129_v52, %v1597_v7  ;;  %v1596_v56 = vmax.f32 %v1540_v39, %v1547_v10  ;;  %v7750_v37 = vadd.f32 %v4881_v44, %v3393_v0  ;;  %5137 = vmatpush3.bf16.msra.mxu1 %v5794_v14  ;;  %3797 = vmatprep.mubr.bf16.mxu1 %v8258_v4 }
 0x244   :  { %v1424_v31 = vpop.f32.mrf.mxu0  ;;  %v4883_v2 = vpop.f32.mrf.mxu1  ;;  %5138 = vmatprep.subr.bf16.mxu1 %v5796_v16  ;;  %v3400_v6 = vadd.f32 %v4841_v20, %v7723_v13  ;;  %v8259_v7 = vpack.c.bf16 %v7132_v53, %v6909_v22  ;;  %v5806_v22 = vld [vmem:[%s8219_s3 + $0x3d8] sm:$0xff]  }
 0x245   :  { %v1652_v8 = vadd.f32 %v7129_v52, %v1596_v56  ;;  %v3405_v56 = vadd.f32 %v7521_v26, %v7723_v13  ;;  %v1743_v2 = vpack.c.bf16 %v7748_v3, %v7748_v3  ;;  %v5809_v13 = vld [vmem:[%s8219_s3 + $0x3d0] sm:$0xff]  }
 0x246   :  { %v5588_v61 = vpop.f32.mrf.mxu0  ;;  %v4885_v41 = vpop.f32.mrf.mxu1 }
 0x247   :  { %v1718_v39 = vpack.c.bf16 %v1652_v8, %v1651_v59  ;;  %v1550_v21 = vmax.f32 %v5587_v60, %v5588_v61  ;;  %5139 = vmatpush3.bf16.msra.mxu1 %v5797_v62  ;;  %v1719_v14 = vpack.c.bf16 %v7748_v3, %v1652_v8  ;;  %v5804_v60 = vld [vmem:[%s8219_s3 + $0x3a0] sm:$0xff]  }
 0x248   :  { %v1427_v24 = vpop.f32.mrf.mxu0  ;;  %v4886_v45 = vpop.f32.mrf.mxu1  ;;  %5140 = vmatprep.subr.bf16.mxu1 %v5799_v17 }
 0x249   :  { %v1599_v16 = vmax.f32 %v1543_v34, %v1550_v21  ;;  %v1549_v50 = vmax.f32 %v1424_v31, %v1427_v24  ;;  %v4887_v5 = vadd.f32 %v4886_v45, %v4885_v41  ;;  %4079 = vmatprep.mubr.bf16.mxu0 %v1719_v14  ;;  %v5807_v34 = vld [vmem:[%s8219_s3 + $0x398] sm:$0xff]   ;;  %v5810_v41 = vld [vmem:[%s8219_s3 + $0x390] sm:$0xff]   ;;  %v8260_v21 = vmov 0.0   ;;  %v5811_v14 = vld [vmem:[%s8219_s3 + $0x3c8] sm:$0xff]  }
 0x24a   :  { %v4888_v0 = vpop.f32.mrf.mxu1  ;;  %3798 = vmatmul.mubr.bf16.gmra.mxu1 %v8259_v7  ;;  %4080 = vmatmul.mubr.bf16.gmra.mxu0 %v1718_v39  ;;  %v5812_v24 = vld [vmem:[%s8219_s3 + $0x388] sm:$0xff]  }
 0x24b   :  { %v7780_v10 = vadd.f32 %v7129_v52, %v1599_v16  ;;  %v1598_v44 = vmax.f32 %v1542_v57, %v1549_v50  ;;  %v7782_v59 = vadd.f32 %v4887_v5, %v3400_v6  ;;  %3804 = vmatprep.mubr.bf16.mxu1 %v7215_v19  ;;  %5141 = vmatpush3.bf16.msra.mxu1 %v5801_v46  ;;  %v7817_v57 = vpop.f32.mrf.mxu0  ;;  %v5813_v6 = vld [vmem:[%s8219_s3 + $0x3c0] sm:$0xff]  }
 0x24c   :  { %v4889_v25 = vpop.f32.mrf.mxu1  ;;  %5142 = vmatprep.subr.bf16.mxu1 %v5803_v30  ;;  %v1736_v16 = vpack.c.bf16 %v7424_v27, %v7424_v27  ;;  %v5814_v5 = vld [vmem:[%s8219_s3 + $0x380] sm:$0xff]  }
 0x24d   :  { %v7794_v4 = vadd.f32 %v7129_v52, %v1598_v44  ;;  %v4890_v62 = vadd.f32 %v4889_v25, %v4888_v0  ;;  %v1440_v45 = vpop.f32.mrf.mxu0  ;;  %v5815_v44 = vld [vmem:[%s8219_s3 + $0x478] sm:$0xff]  }
 0x24e   :  { %v4891_v31 = vpop.f32.mrf.mxu1 }
 0x24f   :  { %v7798_v17 = vadd.f32 %v4890_v62, %v3405_v56  ;;  %5143 = vmatpush3.bf16.msra.mxu1 %v5804_v60  ;;  %v1744_v20 = vpack.c.bf16 %v7794_v4, %v7794_v4  ;;  %v1721_v26 = vpack.c.bf16 %v7780_v10, %v7794_v4  ;;  %v1720_v8 = vpack.c.bf16 %v7794_v4, %v7748_v3  ;;  %v5592_v0 = vpop.f32.mrf.mxu0 }
 0x250   :  { %v4892_v52 = vpop.f32.mrf.mxu1  ;;  %5144 = vmatprep.subr.bf16.mxu1 %v5806_v22  ;;  %v1735_v56 = vpack.c.bf16 %v7354_v42, %v7354_v42  ;;  %v1544_v62 = vmax.f32 %v7683_v11, %v7695_v32  ;;  %v5816_v11 = vld [vmem:[%s8219_s3 + $0x438] sm:$0xff]  }
 0x251   :  { %4085 = vmatprep.mubr.bf16.mxu0 %v1744_v20  ;;  %v1443_v25 = vpop.f32.mrf.mxu0 }
 0x252   :  { %v4894_v61 = vpop.f32.mrf.mxu1  ;;  %3805 = vmatmul.mubr.bf16.gmra.mxu1 %v7180_v54  ;;  %4086 = vmatmul.mubr.bf16.gmra.mxu0 %v1743_v2  ;;  %v8261_v2 = vpack.c.bf16 %v7587_v36, %v7407_v29  ;;  %v1551_v20 = vmax.f32 %v1440_v45, %v1443_v25  ;;  %v1552_v45 = vmax.f32 %v7817_v57, %v5592_v0  ;;  %v5819_v57 = vld [vmem:[%s8219_s3 + $0x468] sm:$0xff]  }
 0x253   :  { %3811 = vmatprep.mubr.bf16.mxu1 %v7382_v9  ;;  %5145 = vmatpush3.bf16.msra.mxu1 %v5807_v34 }
 0x254   :  { %v4895_v39 = vpop.f32.mrf.mxu1  ;;  %5609 = vmatprep.mubr.msk.bf16.mxu0 %vm5866_vm1, %v8260_v21  ;;  %5146 = vmatprep.subr.bf16.mxu1 %v5809_v13  ;;  %v1600_v61 = vmax.f32 %v1544_v62, %v1551_v20  ;;  %v8267_v62 = vld [vmem:[#allocation2_spill] sm:$0xff] }
 0x255   :  { %v5817_v39 = vld [vmem:[%s8219_s3 + $0x470] sm:$0xff]  }
 0x256   :  { %v4897_v46 = vpop.f32.mrf.mxu1 }
 0x257   :  { %5147 = vmatpush3.bf16.msra.mxu1 %v5810_v41 }
 0x258   :  { %v4898_v30 = vpop.f32.mrf.mxu1  ;;  %5148 = vmatprep.subr.bf16.mxu1 %v5811_v14  ;;  %v1545_v14 = vmax.f32 %v7711_v49, %v7716_v18  ;;  %v8264_v49 = vld [vmem:[#allocation5_spill] sm:$0xff] }
 0x259   :  { %v5864_v30 = vld [vmem:[%s8220_s2] ss:$0 sm:$0xff]  ;;  %v8265_v18 = vpack.c.bf16 %v8264_v49, %v7132_v53  ;;  %v5820_v53 = vld [vmem:[%s8219_s3 + $0x428] sm:$0xff]  }
 0x25a   :  { %v4900_v50 = vpop.f32.mrf.mxu1  ;;  %3812 = vmatmul.mubr.bf16.gmra.mxu1 %v7386_v35  ;;  %5610 = vmatmul.mubr.bf16.vlgmr.msra.gmra.mxu0 %v7431_v47  ;;  %v1601_v0 = vmax.f32 %v1545_v14, %v1552_v45  ;;  %v5827_v45 = vld [vmem:[%s8219_s3 + $0x448] sm:$0xff]   ;;  %v5829_v49 = vld [vmem:[%s8219_s3 + $0x440] sm:$0xff]  }
 0x25b   :  { %3817 = vmatprep.mubr.bf16.mxu1 %v1736_v16  ;;  %5149 = vmatpush3.bf16.msra.mxu1 %v5812_v24  ;;  %v8262_v24 = vld [vmem:[#allocation4_spill] sm:$0xff] }
 0x25c   :  { %v4901_v7 = vpop.f32.mrf.mxu1  ;;  %5613 = vmatprep.mubr.msk.bf16.mxu0 %vm5866_vm1, %v8260_v21  ;;  %5150 = vmatprep.subr.bf16.mxu1 %v5813_v6  ;;  %v7871_v6 = vadd.f32 %v5864_v30, %v1600_v61  ;;  %v5818_v50 = vld [vmem:[%s8219_s3 + $0x430] sm:$0xff]  }
 0x25e   :  { %v4903_v60 = vpop.f32.mrf.mxu1  ;;  %v1722_v7 = vpack.c.bf16 %v7871_v6, %v7780_v10 }
 0x25f   :  { %5151 = vmatpush3.bf16.msra.mxu1 %v5814_v5  ;;  %v5821_v60 = vld [vmem:[%s8219_s3 + $0x460] sm:$0xff]  }
 0x260   :  { %v4904_v22 = vpop.f32.mrf.mxu1  ;;  %5182 = vmatprep.subr.bf16.mxu1 %v5815_v44 }
 0x262   :  { %v4922_v31 = vpop.f32.mrf.mxu1  ;;  %3818 = vmatmul.mubr.bf16.gmra.mxu1 %v1735_v56  ;;  %5614 = vmatmul.mubr.bf16.gmra.mxu0 %v8261_v2  ;;  %v8266_v56 = vld [vmem:[#allocation3_spill] sm:$0xff]  ;;  %v1657_v2 = vadd.f32 %v5864_v30, %v1601_v0 }
 0x263   :  { %3856 = vmatprep.mubr.bf16.mxu1 %v7224_v51  ;;  %5617 = vmatprep.mubr.msk.bf16.mxu0 %vm5866_vm1, %v8260_v21 }
 0x264   :  { %v4923_v34 = vpop.f32.mrf.mxu1 }
 0x265   :  { %v4924_v52 = vadd.f32 %v4923_v34, %v4922_v31  ;;  %v8268_v31 = vpack.c.bf16 %v8266_v56, %v8267_v62  ;;  %v5822_v34 = vld [vmem:[%s8219_s3 + $0x420] sm:$0xff]  }
 0x266   :  { %v4925_v13 = vpop.f32.mrf.mxu1 }
 0x267   :  { %v7853_v41 = vadd.f32 %v4924_v52, %v7736_v1  ;;  %v8263_v1 = vpack.c.bf16 %v7624_v63, %v7641_v40 }
 0x268   :  { %v4926_v32 = vpop.f32.mrf.mxu1 }
 0x269   :  { %v4927_v51 = vadd.f32 %v4926_v32, %v4925_v13  ;;  %v5823_v13 = vld [vmem:[%s8219_s3 + $0x458] sm:$0xff]  }
 0x26a   :  { %v4928_v46 = vpop.f32.mrf.mxu1  ;;  %3857 = vmatmul.mubr.bf16.vlgmr.msra.gmra.mxu1 %v8262_v24  ;;  %5618 = vmatmul.mubr.bf16.gmra.mxu0 %v8263_v1  ;;  %v5826_v24 = vld [vmem:[%s8219_s3 + $0x410] sm:$0xff]  }
 0x26b   :  { %v7874_v16 = vadd.f32 %v4927_v51, %v7750_v37  ;;  %5183 = vmatpush3.bf16.msra.mxu1 %v5816_v11  ;;  %3864 = vmatprep.mubr.bf16.mxu1 %v8265_v18  ;;  %v5825_v51 = vld [vmem:[%s8219_s3 + $0x450] sm:$0xff]   ;;  %v8269_v46 = vpack.c.bf16 %v7203_v28, %v7206_v33  ;;  %v1738_v18 = vpack.c.bf16 %v7560_v12, %v7560_v12 }
 0x26c   :  { %v4929_v5 = vpop.f32.mrf.mxu1  ;;  %5184 = vmatprep.subr.bf16.mxu1 %v5817_v39  ;;  %5621 = vmatprep.mubr.msk.bf16.mxu0 %vm5866_vm1, %v8260_v21 }
 0x26d   :  { %v5830_v5 = vld [vmem:[%s8219_s3 + $0x400] sm:$0xff]  }
 0x26e   :  { %v4931_v37 = vpop.f32.mrf.mxu1 }
 0x26f   :  { %5185 = vmatpush3.bf16.msra.mxu1 %v5818_v50 }
 0x270   :  { %v4932_v44 = vpop.f32.mrf.mxu1  ;;  %5186 = vmatprep.subr.bf16.mxu1 %v5819_v57 }
 0x271   :  { %v4933_v25 = vadd.f32 %v4932_v44, %v4931_v37  ;;  %v5831_v37 = vld [vmem:[%s8219_s3 + $0x4f8] sm:$0xff]  }
 0x272   :  { %v4934_v22 = vpop.f32.mrf.mxu1  ;;  %3865 = vmatmul.mubr.bf16.gmra.mxu1 %v8268_v31  ;;  %5622 = vmatmul.mubr.bf16.gmra.mxu0 %v1722_v7  ;;  %v5832_v31 = vld [vmem:[%s8219_s3 + $0x4b8] sm:$0xff]  }
 0x273   :  { %v7899_v20 = vadd.f32 %v4933_v25, %v7782_v59  ;;  %3871 = vmatprep.mubr.bf16.mxu1 %v7336_v23  ;;  %5187 = vmatpush3.bf16.msra.mxu1 %v5820_v53  ;;  %v1747_v59 = vpack.c.bf16 %v1657_v2, %v1657_v2  ;;  %v5824_v23 = vld [vmem:[%s8219_s3 + $0x418] sm:$0xff]   ;;  %v1737_v53 = vpack.c.bf16 %v7407_v29, %v7407_v29 }
 0x274   :  { %v4935_v52 = vpop.f32.mrf.mxu1  ;;  %5188 = vmatprep.subr.bf16.mxu1 %v5821_v60  ;;  %5625 = vmatprep.mubr.msk.bf16.mxu0 %vm5866_vm1, %v8260_v21 }
 0x275   :  { %v4936_v61 = vadd.f32 %v4935_v52, %v4934_v22 }
 0x276   :  { %v4937_v11 = vpop.f32.mrf.mxu1 }
 0x277   :  { %v7911_v32 = vadd.f32 %v4936_v61, %v7798_v17  ;;  %5189 = vmatpush3.bf16.msra.mxu1 %v5822_v34  ;;  %v8270_v17 = vpack.c.bf16 %v7569_v43, %v7556_v55  ;;  %v5828_v55 = vld [vmem:[%s8219_s3 + $0x408] sm:$0xff]   ;;  %v5833_v34 = vld [vmem:[%s8219_s3 + $0x4f0] sm:$0xff]  }
 0x278   :  { %v4938_v39 = vpop.f32.mrf.mxu1  ;;  %5190 = vmatprep.subr.bf16.mxu1 %v5823_v13  ;;  %v5834_v61 = vld [vmem:[%s8219_s3 + $0x4b0] sm:$0xff]  }
 0x27a   :  { %v4940_v14 = vpop.f32.mrf.mxu1  ;;  %3872 = vmatmul.mubr.bf16.gmra.mxu1 %v8269_v46  ;;  %5626 = vmatmul.mubr.bf16.gmra.mxu0 %v1747_v59  ;;  %v5835_v59 = vld [vmem:[%s8219_s3 + $0x4e8] sm:$0xff]  }
 0x27b   :  { %3878 = vmatprep.mubr.bf16.mxu1 %v8270_v17  ;;  %5191 = vmatpush3.bf16.msra.mxu1 %v5824_v23 }
 0x27c   :  { %v4941_v1 = vpop.f32.mrf.mxu1  ;;  %5192 = vmatprep.subr.bf16.mxu1 %v5825_v51  ;;  %5656 = vmatprep.mubr.msk.f32.mxu0 %vm5866_vm1, %v8260_v21  ;;  %v8272_v51 = vld [vmem:[#allocation6_spill] sm:$0xff] }
 0x27d   :  { %v8273_v14 = vpack.c.bf16 %v8272_v51, %v7169_v38  ;;  %v5848_v51 = vld [vmem:[%s8219_s3 + $0x5b8] sm:$0xff]  }
 0x27e   :  { %v4943_v30 = vpop.f32.mrf.mxu1 }
 0x27f   :  { %5193 = vmatpush3.bf16.msra.mxu1 %v5826_v24  ;;  %v5838_v24 = vld [vmem:[%s8219_s3 + $0x4a0] sm:$0xff]  }
 0x280   :  { %v4944_v43 = vpop.f32.mrf.mxu1  ;;  %5194 = vmatprep.subr.bf16.mxu1 %v5827_v45  ;;  %v5839_v45 = vld [vmem:[%s8219_s3 + $0x4d8] sm:$0xff]  }
 0x282   :  { %v4946_v50 = vpop.f32.mrf.mxu1  ;;  %3879 = vmatmul.mubr.bf16.gmra.mxu1 %v7431_v47 }
 0x283   :  { %3884 = vmatprep.mubr.bf16.mxu1 %v1738_v18  ;;  %5195 = vmatpush3.bf16.msra.mxu1 %v5828_v55  ;;  %v5840_v18 = vld [vmem:[%s8219_s3 + $0x498] sm:$0xff]  }
 0x284   :  { %v4947_v57 = vpop.f32.mrf.mxu1  ;;  %5196 = vmatprep.subr.bf16.mxu1 %v5829_v49 }
 0x286   :  { %v4949_v0 = vpop.f32.mrf.mxu1 }
 0x287   :  { %5197 = vmatpush3.bf16.msra.mxu1 %v5830_v5  ;;  %v5841_v5 = vld [vmem:[%s8219_s3 + $0x4d0] sm:$0xff]  }
 0x288   :  { %v4950_v7 = vpop.f32.mrf.mxu1  ;;  %5228 = vmatprep.subr.bf16.mxu1 %v5831_v37 }
 0x289   :  { %v8274_v7 = vld [vmem:[#allocation10_spill] sm:$0xff] }
 0x28a   :  { %v4968_v44 = vpop.f32.mrf.mxu1  ;;  %3885 = vmatmul.mubr.bf16.gmra.mxu1 %v1737_v53 }
 0x28b   :  { %3923 = vmatprep.mubr.bf16.mxu1 %v7348_v48 }
 0x28c   :  { %v4969_v60 = vpop.f32.mrf.mxu1 }
 0x28d   :  { %v4970_v25 = vadd.f32 %v4969_v60, %v4968_v44  ;;  %v5843_v44 = vld [vmem:[%s8219_s3 + $0x4c8] sm:$0xff]  }
 0x28e   :  { %v4971_v22 = vpop.f32.mrf.mxu1 }
 0x28f   :  { %v7952_v62 = vadd.f32 %v4970_v25, %v7853_v41  ;;  %v8271_v41 = vpack.c.bf16 %v7312_v15, %v8266_v56  ;;  %v5837_v15 = vld [vmem:[%s8219_s3 + $0x4e0] sm:$0xff]   ;;  %v5844_v25 = vld [vmem:[%s8219_s3 + $0x488] sm:$0xff]  }
 0x290   :  { %v4972_v2 = vpop.f32.mrf.mxu1 }
 0x291   :  { %v4973_v52 = vadd.f32 %v4972_v2, %v4971_v22  ;;  %v1740_v2 = vpack.c.bf16 %v7587_v36, %v7587_v36 }
 0x292   :  { %v4974_v13 = vpop.f32.mrf.mxu1  ;;  %3924 = vmatmul.mubr.bf16.vlgmr.msra.gmra.mxu1 %v7390_v58  ;;  %v5836_v58 = vld [vmem:[%s8219_s3 + $0x4a8] sm:$0xff]  }
 0x293   :  { %v7962_v48 = vadd.f32 %v4973_v52, %v7874_v16  ;;  %5229 = vmatpush3.bf16.msra.mxu1 %v5832_v31  ;;  %3931 = vmatprep.mubr.bf16.mxu1 %v8271_v41  ;;  %v5845_v31 = vld [vmem:[%s8219_s3 + $0x4c0] sm:$0xff]   ;;  %v8275_v52 = vld [vmem:[#allocation9_spill] sm:$0xff] }
 0x294   :  { %v4975_v11 = vpop.f32.mrf.mxu1  ;;  %5230 = vmatprep.subr.bf16.mxu1 %v5833_v34  ;;  %v5846_v13 = vld [vmem:[%s8219_s3 + $0x480] sm:$0xff]  }
 0x296   :  { %v4977_v23 = vpop.f32.mrf.mxu1 }
 0x297   :  { %5231 = vmatpush3.bf16.msra.mxu1 %v5834_v61  ;;  %v5847_v61 = vld [vmem:[%s8219_s3 + $0x5f8] sm:$0xff]  }
 0x298   :  { %v4978_v16 = vpop.f32.mrf.mxu1  ;;  %5232 = vmatprep.subr.bf16.mxu1 %v5835_v59 }
 0x299   :  { %v4979_v56 = vadd.f32 %v4978_v16, %v4977_v23  ;;  %v8276_v23 = vld [vmem:[#allocation8_spill] sm:$0xff] }
 0x29a   :  { %v4980_v39 = vpop.f32.mrf.mxu1  ;;  %3932 = vmatmul.mubr.bf16.gmra.mxu1 %v8273_v14  ;;  %v5290_v46 = vpop.f32.mrf.mxu0  ;;  %v1739_v36 = vpack.c.bf16 %v8276_v23, %v8276_v23 }
 0x29b   :  { %v7983_v17 = vadd.f32 %v4979_v56, %v7899_v20  ;;  %3938 = vmatprep.mubr.bf16.mxu1 %v7382_v9  ;;  %5233 = vmatpush3.bf16.msra.mxu1 %v5836_v58 }
 0x29c   :  { %v4981_v1 = vpop.f32.mrf.mxu1  ;;  %5234 = vmatprep.subr.bf16.mxu1 %v5837_v15  ;;  %v5291_v30 = vpop.f32.mrf.mxu0 }
 0x29d   :  { %v4982_v38 = vadd.f32 %v4981_v1, %v4980_v39  ;;  %v7992_v55 = vadd.f32 %v5291_v30, %v5290_v46  ;;  %v5849_v46 = vld [vmem:[%s8219_s3 + $0x5f0] sm:$0xff]  }
 0x29e   :  { %v4983_v43 = vpop.f32.mrf.mxu1  ;;  %v5293_v20 = vpop.f32.mrf.mxu0 }
 0x29f   :  { %v7995_v49 = vadd.f32 %v4982_v38, %v7911_v32  ;;  %5235 = vmatpush3.bf16.msra.mxu1 %v5838_v24  ;;  %v5842_v32 = vld [vmem:[%s8219_s3 + $0x490] sm:$0xff]   ;;  %v5851_v38 = vld [vmem:[%s8219_s3 + $0x5e8] sm:$0xff]  }
 0x2a0   :  { %v4984_v50 = vpop.f32.mrf.mxu1  ;;  %5236 = vmatprep.subr.bf16.mxu1 %v5839_v45  ;;  %v5294_v57 = vpop.f32.mrf.mxu0  ;;  %v5850_v45 = vld [vmem:[%s8219_s3 + $0x5b0] sm:$0xff]  }
 0x2a1   :  { %v8003_v37 = vadd.f32 %v5294_v57, %v5293_v20  ;;  %v8278_v50 = vld [vmem:[#allocation7_spill] sm:$0xff] }
 0x2a2   :  { %v4986_v0 = vpop.f32.mrf.mxu1  ;;  %3939 = vmatmul.mubr.bf16.gmra.mxu1 %v7386_v35 }
 0x2a3   :  { %3945 = vmatprep.mubr.bf16.mxu1 %v8274_v7  ;;  %5237 = vmatpush3.bf16.msra.mxu1 %v5840_v18  ;;  %v8280_v0 = vpack.c.bf16 %v7407_v29, %v7424_v27  ;;  %v5854_v7 = vld [vmem:[%s8219_s3 + $0x5a0] sm:$0xff]   ;;  %v5856_v29 = vld [vmem:[%s8219_s3 + $0x598] sm:$0xff]  }
 0x2a4   :  { %v4987_v53 = vpop.f32.mrf.mxu1  ;;  %5238 = vmatprep.subr.bf16.mxu1 %v5841_v5  ;;  %v8279_v5 = vpack.c.bf16 %v8278_v50, %v7206_v33 }
 0x2a5   :  { %v5855_v53 = vld [vmem:[%s8219_s3 + $0x5d8] sm:$0xff]  }
 0x2a6   :  { %v4989_v60 = vpop.f32.mrf.mxu1 }
 0x2a7   :  { %5239 = vmatpush3.bf16.msra.mxu1 %v5842_v32 }
 0x2a8   :  { %v4990_v22 = vpop.f32.mrf.mxu1  ;;  %5240 = vmatprep.subr.bf16.mxu1 %v5843_v44 }
 0x2aa   :  { %v4992_v34 = vpop.f32.mrf.mxu1  ;;  %3946 = vmatmul.mubr.bf16.gmra.mxu1 %v8275_v52 }
 0x2ab   :  { %3951 = vmatprep.mubr.bf16.mxu1 %v1740_v2  ;;  %5241 = vmatpush3.bf16.msra.mxu1 %v5844_v25  ;;  %v5857_v25 = vld [vmem:[%s8219_s3 + $0x5d0] sm:$0xff]   ;;  %v5859_v34 = vld [vmem:[%s8219_s3 + $0x5c8] sm:$0xff]  }
 0x2ac   :  { %v4993_v41 = vpop.f32.mrf.mxu1  ;;  %5242 = vmatprep.subr.bf16.mxu1 %v5845_v31  ;;  %v8281_v31 = vld [vmem:[#allocation12_spill] sm:$0xff] }
 0x2ad   :  { %v5861_v41 = vld [vmem:[%s8219_s3 + $0x5c0] sm:$0xff]  }
 0x2ae   :  { %v4995_v11 = vpop.f32.mrf.mxu1 }
 0x2af   :  { %5243 = vmatpush3.bf16.msra.mxu1 %v5846_v13  ;;  %v5860_v13 = vld [vmem:[%s8219_s3 + $0x588] sm:$0xff]  }
 0x2b0   :  { %v4996_v59 = vpop.f32.mrf.mxu1  ;;  %5320 = vmatprep.subr.bf16.mxu1 %v5847_v61  ;;  %v1742_v61 = vpack.c.bf16 %v7624_v63, %v7624_v63  ;;  %v1741_v63 = vpack.c.bf16 %v7641_v40, %v7641_v40 }
 0x2b1   :  { %v8282_v59 = vld [vmem:[#allocation11_spill] sm:$0xff] }
 0x2b2   :  { %v5014_v58 = vpop.f32.mrf.mxu1  ;;  %3952 = vmatmul.mubr.bf16.gmra.mxu1 %v1739_v36 }
 0x2b3   :  { %3990 = vmatprep.mubr.bf16.mxu1 %v7215_v19 }
 0x2b4   :  { %v5015_v16 = vpop.f32.mrf.mxu1 }
 0x2b5   :  { %v5016_v15 = vadd.f32 %v5015_v16, %v5014_v58  ;;  %v5862_v58 = vld [vmem:[%s8219_s3 + $0x580] sm:$0xff]  }
 0x2b6   :  { %v5017_v56 = vpop.f32.mrf.mxu1 }
 0x2b7   :  { %v8032_v39 = vadd.f32 %v5016_v15, %v7952_v62  ;;  %v8277_v62 = vpack.c.bf16 %v7354_v42, %v7203_v28  ;;  %v5853_v28 = vld [vmem:[%s8219_s3 + $0x5e0] sm:$0xff]  }
 0x2b8   :  { %v5018_v14 = vpop.f32.mrf.mxu1 }
 0x2b9   :  { %v5019_v24 = vadd.f32 %v5018_v14, %v5017_v56 }
 0x2ba   :  { %v5020_v1 = vpop.f32.mrf.mxu1  ;;  %3991 = vmatmul.mubr.bf16.vlgmr.msra.gmra.mxu1 %v7180_v54  ;;  %v5852_v54 = vld [vmem:[%s8219_s3 + $0x5a8] sm:$0xff]  }
 0x2bb   :  { %v8042_v19 = vadd.f32 %v5019_v24, %v7962_v48  ;;  %5321 = vmatpush3.bf16.msra.mxu1 %v5848_v51  ;;  %3998 = vmatprep.mubr.bf16.mxu1 %v8277_v62 }
 0x2bc   :  { %v5021_v30 = vpop.f32.mrf.mxu1  ;;  %5322 = vmatprep.subr.bf16.mxu1 %v5849_v46 }
 0x2be   :  { %v5023_v43 = vpop.f32.mrf.mxu1 }
 0x2bf   :  { %5323 = vmatpush3.bf16.msra.mxu1 %v5850_v45 }
 0x2c0   :  { %v5024_v48 = vpop.f32.mrf.mxu1  ;;  %5324 = vmatprep.subr.bf16.mxu1 %v5851_v38 }
 0x2c1   :  { %v5025_v20 = vadd.f32 %v5024_v48, %v5023_v43 }
 0x2c2   :  { %v5026_v18 = vpop.f32.mrf.mxu1  ;;  %3999 = vmatmul.mubr.bf16.gmra.mxu1 %v8279_v5 }
 0x2c3   :  { %v8063_v57 = vadd.f32 %v5025_v20, %v7983_v17  ;;  %4005 = vmatprep.mubr.bf16.mxu1 %v8280_v0  ;;  %5325 = vmatpush3.bf16.msra.mxu1 %v5852_v54 }
 0x2c4   :  { %v5027_v32 = vpop.f32.mrf.mxu1  ;;  %5326 = vmatprep.subr.bf16.mxu1 %v5853_v28 }
 0x2c5   :  { %v5028_v33 = vadd.f32 %v5027_v32, %v5026_v18 }
 0x2c6   :  { %v5029_v44 = vpop.f32.mrf.mxu1 }
 0x2c7   :  { %v8075_v17 = vadd.f32 %v5028_v33, %v7995_v49  ;;  %5327 = vmatpush3.bf16.msra.mxu1 %v5854_v7  ;;  %v5858_v49 = vld [vmem:[%s8219_s3 + $0x590] sm:$0xff]  }
 0x2c8   :  { %v5030_v60 = vpop.f32.mrf.mxu1  ;;  %5328 = vmatprep.subr.bf16.mxu1 %v5855_v53 }
 0x2ca   :  { %v5032_v22 = vpop.f32.mrf.mxu1  ;;  %4006 = vmatmul.mubr.bf16.gmra.mxu1 %v7431_v47 }
 0x2cb   :  { %4012 = vmatprep.mubr.bf16.mxu1 %v8281_v31  ;;  %5329 = vmatpush3.bf16.msra.mxu1 %v5856_v29 }
 0x2cc   :  { %v5033_v2 = vpop.f32.mrf.mxu1  ;;  %5330 = vmatprep.subr.bf16.mxu1 %v5857_v25 }
 0x2cd   :  { %v1745_v2 = vpack.c.bf16 %v7780_v10, %v7780_v10 }
 0x2ce   :  { %v5035_v52 = vpop.f32.mrf.mxu1 }
 0x2cf   :  { %5331 = vmatpush3.bf16.msra.mxu1 %v5858_v49 }
 0x2d0   :  { %v5036_v47 = vpop.f32.mrf.mxu1  ;;  %5332 = vmatprep.subr.bf16.mxu1 %v5859_v34 }
 0x2d2   :  { %v5038_v11 = vpop.f32.mrf.mxu1  ;;  %4013 = vmatmul.mubr.bf16.gmra.mxu1 %v8282_v59  ;;  %v5296_v36 = vpop.f32.mrf.mxu0 }
 0x2d3   :  { %4018 = vmatprep.mubr.bf16.mxu1 %v1742_v61  ;;  %5333 = vmatpush3.bf16.msra.mxu1 %v5860_v13 }
 0x2d4   :  { %v5039_v16 = vpop.f32.mrf.mxu1  ;;  %v5297_v15 = vpop.f32.mrf.mxu0  ;;  %5334 = vmatprep.subr.bf16.mxu1 %v5861_v41 }
 0x2d6   :  { %v5041_v56 = vpop.f32.mrf.mxu1  ;;  %v5299_v51 = vpop.f32.mrf.mxu0 }
 0x2d7   :  { %5335 = vmatpush3.bf16.msra.mxu1 %v5862_v58 }
 0x2d8   :  { %v5042_v14 = vpop.f32.mrf.mxu1  ;;  %v5300_v46 = vpop.f32.mrf.mxu0  ;;  %5629 = vmatprep.subr.mxu1 %v8260_v21 }
 0x2d9   :  { %v8106_v24 = vadd.f32 %v5300_v46, %v5299_v51 }
 0x2da   :  { %v5060_v1 = vpop.f32.mrf.mxu1  ;;  %4019 = vmatmul.mubr.bf16.gmra.mxu1 %v1741_v63  ;;  %v5302_v62 = vpop.f32.mrf.mxu0 }
 0x2db   :  { %4124 = vmatprep.mubr.bf16.mxu1 %v7382_v9  ;;  %v8283_v9 = vpack.c.bf16 %v8276_v23, %v7424_v27 }
 0x2dc   :  { %v5061_v45 = vpop.f32.mrf.mxu1  ;;  %v5303_v30 = vpop.f32.mrf.mxu0 }
 0x2dd   :  { %v5062_v38 = vadd.f32 %v5061_v45, %v5060_v1  ;;  %v8109_v43 = vadd.f32 %v5303_v30, %v5302_v62  ;;  %v4236_v1 = vld [vmem:[%s8222_s5 + $0x38] sm:$0xff] }
 0x2de   :  { %v5063_v54 = vpop.f32.mrf.mxu1  ;;  %v5305_v48 = vpop.f32.mrf.mxu0 }
 0x2df   :  { %v3725_v28 = vadd.f32 %v5062_v38, %v8032_v39  ;;  %v8284_v39 = vpack.c.bf16 %v7560_v12, %v7354_v42 }
 0x2e0   :  { %v5064_v20 = vpop.f32.mrf.mxu1  ;;  %v5306_v40 = vpop.f32.mrf.mxu0 }
 0x2e1   :  { %v5065_v18 = vadd.f32 %v5064_v20, %v5063_v54  ;;  %v4235_v20 = vld [vmem:[%s8222_s5 + $0x30] sm:$0xff] }
 0x2e2   :  { %v5066_v50 = vpop.f32.mrf.mxu1  ;;  %4125 = vmatmul.mubr.bf16.vlgmr.msra.gmra.mxu1 %v7386_v35 }
 0x2e3   :  { %v3728_v5 = vadd.f32 %v5065_v18, %v8042_v19  ;;  %4132 = vmatprep.mubr.bf16.mxu1 %v8283_v9  ;;  %5630 = vmatpush3.msra.mxu1 %v4236_v1  ;;  %v4234_v9 = vld [vmem:[%s8222_s5 + $0x28] sm:$0xff] }
 0x2e4   :  { %v5067_v0 = vpop.f32.mrf.mxu1  ;;  %5631 = vmatprep.subr.mxu1 %v8260_v21 }
 0x2e5   :  { %5632 = vmatpush3.msra.mxu1 %v4235_v20 }
 0x2e6   :  { %v5069_v7 = vpop.f32.mrf.mxu1  ;;  %5633 = vmatprep.subr.mxu1 %v8260_v21 }
 0x2e7   :  { %5634 = vmatpush3.msra.mxu1 %v4234_v9  ;;  %v4319_v9 = vld [vmem:[%s8223_s7] sm:$0xff] }
 0x2e8   :  { %v5070_v32 = vpop.f32.mrf.mxu1  ;;  %5635 = vmatprep.subr.mxu1 %v8260_v21 }
 0x2e9   :  { %v5071_v53 = vadd.f32 %v5070_v32, %v5069_v7 }
 0x2ea   :  { %v5072_v33 = vpop.f32.mrf.mxu1  ;;  %4133 = vmatmul.mubr.bf16.gmra.mxu1 %v8284_v39 }
 0x2eb   :  { %v3735_v44 = vadd.f32 %v5071_v53, %v8063_v57  ;;  %4139 = vmatprep.mubr.bf16.mxu1 %v8281_v31  ;;  %v1746_v57 = vpack.c.bf16 %v7871_v6, %v7871_v6 }
 0x2ec   :  { %v5073_v35 = vpop.f32.mrf.mxu1 }
 0x2ed   :  { %v5074_v29 = vadd.f32 %v5073_v35, %v5072_v33 }
 0x2ee   :  { %v5075_v19 = vpop.f32.mrf.mxu1 }
 0x2ef   :  { %v3740_v60 = vadd.f32 %v5074_v29, %v8075_v17 }
 0x2f0   :  { %v5076_v27 = vpop.f32.mrf.mxu1 }
 0x2f2   :  { %v5078_v23 = vpop.f32.mrf.mxu1  ;;  %4140 = vmatmul.mubr.bf16.gmra.mxu1 %v8282_v59 }
 0x2f3   :  { %4146 = vmatprep.mubr.bf16.mxu1 %v1721_v26 }
 0x2f4   :  { %v5079_v25 = vpop.f32.mrf.mxu1 }
 0x2f6   :  { %v5081_v42 = vpop.f32.mrf.mxu1 }
 0x2f8   :  { %v5082_v12 = vpop.f32.mrf.mxu1 }
 0x2fa   :  { %v5084_v22 = vpop.f32.mrf.mxu1  ;;  %4147 = vmatmul.mubr.bf16.gmra.mxu1 %v1720_v8 }
 0x2fb   :  { %4152 = vmatprep.mubr.bf16.mxu1 %v1746_v57 }
 0x2fc   :  { %v5085_v17 = vpop.f32.mrf.mxu1 }
 0x2fe   :  { %v5087_v31 = vpop.f32.mrf.mxu1 }
 0x2ff   :  { %v4232_v31 = vld [vmem:[%s8222_s5 + $0x18] sm:$0xff] }
 0x300   :  { %v5088_v49 = vpop.f32.mrf.mxu1 }
 0x301   :  { %v4231_v49 = vld [vmem:[%s8222_s5 + $0x10] sm:$0xff] }
 0x302   :  { %v5106_v34 = vpop.f32.mrf.mxu1  ;;  %4153 = vmatmul.mubr.bf16.gmra.mxu1 %v1745_v2 }
 0x303   :  { %5645 = vmatprep.mubr.msk.f32.mxu1 %vm5866_vm1, %v8260_v21 }
 0x304   :  { %v5107_v26 = vpop.f32.mrf.mxu1 }
 0x305   :  { %v5108_v52 = vadd.f32 %v5107_v26, %v5106_v34 }
 0x306   :  { %v5109_v6 = vpop.f32.mrf.mxu1 }
 0x307   :  { %v3792_v13 = vadd.f32 %v5108_v52, %v3725_v28 }
 0x308   :  { %v5110_v47 = vpop.f32.mrf.mxu1 }
 0x309   :  { %v5111_v41 = vadd.f32 %v5110_v47, %v5109_v6 }
 0x30a   :  { %v5112_v3 = vpop.f32.mrf.mxu1  ;;  %v5308_v4 = vpop.f32.mrf.mxu0 }
 0x30b   :  { %v8136_v8 = vadd.f32 %v5111_v41, %v3728_v5 }
 0x30c   :  { %v5113_v61 = vpop.f32.mrf.mxu1  ;;  %v5309_v11 = vpop.f32.mrf.mxu0 }
 0x30d   :  { %v4230_v61 = vld [vmem:[%s8222_s5 + $0x8] sm:$0xff] }
 0x30e   :  { %v5115_v59 = vpop.f32.mrf.mxu1  ;;  %v5311_v36 = vpop.f32.mrf.mxu0 }
 0x310   :  { %v5116_v10 = vpop.f32.mrf.mxu1  ;;  %v5312_v58 = vpop.f32.mrf.mxu0 }
 0x311   :  { %v5117_v16 = vadd.f32 %v5116_v10, %v5115_v59 }
 0x312   :  { %v5118_v15 = vpop.f32.mrf.mxu1  ;;  %v5314_v56 = vpop.f32.mrf.mxu0 }
 0x313   :  { %v8138_v51 = vadd.f32 %v5117_v16, %v3735_v44  ;;  %v4229_v16 = vld [vmem:[%s8222_s5] sm:$0xff] }
 0x314   :  { %v5119_v14 = vpop.f32.mrf.mxu1  ;;  %v5315_v46 = vpop.f32.mrf.mxu0 }
 0x315   :  { %v5120_v63 = vadd.f32 %v5119_v14, %v5118_v15 }
 0x316   :  { %v5121_v62 = vpop.f32.mrf.mxu1  ;;  %v5317_v45 = vpop.f32.mrf.mxu0 }
 0x317   :  { %v8143_v30 = vadd.f32 %v5120_v63, %v3740_v60  ;;  %v4233_v60 = vld [vmem:[%s8222_s5 + $0x20] sm:$0xff] }
 0x318   :  { %v5122_v38 = vpop.f32.mrf.mxu1  ;;  %v5318_v54 = vpop.f32.mrf.mxu0  ;;  %5636 = vmatpush3.msra.mxu1 %v4233_v60 }
 0x319   :  { %5637 = vmatprep.subr.mxu1 %v8260_v21 }
 0x31a   :  { %v5124_v48 = vpop.f32.mrf.mxu1  ;;  %v8146_v28 = vpop.f32.mrf.mxu0  ;;  %5638 = vmatpush3.msra.mxu1 %v4232_v31 }
 0x31b   :  { %5639 = vmatprep.subr.mxu1 %v8260_v21 }
 0x31c   :  { %v5125_v40 = vpop.f32.mrf.mxu1  ;;  %v5611_v18 = vpop.f32.mrf.mxu0  ;;  %5640 = vmatpush3.msra.mxu1 %v4231_v49 }
 0x31d   :  { %5641 = vmatprep.subr.mxu1 %v8260_v21  ;;  %v4321_v40 = vld [vmem:[%s8223_s7 + $0x10] sm:$0xff] }
 0x31e   :  { %v5127_v50 = vpop.f32.mrf.mxu1  ;;  %v8152_v5 = vpop.f32.mrf.mxu0  ;;  %5642 = vmatpush3.msra.mxu1 %v4230_v61 }
 0x31f   :  { %5643 = vmatprep.subr.mxu1 %v8260_v21 }
 0x320   :  { %v5128_v0 = vpop.f32.mrf.mxu1  ;;  %v5612_v7 = vpop.f32.mrf.mxu0  ;;  %5644 = vmatpush3.msra.mxu1 %v4229_v16 }
 0x322   :  { %v5130_v32 = vpop.f32.mrf.mxu1  ;;  %v4201_v53 = vpop.f32.mrf.mxu0 }
 0x324   :  { %v5131_v33 = vpop.f32.mrf.mxu1  ;;  %v5615_v39 = vpop.f32.mrf.mxu0 }
 0x326   :  { %v5133_v44 = vpop.f32.mrf.mxu1  ;;  %v8158_v35 = vpop.f32.mrf.mxu0 }
 0x328   :  { %v5134_v29 = vpop.f32.mrf.mxu1  ;;  %v5616_v19 = vpop.f32.mrf.mxu0 }
 0x32a   :  { %v5152_v27 = vpop.f32.mrf.mxu1  ;;  %v8163_v23 = vpop.f32.mrf.mxu0 }
 0x32c   :  { %v5153_v25 = vpop.f32.mrf.mxu1  ;;  %v5619_v42 = vpop.f32.mrf.mxu0 }
 0x32d   :  { %v5154_v12 = vadd.f32 %v5153_v25, %v5152_v27 }
 0x32e   :  { %v5155_v57 = vpop.f32.mrf.mxu1  ;;  %v4211_v22 = vpop.f32.mrf.mxu0 }
 0x32f   :  { %v3859_v17 = vadd.f32 %v5154_v12, %v3792_v13 }
 0x330   :  { %v5156_v2 = vpop.f32.mrf.mxu1  ;;  %v5620_v34 = vpop.f32.mrf.mxu0 }
 0x331   :  { %v5157_v26 = vadd.f32 %v5156_v2, %v5155_v57 }
 0x332   :  { %v5158_v52 = vpop.f32.mrf.mxu1  ;;  %v4215_v6 = vpop.f32.mrf.mxu0 }
 0x333   :  { %v3862_v47 = vadd.f32 %v5157_v26, %v8136_v8 }
 0x334   :  { %v5159_v13 = vpop.f32.mrf.mxu1  ;;  %v5623_v41 = vpop.f32.mrf.mxu0 }
 0x336   :  { %v5161_v3 = vpop.f32.mrf.mxu1  ;;  %v4217_v4 = vpop.f32.mrf.mxu0 }
 0x338   :  { %v5162_v11 = vpop.f32.mrf.mxu1  ;;  %v5624_v59 = vpop.f32.mrf.mxu0 }
 0x339   :  { %v5163_v36 = vadd.f32 %v5162_v11, %v5161_v3 }
 0x33a   :  { %v5164_v10 = vpop.f32.mrf.mxu1  ;;  %v4221_v58 = vpop.f32.mrf.mxu0 }
 0x33b   :  { %v3869_v8 = vadd.f32 %v5163_v36, %v8138_v51  ;;  %v4322_v51 = vld [vmem:[%s8223_s7 + $0x18] sm:$0xff] }
 0x33c   :  { %v5165_v15 = vpop.f32.mrf.mxu1  ;;  %v5627_v56 = vpop.f32.mrf.mxu0  ;;  %5649 = vmatpush3.msra.mxu0 %v4322_v51 }
 0x33d   :  { %v5166_v14 = vadd.f32 %v5165_v15, %v5164_v10  ;;  %5650 = vmatprep.subr.mxu0 %v8260_v21 }
 0x33e   :  { %v5167_v46 = vpop.f32.mrf.mxu1  ;;  %v4223_v63 = vpop.f32.mrf.mxu0  ;;  %5651 = vmatpush3.msra.mxu0 %v4321_v40 }
 0x33f   :  { %v3874_v1 = vadd.f32 %v5166_v14, %v8143_v30  ;;  %v4320_v30 = vld [vmem:[%s8223_s7 + $0x8] sm:$0xff]  ;;  %5652 = vmatprep.subr.mxu0 %v8260_v21 }
 0x340   :  { %v5168_v62 = vpop.f32.mrf.mxu1  ;;  %v5628_v45 = vpop.f32.mrf.mxu0  ;;  %5653 = vmatpush3.msra.mxu0 %v4320_v30 }
 0x341   :  { %5654 = vmatprep.subr.mxu0 %v8260_v21 }
 0x342   :  { %v5170_v38 = vpop.f32.mrf.mxu1  ;;  %5655 = vmatpush3.msra.mxu0 %v4319_v9 }
 0x344   :  { %v5171_v54 = vpop.f32.mrf.mxu1 }
 0x346   :  { %v5173_v48 = vpop.f32.mrf.mxu1 }
 0x348   :  { %v5174_v20 = vpop.f32.mrf.mxu1 }
 0x34a   :  { %v5176_v18 = vpop.f32.mrf.mxu1 }
 0x34c   :  { %v5177_v50 = vpop.f32.mrf.mxu1 }
 0x34e   :  { %v5179_v0 = vpop.f32.mrf.mxu1 }
 0x350   :  { %v5180_v7 = vpop.f32.mrf.mxu1 }
 0x352   :  { %v5198_v32 = vpop.f32.mrf.mxu1 }
 0x354   :  { %v5199_v53 = vpop.f32.mrf.mxu1 }
 0x355   :  { %v5200_v33 = vadd.f32 %v5199_v53, %v5198_v32 }
 0x356   :  { %v5201_v39 = vpop.f32.mrf.mxu1 }
 0x357   :  { %v3926_v44 = vadd.f32 %v5200_v33, %v3859_v17 }
 0x358   :  { %v5202_v29 = vpop.f32.mrf.mxu1 }
 0x359   :  { %v5203_v19 = vadd.f32 %v5202_v29, %v5201_v39 }
 0x35a   :  { %v5204_v60 = vpop.f32.mrf.mxu1 }
 0x35b   :  { %v3929_v27 = vadd.f32 %v5203_v19, %v3862_v47 }
 0x35c   :  { %v5205_v25 = vpop.f32.mrf.mxu1 }
 0x35e   :  { %v5207_v42 = vpop.f32.mrf.mxu1 }
 0x360   :  { %v5208_v12 = vpop.f32.mrf.mxu1 }
 0x361   :  { %v5209_v57 = vadd.f32 %v5208_v12, %v5207_v42 }
 0x362   :  { %v5210_v22 = vpop.f32.mrf.mxu1 }
 0x363   :  { %v3936_v31 = vadd.f32 %v5209_v57, %v3869_v8 }
 0x364   :  { %v5211_v49 = vpop.f32.mrf.mxu1 }
 0x365   :  { %v5212_v2 = vadd.f32 %v5211_v49, %v5210_v22 }
 0x366   :  { %v5213_v21 = vpop.f32.mrf.mxu1 }
 0x367   :  { %v3941_v34 = vadd.f32 %v5212_v2, %v3874_v1 }
 0x368   :  { %v5214_v26 = vpop.f32.mrf.mxu1 }
 0x36a   :  { %v5216_v52 = vpop.f32.mrf.mxu1 }
 0x36c   :  { %v5217_v6 = vpop.f32.mrf.mxu1 }
 0x36e   :  { %v5219_v13 = vpop.f32.mrf.mxu1 }
 0x370   :  { %v5220_v41 = vpop.f32.mrf.mxu1 }
 0x372   :  { %v5222_v17 = vpop.f32.mrf.mxu1 }
 0x374   :  { %v5223_v3 = vpop.f32.mrf.mxu1 }
 0x376   :  { %v5225_v4 = vpop.f32.mrf.mxu1 }
 0x378   :  { %v5226_v61 = vpop.f32.mrf.mxu1 }
 0x37a   :  { %v5244_v47 = vpop.f32.mrf.mxu1 }
 0x37c   :  { %v5245_v11 = vpop.f32.mrf.mxu1 }
 0x37d   :  { %v5246_v59 = vadd.f32 %v5245_v11, %v5244_v47 }
 0x37e   :  { %v5247_v36 = vpop.f32.mrf.mxu1 }
 0x37f   :  { %v3993_v10 = vadd.f32 %v5246_v59, %v3926_v44 }
 0x380   :  { %v5248_v58 = vpop.f32.mrf.mxu1 }
 0x381   :  { %v5249_v8 = vadd.f32 %v5248_v58, %v5247_v36  ;;  %v4060_v16 = vadd.f32 %v7992_v55, %v3993_v10 }
 0x382   :  { %v5250_v15 = vpop.f32.mrf.mxu1 }
 0x383   :  { %v3996_v56 = vadd.f32 %v5249_v8, %v3929_v27 }
 0x384   :  { %v5251_v14 = vpop.f32.mrf.mxu1 }
 0x385   :  { %v4063_v46 = vadd.f32 %v8003_v37, %v3996_v56 }
 0x386   :  { %v5253_v63 = vpop.f32.mrf.mxu1 }
 0x388   :  { %v5254_v1 = vpop.f32.mrf.mxu1 }
 0x389   :  { %v5255_v62 = vadd.f32 %v5254_v1, %v5253_v63 }
 0x38a   :  { %v5256_v45 = vpop.f32.mrf.mxu1 }
 0x38b   :  { %v4003_v38 = vadd.f32 %v5255_v62, %v3936_v31 }
 0x38c   :  { %v5257_v54 = vpop.f32.mrf.mxu1 }
 0x38d   :  { %v5258_v48 = vadd.f32 %v5257_v54, %v5256_v45  ;;  %v4070_v20 = vadd.f32 %v8106_v24, %v4003_v38 }
 0x38e   :  { %v5259_v51 = vpop.f32.mrf.mxu1 }
 0x38f   :  { %v4008_v40 = vadd.f32 %v5258_v48, %v3941_v34 }
 0x390   :  { %v5260_v18 = vpop.f32.mrf.mxu1 }
 0x391   :  { %v4075_v30 = vadd.f32 %v8109_v43, %v4008_v40 }
 0x392   :  { %v5262_v55 = vpop.f32.mrf.mxu1 }
 0x394   :  { %v5263_v50 = vpop.f32.mrf.mxu1 }
 0x396   :  { %v5265_v9 = vpop.f32.mrf.mxu1 }
 0x398   :  { %v5266_v0 = vpop.f32.mrf.mxu1 }
 0x39a   :  { %v5268_v7 = vpop.f32.mrf.mxu1 }
 0x39c   :  { %v5269_v37 = vpop.f32.mrf.mxu1 }
 0x39e   :  { %v5271_v32 = vpop.f32.mrf.mxu1 }
 0x3a0   :  { %v5272_v53 = vpop.f32.mrf.mxu1 }
 0x3a2   :  { %v5336_v33 = vpop.f32.mrf.mxu1 }
 0x3a4   :  { %v5337_v39 = vpop.f32.mrf.mxu1 }
 0x3a5   :  { %v5338_v44 = vadd.f32 %v5337_v39, %v5336_v33 }
 0x3a6   :  { %v5339_v29 = vpop.f32.mrf.mxu1 }
 0x3a7   :  { %v4127_v60 = vadd.f32 %v5338_v44, %v4060_v16 }
 0x3a8   :  { %v5340_v19 = vpop.f32.mrf.mxu1 }
 0x3a9   :  { %v5341_v24 = vadd.f32 %v5340_v19, %v5339_v29  ;;  %v4194_v43 = vadd.f32 %v8146_v28, %v4127_v60 }
 0x3aa   :  { %v5342_v27 = vpop.f32.mrf.mxu1 }
 0x3ab   :  { %v4130_v25 = vadd.f32 %v5341_v24, %v4063_v46 }
 0x3ac   :  { %v5343_v42 = vpop.f32.mrf.mxu1 }
 0x3ad   :  { %v4197_v12 = vadd.f32 %v8152_v5, %v4130_v25 }
 0x3ae   :  { %v5345_v57 = vpop.f32.mrf.mxu1 }
 0x3af   :  { %v4226_v22 = vmax.f32 %v4194_v43, %v4197_v12 }
 0x3b0   :  { %v5346_v31 = vpop.f32.mrf.mxu1 }
 0x3b1   :  { %v5347_v49 = vadd.f32 %v5346_v31, %v5345_v57 }
 0x3b2   :  { %v5348_v2 = vpop.f32.mrf.mxu1 }
 0x3b3   :  { %v4137_v21 = vadd.f32 %v5347_v49, %v4070_v20 }
 0x3b4   :  { %v5349_v34 = vpop.f32.mrf.mxu1 }
 0x3b5   :  { %v4204_v26 = vadd.f32 %v8158_v35, %v4137_v21  ;;  %v5350_v52 = vadd.f32 %v5349_v34, %v5348_v2  ;;  %v4710_v35 = vld [vmem:[%s8224_s6] ss:$0 sm:$0xff] }
 0x3b6   :  { %v5351_v6 = vpop.f32.mrf.mxu1 }
 0x3b7   :  { %v4227_v13 = vmax.f32 %v4226_v22, %v4204_v26  ;;  %v4142_v41 = vadd.f32 %v5350_v52, %v4075_v30 }
 0x3b8   :  { %v5352_v17 = vpop.f32.mrf.mxu1 }
 0x3b9   :  { %v4209_v3 = vadd.f32 %v8163_v23, %v4142_v41  ;;  %v4712_v23 = vld [vmem:[%s8225_s8] ss:$0 sm:$0xff] }
 0x3ba   :  { %v5354_v4 = vpop.f32.mrf.mxu1 }
 0x3bb   :  { %v4228_v28 = vmax.f32 %v4227_v13, %v4209_v3 }
 0x3bc   :  { %v5355_v5 = vpop.f32.mrf.mxu1 }
 0x3bd   :  { %5646 = vmatmul.mubr.msk.f32.vlgmr.msra.gmra.mxu1 %vm4244_vm2, %v4228_v28 }
 0x3be   :  { %v5357_v61 = vpop.f32.mrf.mxu1 }
 0x3c0   :  { %v5358_v47 = vpop.f32.mrf.mxu1 }
 0x3c2   :  { %v5360_v11 = vpop.f32.mrf.mxu1 }
 0x3c4   :  { %v5361_v59 = vpop.f32.mrf.mxu1 }
 0x3c6   :  { %v5363_v36 = vpop.f32.mrf.mxu1 }
 0x3c8   :  { %v5364_v10 = vpop.f32.mrf.mxu1 }
 0x47d   :  { %v4314_v58 = vpop.f32.mrf.mxu1 }
 0x47e   :  { %v4315_v8 = vadd.f32 %v4710_v35, %v4314_v58 }
 0x47f   :  { %v5647_v16 = vpop.f32.mrf.mxu1 }
 0x480   :  { %v4318_v15 = vmax.f32 %v4315_v8, 0.0 }
 0x482   :  { %5657 = vmatmul.mubr.msk.f32.vlgmr.msra.gmra.mxu0 %vm343_vm0, %v4318_v15 }
 0x542   :  { %v4399_v56 = vpop.f32.mrf.mxu0 }
 0x543   :  { %v4400_v14 = vadd.f32 %v4712_v23, %v4399_v56 }
 0x544   :  { %v5658_v46 = vpop.f32.mrf.mxu0 }
 0x545   :  { %4403 = vst [vmem:[%s8226_s9] sm:$0xff] %v4400_v14 }

</bundles_post_ra>
